<compile_context>
chip_gen: v7x
topology: tpu7x:2x2x1
jax: 0.10.0
libtpu: 0.0.40
codegen_flags: <defaults>
</compile_context>

<pallas_src>
import functools

import jax
import jax.numpy as jnp
from jax import lax
from jax.experimental import pallas as pl
from jax.experimental.pallas import tpu as pltpu


def _cross_attention_kernel(xj_ref, xb_ref, xv_ref, pe_ref,
                            wqkv_ref, bqkv_ref, wp_ref, bp_ref,
                            o_ref, *, num_heads, scale):
    """One batch element per grid step; all operands resident in VMEM."""
    f32 = jnp.float32

    # pos-embed add (pos_drop with p=0.0 is the identity).
    xj = xj_ref[0] + pe_ref[0]                     # (N, C)  joints
    xb = xb_ref[0] + pe_ref[1]                     # (N, C)  bones
    xv = xv_ref[0] + pe_ref[2]                     # (N, C)  velocity

    x_jb = jnp.concatenate([xj, xb], axis=0)       # (2N, C) = cat([joints, bones])
    x_jv = jnp.concatenate([xj, xv], axis=0)       # (2N, C) = cat([joints, velocity])

    def linear(x, i):
        # Full-width (C x C) lane-dense MXU matmul with f32 accumulation.
        return jnp.dot(x, wqkv_ref[i], preferred_element_type=f32) + bqkv_ref[i]

    q_jb = linear(xj, 0)        # (N, C)
    k_jb = linear(x_jb, 1)      # (2N, C)
    v_jb = linear(x_jb, 2)      # (2N, C)
    q_jv = linear(xj, 3)        # (N, C)
    k_jv = linear(x_jv, 4)      # (2N, C)
    v_jv = linear(x_jv, 5)      # (2N, C)

    C = q_jb.shape[-1]
    d = C // num_heads

    def softmax_last(x):
        m = jnp.max(x, axis=-1, keepdims=True)
        e = jnp.exp(x - m)
        return e / jnp.sum(e, axis=-1, keepdims=True)

    def fuse(a, b):
        # (a * softmax(b) + b * softmax(a)) / 2, softmax over head_dim.
        return 0.5 * (a * softmax_last(b) + b * softmax_last(a))

    head_outs = []
    for h in range(num_heads):                      # static unroll; heads independent
        lo, hi = h * d, (h + 1) * d                 # lane-aligned slices (d = 128 in demo)
        qh = fuse(q_jb[:, lo:hi], q_jv[:, lo:hi])   # (N, d)
        kh = fuse(k_jb[:, lo:hi], k_jv[:, lo:hi])   # (2N, d)
        vh = fuse(v_jb[:, lo:hi], v_jv[:, lo:hi])   # (2N, d)

        # q @ k^T (contract over head_dim) -> (N, 2N), scaled, softmaxed.
        attn = lax.dot_general(qh, kh, (((1,), (1,)), ((), ())),
                               preferred_element_type=f32) * scale
        attn = softmax_last(attn)                   # attn_drop(p=0) is identity
        head_outs.append(jnp.dot(attn, vh, preferred_element_type=f32))  # (N, d)

    # Concat over heads along channels == (attn @ v).transpose(1,2).view(B, N, C).
    x = jnp.concatenate(head_outs, axis=1)          # (N, C)
    out = jnp.dot(x, wp_ref[...], preferred_element_type=f32) + bp_ref[...]
    o_ref[0] = out.astype(o_ref.dtype)              # proj_drop(p=0) is identity


@functools.partial(jax.jit, static_argnames=("num_heads", "scale"))
def cross_attention_pallas(joints, bones, velocity, params, *, num_heads, scale):
    """joints/bones/velocity: (B, C, N). Returns (B, C, N), matching the module."""
    B, C, N = joints.shape
    assert C % num_heads == 0

    # forward() starts with permute(0, 2, 1): token-major layout for the matmuls.
    xj = jnp.transpose(joints, (0, 2, 1))           # (B, N, C)
    xb = jnp.transpose(bones, (0, 2, 1))
    xv = jnp.transpose(velocity, (0, 2, 1))

    pe = jnp.stack([params["pe_j"], params["pe_b"], params["pe_v"]], axis=0)        # (3, N, C)
    wqkv = jnp.stack([params["wq_jb"], params["wk_jb"], params["wv_jb"],
                      params["wq_jv"], params["wk_jv"], params["wv_jv"]], axis=0)   # (6, C, C)
    bqkv = jnp.stack([params["bq_jb"], params["bk_jb"], params["bv_jb"],
                      params["bq_jv"], params["bk_jv"], params["bv_jv"]],
                     axis=0).reshape(6, 1, C)                                       # (6, 1, C)
    bp = params["bp"].reshape(1, C)

    kernel = functools.partial(_cross_attention_kernel,
                               num_heads=num_heads, scale=scale)

    batch_spec = pl.BlockSpec((1, N, C), lambda b: (b, 0, 0))
    const3 = lambda b: (0, 0, 0)
    const2 = lambda b: (0, 0)

    out = pl.pallas_call(
        kernel,
        out_shape=jax.ShapeDtypeStruct((B, N, C), joints.dtype),
        grid_spec=pltpu.PrefetchScalarGridSpec(
            num_scalar_prefetch=0,
            grid=(B,),
            in_specs=[
                batch_spec,                              # joints  (token-major)
                batch_spec,                              # bones
                batch_spec,                              # velocity
                pl.BlockSpec((3, N, C), const3),         # pos embeds (VMEM-resident)
                pl.BlockSpec((6, C, C), const3),         # 6 QKV weights (VMEM-resident)
                pl.BlockSpec((6, 1, C), const3),         # 6 QKV biases
                pl.BlockSpec((C, C), const2),            # proj weight
                pl.BlockSpec((1, C), const2),            # proj bias
            ],
            out_specs=pl.BlockSpec((1, N, C), lambda b: (b, 0, 0)),   # lane-dense (C mult. of 128)
        ),
        compiler_params=pltpu.CompilerParams(
            dimension_semantics=("parallel",),           # batch axis -> megacore split
            vmem_limit_bytes=32 * 1024 * 1024,
        ),
    )(xj, xb, xv, pe, wqkv, bqkv, params["wp"], bp)

    # forward() ends with x.permute(0, 2, 1).
    return jnp.transpose(out, (0, 2, 1))


def _reference_cross_attention(joints, bones, velocity, p, num_heads, scale):
    """Pure-JAX reference mirroring the PyTorch forward (f32, HIGHEST precision)."""
    hp = lax.Precision.HIGHEST
    xj = jnp.transpose(joints, (0, 2, 1)) + p["pe_j"][None]
    xb = jnp.transpose(bones, (0, 2, 1)) + p["pe_b"][None]
    xv = jnp.transpose(velocity, (0, 2, 1)) + p["pe_v"][None]
    B, N, C = xj.shape
    d = C // num_heads

    def lin(x, w, b):
        return jnp.einsum("bnc,cd->bnd", x, w, precision=hp) + b

    def heads(x, n):
        return x.reshape(B, n, num_heads, d).transpose(0, 2, 1, 3)

    x_jb = jnp.concatenate([xj, xb], axis=1)
    x_jv = jnp.concatenate([xj, xv], axis=1)
    q_jb = heads(lin(xj, p["wq_jb"], p["bq_jb"]), N)
    k_jb = heads(lin(x_jb, p["wk_jb"], p["bk_jb"]), 2 * N)
    v_jb = heads(lin(x_jb, p["wv_jb"], p["bv_jb"]), 2 * N)
    q_jv = heads(lin(xj, p["wq_jv"], p["bq_jv"]), N)
    k_jv = heads(lin(x_jv, p["wk_jv"], p["bk_jv"]), 2 * N)
    v_jv = heads(lin(x_jv, p["wv_jv"], p["bv_jv"]), 2 * N)

    sm = jax.nn.softmax
    q = 0.5 * (q_jb * sm(q_jv, -1) + q_jv * sm(q_jb, -1))
    k = 0.5 * (k_jb * sm(k_jv, -1) + k_jv * sm(k_jb, -1))
    v = 0.5 * (v_jb * sm(v_jv, -1) + v_jv * sm(v_jb, -1))

    attn = jnp.einsum("bhnd,bhmd->bhnm", q, k, precision=hp) * scale
    attn = sm(attn, -1)
    x = jnp.einsum("bhnm,bhmd->bhnd", attn, v, precision=hp)
    x = x.transpose(0, 2, 1, 3).reshape(B, N, C)
    x = jnp.einsum("bnc,cd->bnd", x, p["wp"], precision=hp) + p["bp"]
    return jnp.transpose(x, (0, 2, 1))


if __name__ == "__main__":
    # Small config consistent with the module: dim divisible by num_heads,
    # head_dim = dim // num_heads = 128 so per-head slices are lane-aligned.
    B = 2
    dim = 256
    num_heads = 2
    num_patches = 16
    qk_scale = 0.8            # module default: scale = qk_scale or head_dim**-0.5

    key = jax.random.PRNGKey(0)
    ks = jax.random.split(key, 20)

    def w(k):
        return jax.random.normal(k, (dim, dim), dtype=jnp.float32) * 0.02

    def b(k):
        return jax.random.normal(k, (dim,), dtype=jnp.float32) * 0.02

    params = {
        "wq_jb": w(ks[0]), "bq_jb": b(ks[1]),
        "wk_jb": w(ks[2]), "bk_jb": b(ks[3]),
        "wv_jb": w(ks[4]), "bv_jb": b(ks[5]),
        "wq_jv": w(ks[6]), "bq_jv": b(ks[7]),
        "wk_jv": w(ks[8]), "bk_jv": b(ks[9]),
        "wv_jv": w(ks[10]), "bv_jv": b(ks[11]),
        "wp": w(ks[12]), "bp": b(ks[13]),
        "pe_j": jax.random.normal(ks[14], (num_patches, dim), dtype=jnp.float32) * 0.02,
        "pe_b": jax.random.normal(ks[15], (num_patches, dim), dtype=jnp.float32) * 0.02,
        "pe_v": jax.random.normal(ks[16], (num_patches, dim), dtype=jnp.float32) * 0.02,
    }

    # Inputs are (B, dim, num_patches), as implied by the leading permute(0, 2, 1).
    joints = jax.random.normal(ks[17], (B, dim, num_patches), dtype=jnp.float32)
    bones = jax.random.normal(ks[18], (B, dim, num_patches), dtype=jnp.float32)
    velocity = jax.random.normal(ks[19], (B, dim, num_patches), dtype=jnp.float32)

    out = cross_attention_pallas(joints, bones, velocity, params,
                                 num_heads=num_heads, scale=qk_scale)
    out = jax.block_until_ready(out)

    ref = _reference_cross_attention(joints, bones, velocity, params,
                                     num_heads=num_heads, scale=qk_scale)
    assert out.shape == (B, dim, num_patches)
    assert jnp.allclose(out, ref, atol=2e-3, rtol=2e-2), (
        "mismatch vs JAX reference, max abs diff = "
        + str(float(jnp.max(jnp.abs(out - ref)))))

    print("KERNEL_OK")
</pallas_src>

<mosaic_0001>
module attributes {stable_mosaic.version = 11 : i64} {
  func.func @_cross_attention_kernel(%arg0: i32, %arg1: memref<1x16x256xf32, #tpu.memory_space<vmem>>, %arg2: memref<1x16x256xf32, #tpu.memory_space<vmem>>, %arg3: memref<1x16x256xf32, #tpu.memory_space<vmem>>, %arg4: memref<3x16x256xf32, #tpu.memory_space<vmem>>, %arg5: memref<6x256x256xf32, #tpu.memory_space<vmem>>, %arg6: memref<6x1x256xf32, #tpu.memory_space<vmem>>, %arg7: memref<256x256xf32, #tpu.memory_space<vmem>>, %arg8: memref<1x256xf32, #tpu.memory_space<vmem>>, %arg9: memref<1x16x256xf32, #tpu.memory_space<vmem>>) attributes {dimension_semantics = [#tpu.dimension_semantics<parallel>], iteration_bounds = array<i64: 2>, scalar_prefetch = 0 : i64, scratch_operands = 0 : i64, tpu.core_type = #tpu.core_type<tc>, window_params = [{transform_indices = @transform_0, window_bounds = array<i64: 1, 16, 256>}, {transform_indices = @transform_1, window_bounds = array<i64: 1, 16, 256>}, {transform_indices = @transform_2, window_bounds = array<i64: 1, 16, 256>}, {pipeline_mode = #tpu.pipeline_mode<synchronous>, transform_indices = @transform_3, window_bounds = array<i64: 3, 16, 256>}, {pipeline_mode = #tpu.pipeline_mode<synchronous>, transform_indices = @transform_4, window_bounds = array<i64: 6, 256, 256>}, {pipeline_mode = #tpu.pipeline_mode<synchronous>, transform_indices = @transform_5, window_bounds = array<i64: 6, 1, 256>}, {pipeline_mode = #tpu.pipeline_mode<synchronous>, transform_indices = @transform_6, window_bounds = array<i64: 256, 256>}, {pipeline_mode = #tpu.pipeline_mode<synchronous>, transform_indices = @transform_7, window_bounds = array<i64: 1, 256>}, {transform_indices = @transform_8, window_bounds = array<i64: 1, 16, 256>}]} {
    %c0 = arith.constant 0 : index
    %c0_0 = arith.constant 0 : index
    %c0_1 = arith.constant 0 : index
    %0 = vector.load %arg1[%c0, %c0_0, %c0_1] : memref<1x16x256xf32, #tpu.memory_space<vmem>>, vector<1x16x256xf32>
    %1 = vector.shape_cast %0 : vector<1x16x256xf32> to vector<16x256xf32>
    %c0_2 = arith.constant 0 : index
    %c0_3 = arith.constant 0 : index
    %c0_4 = arith.constant 0 : index
    %2 = vector.load %arg4[%c0_2, %c0_3, %c0_4] : memref<3x16x256xf32, #tpu.memory_space<vmem>>, vector<1x16x256xf32>
    %3 = vector.shape_cast %2 : vector<1x16x256xf32> to vector<16x256xf32>
    %4 = arith.addf %1, %3 : vector<16x256xf32>
    %c0_5 = arith.constant 0 : index
    %c0_6 = arith.constant 0 : index
    %c0_7 = arith.constant 0 : index
    %5 = vector.load %arg2[%c0_5, %c0_6, %c0_7] : memref<1x16x256xf32, #tpu.memory_space<vmem>>, vector<1x16x256xf32>
    %6 = vector.shape_cast %5 : vector<1x16x256xf32> to vector<16x256xf32>
    %c1 = arith.constant 1 : index
    %c0_8 = arith.constant 0 : index
    %c0_9 = arith.constant 0 : index
    %7 = vector.load %arg4[%c1, %c0_8, %c0_9] : memref<3x16x256xf32, #tpu.memory_space<vmem>>, vector<1x16x256xf32>
    %8 = vector.shape_cast %7 : vector<1x16x256xf32> to vector<16x256xf32>
    %9 = arith.addf %6, %8 : vector<16x256xf32>
    %c0_10 = arith.constant 0 : index
    %c0_11 = arith.constant 0 : index
    %c0_12 = arith.constant 0 : index
    %10 = vector.load %arg3[%c0_10, %c0_11, %c0_12] : memref<1x16x256xf32, #tpu.memory_space<vmem>>, vector<1x16x256xf32>
    %11 = vector.shape_cast %10 : vector<1x16x256xf32> to vector<16x256xf32>
    %c2 = arith.constant 2 : index
    %c0_13 = arith.constant 0 : index
    %c0_14 = arith.constant 0 : index
    %12 = vector.load %arg4[%c2, %c0_13, %c0_14] : memref<3x16x256xf32, #tpu.memory_space<vmem>>, vector<1x16x256xf32>
    %13 = vector.shape_cast %12 : vector<1x16x256xf32> to vector<16x256xf32>
    %14 = arith.addf %11, %13 : vector<16x256xf32>
    %15 = tpu.concatenate %4, %9 in 0 : vector<16x256xf32>, vector<16x256xf32> -> vector<32x256xf32>
    %16 = tpu.concatenate %4, %14 in 0 : vector<16x256xf32>, vector<16x256xf32> -> vector<32x256xf32>
    %c0_15 = arith.constant 0 : index
    %c0_16 = arith.constant 0 : index
    %c0_17 = arith.constant 0 : index
    %17 = vector.load %arg5[%c0_15, %c0_16, %c0_17] : memref<6x256x256xf32, #tpu.memory_space<vmem>>, vector<1x256x256xf32>
    %18 = vector.shape_cast %17 : vector<1x256x256xf32> to vector<256x256xf32>
    %cst = arith.constant dense<0.000000e+00> : vector<16x256xf32>
    %19 = tpu.matmul %4, %18, %cst {dimension_numbers = #tpu.dot_dimension_numbers<[1], [0], [0], [1], [0, 0, 1, 1], [], []>} : vector<16x256xf32>, vector<256x256xf32>, vector<16x256xf32> -> vector<16x256xf32>
    %c0_18 = arith.constant 0 : index
    %c0_19 = arith.constant 0 : index
    %c0_20 = arith.constant 0 : index
    %20 = vector.load %arg6[%c0_18, %c0_19, %c0_20] : memref<6x1x256xf32, #tpu.memory_space<vmem>>, vector<1x1x256xf32>
    %21 = vector.shape_cast %20 : vector<1x1x256xf32> to vector<1x256xf32>
    %22 = vector.broadcast %21 : vector<1x256xf32> to vector<16x256xf32>
    %23 = arith.addf %19, %22 : vector<16x256xf32>
    %c1_21 = arith.constant 1 : index
    %c0_22 = arith.constant 0 : index
    %c0_23 = arith.constant 0 : index
    %24 = vector.load %arg5[%c1_21, %c0_22, %c0_23] : memref<6x256x256xf32, #tpu.memory_space<vmem>>, vector<1x256x256xf32>
    %25 = vector.shape_cast %24 : vector<1x256x256xf32> to vector<256x256xf32>
    %cst_24 = arith.constant dense<0.000000e+00> : vector<32x256xf32>
    %26 = tpu.matmul %15, %25, %cst_24 {dimension_numbers = #tpu.dot_dimension_numbers<[1], [0], [0], [1], [0, 0, 1, 1], [], []>} : vector<32x256xf32>, vector<256x256xf32>, vector<32x256xf32> -> vector<32x256xf32>
    %c1_25 = arith.constant 1 : index
    %c0_26 = arith.constant 0 : index
    %c0_27 = arith.constant 0 : index
    %27 = vector.load %arg6[%c1_25, %c0_26, %c0_27] : memref<6x1x256xf32, #tpu.memory_space<vmem>>, vector<1x1x256xf32>
    %28 = vector.shape_cast %27 : vector<1x1x256xf32> to vector<1x256xf32>
    %29 = vector.broadcast %28 : vector<1x256xf32> to vector<32x256xf32>
    %30 = arith.addf %26, %29 : vector<32x256xf32>
    %c2_28 = arith.constant 2 : index
    %c0_29 = arith.constant 0 : index
    %c0_30 = arith.constant 0 : index
    %31 = vector.load %arg5[%c2_28, %c0_29, %c0_30] : memref<6x256x256xf32, #tpu.memory_space<vmem>>, vector<1x256x256xf32>
    %32 = vector.shape_cast %31 : vector<1x256x256xf32> to vector<256x256xf32>
    %cst_31 = arith.constant dense<0.000000e+00> : vector<32x256xf32>
    %33 = tpu.matmul %15, %32, %cst_31 {dimension_numbers = #tpu.dot_dimension_numbers<[1], [0], [0], [1], [0, 0, 1, 1], [], []>} : vector<32x256xf32>, vector<256x256xf32>, vector<32x256xf32> -> vector<32x256xf32>
    %c2_32 = arith.constant 2 : index
    %c0_33 = arith.constant 0 : index
    %c0_34 = arith.constant 0 : index
    %34 = vector.load %arg6[%c2_32, %c0_33, %c0_34] : memref<6x1x256xf32, #tpu.memory_space<vmem>>, vector<1x1x256xf32>
    %35 = vector.shape_cast %34 : vector<1x1x256xf32> to vector<1x256xf32>
    %36 = vector.broadcast %35 : vector<1x256xf32> to vector<32x256xf32>
    %37 = arith.addf %33, %36 : vector<32x256xf32>
    %c3 = arith.constant 3 : index
    %c0_35 = arith.constant 0 : index
    %c0_36 = arith.constant 0 : index
    %38 = vector.load %arg5[%c3, %c0_35, %c0_36] : memref<6x256x256xf32, #tpu.memory_space<vmem>>, vector<1x256x256xf32>
    %39 = vector.shape_cast %38 : vector<1x256x256xf32> to vector<256x256xf32>
    %cst_37 = arith.constant dense<0.000000e+00> : vector<16x256xf32>
    %40 = tpu.matmul %4, %39, %cst_37 {dimension_numbers = #tpu.dot_dimension_numbers<[1], [0], [0], [1], [0, 0, 1, 1], [], []>} : vector<16x256xf32>, vector<256x256xf32>, vector<16x256xf32> -> vector<16x256xf32>
    %c3_38 = arith.constant 3 : index
    %c0_39 = arith.constant 0 : index
    %c0_40 = arith.constant 0 : index
    %41 = vector.load %arg6[%c3_38, %c0_39, %c0_40] : memref<6x1x256xf32, #tpu.memory_space<vmem>>, vector<1x1x256xf32>
    %42 = vector.shape_cast %41 : vector<1x1x256xf32> to vector<1x256xf32>
    %43 = vector.broadcast %42 : vector<1x256xf32> to vector<16x256xf32>
    %44 = arith.addf %40, %43 : vector<16x256xf32>
    %c4 = arith.constant 4 : index
    %c0_41 = arith.constant 0 : index
    %c0_42 = arith.constant 0 : index
    %45 = vector.load %arg5[%c4, %c0_41, %c0_42] : memref<6x256x256xf32, #tpu.memory_space<vmem>>, vector<1x256x256xf32>
    %46 = vector.shape_cast %45 : vector<1x256x256xf32> to vector<256x256xf32>
    %cst_43 = arith.constant dense<0.000000e+00> : vector<32x256xf32>
    %47 = tpu.matmul %16, %46, %cst_43 {dimension_numbers = #tpu.dot_dimension_numbers<[1], [0], [0], [1], [0, 0, 1, 1], [], []>} : vector<32x256xf32>, vector<256x256xf32>, vector<32x256xf32> -> vector<32x256xf32>
    %c4_44 = arith.constant 4 : index
    %c0_45 = arith.constant 0 : index
    %c0_46 = arith.constant 0 : index
    %48 = vector.load %arg6[%c4_44, %c0_45, %c0_46] : memref<6x1x256xf32, #tpu.memory_space<vmem>>, vector<1x1x256xf32>
    %49 = vector.shape_cast %48 : vector<1x1x256xf32> to vector<1x256xf32>
    %50 = vector.broadcast %49 : vector<1x256xf32> to vector<32x256xf32>
    %51 = arith.addf %47, %50 : vector<32x256xf32>
    %c5 = arith.constant 5 : index
    %c0_47 = arith.constant 0 : index
    %c0_48 = arith.constant 0 : index
    %52 = vector.load %arg5[%c5, %c0_47, %c0_48] : memref<6x256x256xf32, #tpu.memory_space<vmem>>, vector<1x256x256xf32>
    %53 = vector.shape_cast %52 : vector<1x256x256xf32> to vector<256x256xf32>
    %cst_49 = arith.constant dense<0.000000e+00> : vector<32x256xf32>
    %54 = tpu.matmul %16, %53, %cst_49 {dimension_numbers = #tpu.dot_dimension_numbers<[1], [0], [0], [1], [0, 0, 1, 1], [], []>} : vector<32x256xf32>, vector<256x256xf32>, vector<32x256xf32> -> vector<32x256xf32>
    %c5_50 = arith.constant 5 : index
    %c0_51 = arith.constant 0 : index
    %c0_52 = arith.constant 0 : index
    %55 = vector.load %arg6[%c5_50, %c0_51, %c0_52] : memref<6x1x256xf32, #tpu.memory_space<vmem>>, vector<1x1x256xf32>
    %56 = vector.shape_cast %55 : vector<1x1x256xf32> to vector<1x256xf32>
    %57 = vector.broadcast %56 : vector<1x256xf32> to vector<32x256xf32>
    %58 = arith.addf %54, %57 : vector<32x256xf32>
    %59 = vector.extract_strided_slice %23 {offsets = [0, 0], sizes = [16, 128], strides = [1, 1]} : vector<16x256xf32> to vector<16x128xf32>
    %60 = vector.extract_strided_slice %44 {offsets = [0, 0], sizes = [16, 128], strides = [1, 1]} : vector<16x256xf32> to vector<16x128xf32>
    %cst_53 = arith.constant dense<0xFF800000> : vector<16xf32>
    %61 = vector.multi_reduction <maximumf>, %60, %cst_53 [1] : vector<16x128xf32> to vector<16xf32>
    %62 = vector.shape_cast %61 : vector<16xf32> to vector<16x1xf32>
    %63 = vector.broadcast %62 : vector<16x1xf32> to vector<16x128xf32>
    %64 = arith.subf %60, %63 : vector<16x128xf32>
    %65 = math.exp %64 : vector<16x128xf32>
    %cst_54 = arith.constant dense<0.000000e+00> : vector<16xf32>
    %66 = vector.multi_reduction <add>, %65, %cst_54 [1] : vector<16x128xf32> to vector<16xf32>
    %67 = vector.shape_cast %66 : vector<16xf32> to vector<16x1xf32>
    %68 = vector.broadcast %67 : vector<16x1xf32> to vector<16x128xf32>
    %69 = arith.divf %65, %68 : vector<16x128xf32>
    %70 = arith.mulf %59, %69 : vector<16x128xf32>
    %cst_55 = arith.constant dense<0xFF800000> : vector<16xf32>
    %71 = vector.multi_reduction <maximumf>, %59, %cst_55 [1] : vector<16x128xf32> to vector<16xf32>
    %72 = vector.shape_cast %71 : vector<16xf32> to vector<16x1xf32>
    %73 = vector.broadcast %72 : vector<16x1xf32> to vector<16x128xf32>
    %74 = arith.subf %59, %73 : vector<16x128xf32>
    %75 = math.exp %74 : vector<16x128xf32>
    %cst_56 = arith.constant dense<0.000000e+00> : vector<16xf32>
    %76 = vector.multi_reduction <add>, %75, %cst_56 [1] : vector<16x128xf32> to vector<16xf32>
    %77 = vector.shape_cast %76 : vector<16xf32> to vector<16x1xf32>
    %78 = vector.broadcast %77 : vector<16x1xf32> to vector<16x128xf32>
    %79 = arith.divf %75, %78 : vector<16x128xf32>
    %80 = arith.mulf %60, %79 : vector<16x128xf32>
    %81 = arith.addf %70, %80 : vector<16x128xf32>
    %cst_57 = arith.constant 5.000000e-01 : f32
    %82 = vector.broadcast %cst_57 : f32 to vector<16x128xf32>
    %83 = arith.mulf %82, %81 : vector<16x128xf32>
    %84 = vector.extract_strided_slice %30 {offsets = [0, 0], sizes = [32, 128], strides = [1, 1]} : vector<32x256xf32> to vector<32x128xf32>
    %85 = vector.extract_strided_slice %51 {offsets = [0, 0], sizes = [32, 128], strides = [1, 1]} : vector<32x256xf32> to vector<32x128xf32>
    %cst_58 = arith.constant dense<0xFF800000> : vector<32xf32>
    %86 = vector.multi_reduction <maximumf>, %85, %cst_58 [1] : vector<32x128xf32> to vector<32xf32>
    %87 = vector.shape_cast %86 : vector<32xf32> to vector<32x1xf32>
    %88 = vector.broadcast %87 : vector<32x1xf32> to vector<32x128xf32>
    %89 = arith.subf %85, %88 : vector<32x128xf32>
    %90 = math.exp %89 : vector<32x128xf32>
    %cst_59 = arith.constant dense<0.000000e+00> : vector<32xf32>
    %91 = vector.multi_reduction <add>, %90, %cst_59 [1] : vector<32x128xf32> to vector<32xf32>
    %92 = vector.shape_cast %91 : vector<32xf32> to vector<32x1xf32>
    %93 = vector.broadcast %92 : vector<32x1xf32> to vector<32x128xf32>
    %94 = arith.divf %90, %93 : vector<32x128xf32>
    %95 = arith.mulf %84, %94 : vector<32x128xf32>
    %cst_60 = arith.constant dense<0xFF800000> : vector<32xf32>
    %96 = vector.multi_reduction <maximumf>, %84, %cst_60 [1] : vector<32x128xf32> to vector<32xf32>
    %97 = vector.shape_cast %96 : vector<32xf32> to vector<32x1xf32>
    %98 = vector.broadcast %97 : vector<32x1xf32> to vector<32x128xf32>
    %99 = arith.subf %84, %98 : vector<32x128xf32>
    %100 = math.exp %99 : vector<32x128xf32>
    %cst_61 = arith.constant dense<0.000000e+00> : vector<32xf32>
    %101 = vector.multi_reduction <add>, %100, %cst_61 [1] : vector<32x128xf32> to vector<32xf32>
    %102 = vector.shape_cast %101 : vector<32xf32> to vector<32x1xf32>
    %103 = vector.broadcast %102 : vector<32x1xf32> to vector<32x128xf32>
    %104 = arith.divf %100, %103 : vector<32x128xf32>
    %105 = arith.mulf %85, %104 : vector<32x128xf32>
    %106 = arith.addf %95, %105 : vector<32x128xf32>
    %cst_62 = arith.constant 5.000000e-01 : f32
    %107 = vector.broadcast %cst_62 : f32 to vector<32x128xf32>
    %108 = arith.mulf %107, %106 : vector<32x128xf32>
    %109 = vector.extract_strided_slice %37 {offsets = [0, 0], sizes = [32, 128], strides = [1, 1]} : vector<32x256xf32> to vector<32x128xf32>
    %110 = vector.extract_strided_slice %58 {offsets = [0, 0], sizes = [32, 128], strides = [1, 1]} : vector<32x256xf32> to vector<32x128xf32>
    %cst_63 = arith.constant dense<0xFF800000> : vector<32xf32>
    %111 = vector.multi_reduction <maximumf>, %110, %cst_63 [1] : vector<32x128xf32> to vector<32xf32>
    %112 = vector.shape_cast %111 : vector<32xf32> to vector<32x1xf32>
    %113 = vector.broadcast %112 : vector<32x1xf32> to vector<32x128xf32>
    %114 = arith.subf %110, %113 : vector<32x128xf32>
    %115 = math.exp %114 : vector<32x128xf32>
    %cst_64 = arith.constant dense<0.000000e+00> : vector<32xf32>
    %116 = vector.multi_reduction <add>, %115, %cst_64 [1] : vector<32x128xf32> to vector<32xf32>
    %117 = vector.shape_cast %116 : vector<32xf32> to vector<32x1xf32>
    %118 = vector.broadcast %117 : vector<32x1xf32> to vector<32x128xf32>
    %119 = arith.divf %115, %118 : vector<32x128xf32>
    %120 = arith.mulf %109, %119 : vector<32x128xf32>
    %cst_65 = arith.constant dense<0xFF800000> : vector<32xf32>
    %121 = vector.multi_reduction <maximumf>, %109, %cst_65 [1] : vector<32x128xf32> to vector<32xf32>
    %122 = vector.shape_cast %121 : vector<32xf32> to vector<32x1xf32>
    %123 = vector.broadcast %122 : vector<32x1xf32> to vector<32x128xf32>
    %124 = arith.subf %109, %123 : vector<32x128xf32>
    %125 = math.exp %124 : vector<32x128xf32>
    %cst_66 = arith.constant dense<0.000000e+00> : vector<32xf32>
    %126 = vector.multi_reduction <add>, %125, %cst_66 [1] : vector<32x128xf32> to vector<32xf32>
    %127 = vector.shape_cast %126 : vector<32xf32> to vector<32x1xf32>
    %128 = vector.broadcast %127 : vector<32x1xf32> to vector<32x128xf32>
    %129 = arith.divf %125, %128 : vector<32x128xf32>
    %130 = arith.mulf %110, %129 : vector<32x128xf32>
    %131 = arith.addf %120, %130 : vector<32x128xf32>
    %cst_67 = arith.constant 5.000000e-01 : f32
    %132 = vector.broadcast %cst_67 : f32 to vector<32x128xf32>
    %133 = arith.mulf %132, %131 : vector<32x128xf32>
    %cst_68 = arith.constant dense<0.000000e+00> : vector<16x32xf32>
    %134 = tpu.matmul %83, %108, %cst_68 {dimension_numbers = #tpu.dot_dimension_numbers<[1], [1], [0], [0], [0, 0, 1, 0], [], []>} : vector<16x128xf32>, vector<32x128xf32>, vector<16x32xf32> -> vector<16x32xf32>
    %cst_69 = arith.constant 8.000000e-01 : f32
    %135 = vector.broadcast %cst_69 : f32 to vector<16x32xf32>
    %136 = arith.mulf %134, %135 : vector<16x32xf32>
    %cst_70 = arith.constant dense<0xFF800000> : vector<16xf32>
    %137 = vector.multi_reduction <maximumf>, %136, %cst_70 [1] : vector<16x32xf32> to vector<16xf32>
    %138 = vector.shape_cast %137 : vector<16xf32> to vector<16x1xf32>
    %139 = vector.broadcast %138 : vector<16x1xf32> to vector<16x32xf32>
    %140 = arith.subf %136, %139 : vector<16x32xf32>
    %141 = math.exp %140 : vector<16x32xf32>
    %cst_71 = arith.constant dense<0.000000e+00> : vector<16xf32>
    %142 = vector.multi_reduction <add>, %141, %cst_71 [1] : vector<16x32xf32> to vector<16xf32>
    %143 = vector.shape_cast %142 : vector<16xf32> to vector<16x1xf32>
    %144 = vector.broadcast %143 : vector<16x1xf32> to vector<16x32xf32>
    %145 = arith.divf %141, %144 : vector<16x32xf32>
    %cst_72 = arith.constant dense<0.000000e+00> : vector<16x128xf32>
    %146 = tpu.matmul %145, %133, %cst_72 {dimension_numbers = #tpu.dot_dimension_numbers<[1], [0], [0], [1], [0, 0, 1, 1], [], []>} : vector<16x32xf32>, vector<32x128xf32>, vector<16x128xf32> -> vector<16x128xf32>
    %147 = vector.extract_strided_slice %23 {offsets = [0, 128], sizes = [16, 128], strides = [1, 1]} : vector<16x256xf32> to vector<16x128xf32>
    %148 = vector.extract_strided_slice %44 {offsets = [0, 128], sizes = [16, 128], strides = [1, 1]} : vector<16x256xf32> to vector<16x128xf32>
    %cst_73 = arith.constant dense<0xFF800000> : vector<16xf32>
    %149 = vector.multi_reduction <maximumf>, %148, %cst_73 [1] : vector<16x128xf32> to vector<16xf32>
    %150 = vector.shape_cast %149 : vector<16xf32> to vector<16x1xf32>
    %151 = vector.broadcast %150 : vector<16x1xf32> to vector<16x128xf32>
    %152 = arith.subf %148, %151 : vector<16x128xf32>
    %153 = math.exp %152 : vector<16x128xf32>
    %cst_74 = arith.constant dense<0.000000e+00> : vector<16xf32>
    %154 = vector.multi_reduction <add>, %153, %cst_74 [1] : vector<16x128xf32> to vector<16xf32>
    %155 = vector.shape_cast %154 : vector<16xf32> to vector<16x1xf32>
    %156 = vector.broadcast %155 : vector<16x1xf32> to vector<16x128xf32>
    %157 = arith.divf %153, %156 : vector<16x128xf32>
    %158 = arith.mulf %147, %157 : vector<16x128xf32>
    %cst_75 = arith.constant dense<0xFF800000> : vector<16xf32>
    %159 = vector.multi_reduction <maximumf>, %147, %cst_75 [1] : vector<16x128xf32> to vector<16xf32>
    %160 = vector.shape_cast %159 : vector<16xf32> to vector<16x1xf32>
    %161 = vector.broadcast %160 : vector<16x1xf32> to vector<16x128xf32>
    %162 = arith.subf %147, %161 : vector<16x128xf32>
    %163 = math.exp %162 : vector<16x128xf32>
    %cst_76 = arith.constant dense<0.000000e+00> : vector<16xf32>
    %164 = vector.multi_reduction <add>, %163, %cst_76 [1] : vector<16x128xf32> to vector<16xf32>
    %165 = vector.shape_cast %164 : vector<16xf32> to vector<16x1xf32>
    %166 = vector.broadcast %165 : vector<16x1xf32> to vector<16x128xf32>
    %167 = arith.divf %163, %166 : vector<16x128xf32>
    %168 = arith.mulf %148, %167 : vector<16x128xf32>
    %169 = arith.addf %158, %168 : vector<16x128xf32>
    %cst_77 = arith.constant 5.000000e-01 : f32
    %170 = vector.broadcast %cst_77 : f32 to vector<16x128xf32>
    %171 = arith.mulf %170, %169 : vector<16x128xf32>
    %172 = vector.extract_strided_slice %30 {offsets = [0, 128], sizes = [32, 128], strides = [1, 1]} : vector<32x256xf32> to vector<32x128xf32>
    %173 = vector.extract_strided_slice %51 {offsets = [0, 128], sizes = [32, 128], strides = [1, 1]} : vector<32x256xf32> to vector<32x128xf32>
    %cst_78 = arith.constant dense<0xFF800000> : vector<32xf32>
    %174 = vector.multi_reduction <maximumf>, %173, %cst_78 [1] : vector<32x128xf32> to vector<32xf32>
    %175 = vector.shape_cast %174 : vector<32xf32> to vector<32x1xf32>
    %176 = vector.broadcast %175 : vector<32x1xf32> to vector<32x128xf32>
    %177 = arith.subf %173, %176 : vector<32x128xf32>
    %178 = math.exp %177 : vector<32x128xf32>
    %cst_79 = arith.constant dense<0.000000e+00> : vector<32xf32>
    %179 = vector.multi_reduction <add>, %178, %cst_79 [1] : vector<32x128xf32> to vector<32xf32>
    %180 = vector.shape_cast %179 : vector<32xf32> to vector<32x1xf32>
    %181 = vector.broadcast %180 : vector<32x1xf32> to vector<32x128xf32>
    %182 = arith.divf %178, %181 : vector<32x128xf32>
    %183 = arith.mulf %172, %182 : vector<32x128xf32>
    %cst_80 = arith.constant dense<0xFF800000> : vector<32xf32>
    %184 = vector.multi_reduction <maximumf>, %172, %cst_80 [1] : vector<32x128xf32> to vector<32xf32>
    %185 = vector.shape_cast %184 : vector<32xf32> to vector<32x1xf32>
    %186 = vector.broadcast %185 : vector<32x1xf32> to vector<32x128xf32>
    %187 = arith.subf %172, %186 : vector<32x128xf32>
    %188 = math.exp %187 : vector<32x128xf32>
    %cst_81 = arith.constant dense<0.000000e+00> : vector<32xf32>
    %189 = vector.multi_reduction <add>, %188, %cst_81 [1] : vector<32x128xf32> to vector<32xf32>
    %190 = vector.shape_cast %189 : vector<32xf32> to vector<32x1xf32>
    %191 = vector.broadcast %190 : vector<32x1xf32> to vector<32x128xf32>
    %192 = arith.divf %188, %191 : vector<32x128xf32>
    %193 = arith.mulf %173, %192 : vector<32x128xf32>
    %194 = arith.addf %183, %193 : vector<32x128xf32>
    %cst_82 = arith.constant 5.000000e-01 : f32
    %195 = vector.broadcast %cst_82 : f32 to vector<32x128xf32>
    %196 = arith.mulf %195, %194 : vector<32x128xf32>
    %197 = vector.extract_strided_slice %37 {offsets = [0, 128], sizes = [32, 128], strides = [1, 1]} : vector<32x256xf32> to vector<32x128xf32>
    %198 = vector.extract_strided_slice %58 {offsets = [0, 128], sizes = [32, 128], strides = [1, 1]} : vector<32x256xf32> to vector<32x128xf32>
    %cst_83 = arith.constant dense<0xFF800000> : vector<32xf32>
    %199 = vector.multi_reduction <maximumf>, %198, %cst_83 [1] : vector<32x128xf32> to vector<32xf32>
    %200 = vector.shape_cast %199 : vector<32xf32> to vector<32x1xf32>
    %201 = vector.broadcast %200 : vector<32x1xf32> to vector<32x128xf32>
    %202 = arith.subf %198, %201 : vector<32x128xf32>
    %203 = math.exp %202 : vector<32x128xf32>
    %cst_84 = arith.constant dense<0.000000e+00> : vector<32xf32>
    %204 = vector.multi_reduction <add>, %203, %cst_84 [1] : vector<32x128xf32> to vector<32xf32>
    %205 = vector.shape_cast %204 : vector<32xf32> to vector<32x1xf32>
    %206 = vector.broadcast %205 : vector<32x1xf32> to vector<32x128xf32>
    %207 = arith.divf %203, %206 : vector<32x128xf32>
    %208 = arith.mulf %197, %207 : vector<32x128xf32>
    %cst_85 = arith.constant dense<0xFF800000> : vector<32xf32>
    %209 = vector.multi_reduction <maximumf>, %197, %cst_85 [1] : vector<32x128xf32> to vector<32xf32>
    %210 = vector.shape_cast %209 : vector<32xf32> to vector<32x1xf32>
    %211 = vector.broadcast %210 : vector<32x1xf32> to vector<32x128xf32>
    %212 = arith.subf %197, %211 : vector<32x128xf32>
    %213 = math.exp %212 : vector<32x128xf32>
    %cst_86 = arith.constant dense<0.000000e+00> : vector<32xf32>
    %214 = vector.multi_reduction <add>, %213, %cst_86 [1] : vector<32x128xf32> to vector<32xf32>
    %215 = vector.shape_cast %214 : vector<32xf32> to vector<32x1xf32>
    %216 = vector.broadcast %215 : vector<32x1xf32> to vector<32x128xf32>
    %217 = arith.divf %213, %216 : vector<32x128xf32>
    %218 = arith.mulf %198, %217 : vector<32x128xf32>
    %219 = arith.addf %208, %218 : vector<32x128xf32>
    %cst_87 = arith.constant 5.000000e-01 : f32
    %220 = vector.broadcast %cst_87 : f32 to vector<32x128xf32>
    %221 = arith.mulf %220, %219 : vector<32x128xf32>
    %cst_88 = arith.constant dense<0.000000e+00> : vector<16x32xf32>
    %222 = tpu.matmul %171, %196, %cst_88 {dimension_numbers = #tpu.dot_dimension_numbers<[1], [1], [0], [0], [0, 0, 1, 0], [], []>} : vector<16x128xf32>, vector<32x128xf32>, vector<16x32xf32> -> vector<16x32xf32>
    %cst_89 = arith.constant 8.000000e-01 : f32
    %223 = vector.broadcast %cst_89 : f32 to vector<16x32xf32>
    %224 = arith.mulf %222, %223 : vector<16x32xf32>
    %cst_90 = arith.constant dense<0xFF800000> : vector<16xf32>
    %225 = vector.multi_reduction <maximumf>, %224, %cst_90 [1] : vector<16x32xf32> to vector<16xf32>
    %226 = vector.shape_cast %225 : vector<16xf32> to vector<16x1xf32>
    %227 = vector.broadcast %226 : vector<16x1xf32> to vector<16x32xf32>
    %228 = arith.subf %224, %227 : vector<16x32xf32>
    %229 = math.exp %228 : vector<16x32xf32>
    %cst_91 = arith.constant dense<0.000000e+00> : vector<16xf32>
    %230 = vector.multi_reduction <add>, %229, %cst_91 [1] : vector<16x32xf32> to vector<16xf32>
    %231 = vector.shape_cast %230 : vector<16xf32> to vector<16x1xf32>
    %232 = vector.broadcast %231 : vector<16x1xf32> to vector<16x32xf32>
    %233 = arith.divf %229, %232 : vector<16x32xf32>
    %cst_92 = arith.constant dense<0.000000e+00> : vector<16x128xf32>
    %234 = tpu.matmul %233, %221, %cst_92 {dimension_numbers = #tpu.dot_dimension_numbers<[1], [0], [0], [1], [0, 0, 1, 1], [], []>} : vector<16x32xf32>, vector<32x128xf32>, vector<16x128xf32> -> vector<16x128xf32>
    %235 = tpu.concatenate %146, %234 in 1 : vector<16x128xf32>, vector<16x128xf32> -> vector<16x256xf32>
    %c0_93 = arith.constant 0 : index
    %c0_94 = arith.constant 0 : index
    %236 = vector.load %arg7[%c0_93, %c0_94] : memref<256x256xf32, #tpu.memory_space<vmem>>, vector<256x256xf32>
    %cst_95 = arith.constant dense<0.000000e+00> : vector<16x256xf32>
    %237 = tpu.matmul %235, %236, %cst_95 {dimension_numbers = #tpu.dot_dimension_numbers<[1], [0], [0], [1], [0, 0, 1, 1], [], []>} : vector<16x256xf32>, vector<256x256xf32>, vector<16x256xf32> -> vector<16x256xf32>
    %c0_96 = arith.constant 0 : index
    %c0_97 = arith.constant 0 : index
    %238 = vector.load %arg8[%c0_96, %c0_97] : memref<1x256xf32, #tpu.memory_space<vmem>>, vector<1x256xf32>
    %239 = vector.broadcast %238 : vector<1x256xf32> to vector<16x256xf32>
    %240 = arith.addf %237, %239 : vector<16x256xf32>
    %c0_98 = arith.constant 0 : index
    %c0_99 = arith.constant 0 : index
    %c0_100 = arith.constant 0 : index
    %241 = vector.load %arg9[%c0_98, %c0_99, %c0_100] : memref<1x16x256xf32, #tpu.memory_space<vmem>>, vector<1x16x256xf32>
    %242 = vector.shape_cast %241 : vector<1x16x256xf32> to vector<16x256xf32>
    %243 = vector.shape_cast %240 : vector<16x256xf32> to vector<1x16x256xf32>
    tpu.vector_store %arg9[%c0_98, %c0_99, %c0_100], %243 {strides = array<i32>} : memref<1x16x256xf32, #tpu.memory_space<vmem>>, vector<1x16x256xf32>,
    return
  }
  func.func @transform_0(%arg0: i32) -> (i32, i32, i32) {
    %c0_i32 = arith.constant 0 : i32
    %c0_i32_0 = arith.constant 0 : i32
    %c0_i32_1 = arith.constant 0 : i32
    return %arg0, %c0_i32, %c0_i32_0 : i32, i32, i32
  }
  func.func @transform_1(%arg0: i32) -> (i32, i32, i32) {
    %c0_i32 = arith.constant 0 : i32
    %c0_i32_0 = arith.constant 0 : i32
    %c0_i32_1 = arith.constant 0 : i32
    return %arg0, %c0_i32, %c0_i32_0 : i32, i32, i32
  }
  func.func @transform_2(%arg0: i32) -> (i32, i32, i32) {
    %c0_i32 = arith.constant 0 : i32
    %c0_i32_0 = arith.constant 0 : i32
    %c0_i32_1 = arith.constant 0 : i32
    return %arg0, %c0_i32, %c0_i32_0 : i32, i32, i32
  }
  func.func @transform_3(%arg0: i32) -> (i32, i32, i32) {
    %c0_i32 = arith.constant 0 : i32
    %c0_i32_0 = arith.constant 0 : i32
    %c0_i32_1 = arith.constant 0 : i32
    %c0_i32_2 = arith.constant 0 : i32
    return %c0_i32, %c0_i32_0, %c0_i32_1 : i32, i32, i32
  }
  func.func @transform_4(%arg0: i32) -> (i32, i32, i32) {
    %c0_i32 = arith.constant 0 : i32
    %c0_i32_0 = arith.constant 0 : i32
    %c0_i32_1 = arith.constant 0 : i32
    %c0_i32_2 = arith.constant 0 : i32
    return %c0_i32, %c0_i32_0, %c0_i32_1 : i32, i32, i32
  }
  func.func @transform_5(%arg0: i32) -> (i32, i32, i32) {
    %c0_i32 = arith.constant 0 : i32
    %c0_i32_0 = arith.constant 0 : i32
    %c0_i32_1 = arith.constant 0 : i32
    %c0_i32_2 = arith.constant 0 : i32
    return %c0_i32, %c0_i32_0, %c0_i32_1 : i32, i32, i32
  }
  func.func @transform_6(%arg0: i32) -> (i32, i32) {
    %c0_i32 = arith.constant 0 : i32
    %c0_i32_0 = arith.constant 0 : i32
    %c0_i32_1 = arith.constant 0 : i32
    return %c0_i32, %c0_i32_0 : i32, i32
  }
  func.func @transform_7(%arg0: i32) -> (i32, i32) {
    %c0_i32 = arith.constant 0 : i32
    %c0_i32_0 = arith.constant 0 : i32
    %c0_i32_1 = arith.constant 0 : i32
    return %c0_i32, %c0_i32_0 : i32, i32
  }
  func.func @transform_8(%arg0: i32) -> (i32, i32, i32) {
    %c0_i32 = arith.constant 0 : i32
    %c0_i32_0 = arith.constant 0 : i32
    %c0_i32_1 = arith.constant 0 : i32
    return %arg0, %c0_i32, %c0_i32_0 : i32, i32, i32
  }
}

</mosaic_0001>

<bundles_post_ra>
// kernel: cross_attention_pallas.1
= control target key start
LH: loop header
LB: loop body
LE: loop exit
PB: predicated region body
PF: predicated region fallthrough
CT: control target
= control target key end

     0   :  { %13 = vsyncpa [#allocation3], 0  ;;  %s5679_s0 = inlined_call_operand.vmem [shape: f32[2,16,256], index: 0, kind: input, shape index: {}]   ;;  %s5680_s1 = inlined_call_operand.vmem [shape: f32[2,16,256], index: 1, kind: input, shape index: {}]   ;;  %s5681_s2 = inlined_call_operand.vmem [shape: f32[2,16,256], index: 2, kind: input, shape index: {}]   ;;  %s5682_s3 = inlined_call_operand.vmem [shape: f32[3,16,256], index: 3, kind: input, shape index: {}]   ;;  %s5683_s4 = inlined_call_operand.vmem [shape: f32[6,256,256], index: 4, kind: input, shape index: {}]   ;;  %s5684_s5 = inlined_call_operand.vmem [shape: f32[6,1,256], index: 5, kind: input, shape index: {}]   ;;  %s5685_s6 = inlined_call_operand.vmem [shape: f32[256,256], index: 6, kind: input, shape index: {}]   ;;  %s5686_s7 = inlined_call_operand.vmem [shape: f32[1,256], index: 7, kind: input, shape index: {}]   ;;  %s5687_s8 = inlined_call_operand.hbm [shape: f32[2,16,256], index: 8, kind: output, shape index: {}]  }
   0x1   :  { %15 = vsyncpa [#allocation3 + $0x1], 0  ;;  %s3650_s27 = smov 0   ;;  %s3652_s28 = smov 0  }
   0x2   :  { %s3654_s29 = smov 0   ;;  %s3656_s30 = smov 0  }
   0x3 LB: > { %s3671_s9 = sadd.s32 4294967295, %s3600_s30   ;;  %s2416_s10 = sadd.s32 4294967294, %s3600_s30   ;;  %s3600_s30 = sphi %s3656_s30, %s5708_s30   ;;  %s3596_s29 = sphi %s3654_s29, %s5707_s29   ;;  %s3592_s28 = sphi %s3652_s28, %s5706_s28   ;;  %s3588_s27 = sphi %s3650_s27, %s5705_s27  }
   0x4   : > { %s3675_s11 = sadd.s32 1, %s3600_s30   ;;  %s211_s12 = sadd.s32 1, %s3596_s29 }
   0x5   : > { %s208_s13 = ssub.s32 %s3600_s30, %s3675_s11  ;;  %p221_p0 = scmp.ne.s32.totalorder %s3596_s29, %s3592_s28 }
   0x6   : > { %p209_p1 = scmp.eq.s32.totalorder %s208_s13, 0  ;;  %p222_p2 = scmp.eq.s32.totalorder %s3671_s9, 1 }
   0x7   : > { %p227_p3 = scmp.ne.s32.totalorder %s3592_s28, %s3588_s27  ;;  %p228_p4 = scmp.eq.s32.totalorder %s2416_s10, 1 }
   0x8   : > { %s3686_s14 = scalar_select %p209_p1, %s3596_s29, %s211_s12  }
   0x9   : > { %p3688_p5 = por %p222_p2, %p221_p0  ;;  %p3692_p6 = por %p228_p4, %p227_p3 }
   0xa   : > { %p2419_p7 = scmp.ge.s32.totalorder %s3600_s30, 1  ;;  %p285_p8 = scmp.lt.s32.totalorder %s3600_s30, 3 }
   0xc   : > { %p286_p9 = pnand %p2419_p7, %p285_p8 }
   0xe   : > { %289 = sbr.rel (%p286_p9) target bundleno = 2304 (0x900), region = 52 }
  0x15   : > { %v383_v0 = vld [vmem:[%s5683_s4 + $0x8] sm:$0xff]  ;;  %v385_v1 = vld [vmem:[%s5683_s4 + $0x18] sm:$0xff]  ;;  %v382_v5 = vld [vmem:[%s5683_s4] sm:$0xff]  ;;  %p329_p10 = scmp.lt.s32.totalorder %s3671_s9, 1  ;;  %vm1655_vm0 = vcmask 261120   ;;  %s3602_s13 = smov [#allocation2]  }
  0x16   : > { %v2436_v2 = vld [vmem:[%s5683_s4 + $0x208] sm:$0xff]  ;;  %v2841_v3 = vpack.c.bf16 %v385_v1, %v383_v0  ;;  %v2438_v4 = vld [vmem:[%s5683_s4 + $0x218] sm:$0xff]  ;;  %v384_v6 = vld [vmem:[%s5683_s4 + $0x10] sm:$0xff]  ;;  %s3542_s17 = sshll.u32 %s3602_s13, 4  ;;  %s3543_s17 = int_to_ptr.vmem [resolvable:$false] %s3542_s17 }
  0x17   : > { %v2905_v7 = vpack.c.bf16 %v2438_v4, %v2436_v2  ;;  %v2843_v8 = vpack.c.bf16 %v384_v6, %v382_v5  ;;  %v2435_v9 = vld [vmem:[%s5683_s4 + $0x200] sm:$0xff]  ;;  %v2437_v10 = vld [vmem:[%s5683_s4 + $0x210] sm:$0xff]  ;;  %v387_v11 = vld [vmem:[%s5683_s4 + $0x28] sm:$0xff]  ;;  %s330_s26 = scalar_select %p329_p10, %s3671_s9, 1 }
  0x18   : > { %2842 = vmatprep.subr.bf16.mxu0 %v2841_v3  ;;  %v2907_v12 = vpack.c.bf16 %v2437_v10, %v2435_v9  ;;  %v389_v13 = vld [vmem:[%s5683_s4 + $0x38] sm:$0xff]  ;;  %v2440_v14 = vld [vmem:[%s5683_s4 + $0x228] sm:$0xff]  ;;  %v386_v18 = vld [vmem:[%s5683_s4 + $0x20] sm:$0xff]  ;;  %s3544_s19 = scalar_lea.vmem %s3543_s17, 1024 }
  0x19   : > { %v2442_v15 = vld [vmem:[%s5683_s4 + $0x238] sm:$0xff]  ;;  %2906 = vmatprep.subr.bf16.mxu1 %v2905_v7  ;;  %2844 = vmatpush1.bf16.msra.mxu0 %v2843_v8  ;;  %v2845_v16 = vpack.c.bf16 %v389_v13, %v387_v11  ;;  %v388_v19 = vld [vmem:[%s5683_s4 + $0x30] sm:$0xff]  ;;  %v2439_v20 = vld [vmem:[%s5683_s4 + $0x220] sm:$0xff]  ;;  %s3954_s18 = sshll.u32 %s330_s26, 5 }
  0x1a   : > { %v2909_v17 = vpack.c.bf16 %v2442_v15, %v2440_v14  ;;  %2908 = vmatpush1.bf16.msra.mxu1 %v2907_v12  ;;  %v2847_v21 = vpack.c.bf16 %v388_v19, %v386_v18  ;;  %v2441_v22 = vld [vmem:[%s5683_s4 + $0x230] sm:$0xff]  ;;  %v391_v23 = vld [vmem:[%s5683_s4 + $0x48] sm:$0xff]  ;;  %v393_v24 = vld [vmem:[%s5683_s4 + $0x58] sm:$0xff]  ;;  %s3984_s26 = scalar_lea.vmem %s5679_s0, %s3954_s18  ;;  %s343_s25 = scalar_lea.vmem %s5681_s2, %s3954_s18 }
  0x1b   : > { %2846 = vmatprep.subr.bf16.mxu0 %v2845_v16  ;;  %v2911_v25 = vpack.c.bf16 %v2441_v22, %v2439_v20  ;;  %v2849_v26 = vpack.c.bf16 %v393_v24, %v391_v23  ;;  %v2444_v27 = vld [vmem:[%s5683_s4 + $0x248] sm:$0xff]  ;;  %v2446_v28 = vld [vmem:[%s5683_s4 + $0x258] sm:$0xff]  ;;  %v390_v29 = vld [vmem:[%s5683_s4 + $0x40] sm:$0xff] }
  0x1c   : > { %2910 = vmatprep.subr.bf16.mxu1 %v2909_v17  ;;  %v2913_v30 = vpack.c.bf16 %v2446_v28, %v2444_v27  ;;  %v392_v31 = vld [vmem:[%s5683_s4 + $0x50] sm:$0xff]  ;;  %v2443_v32 = vld [vmem:[%s5683_s4 + $0x240] sm:$0xff]  ;;  %v395_v35 = vld [vmem:[%s5683_s4 + $0x68] sm:$0xff] }
  0x1d   : > { %v2445_v33 = vld [vmem:[%s5683_s4 + $0x250] sm:$0xff]  ;;  %2848 = vmatpush1.bf16.msra.mxu0 %v2847_v21  ;;  %v2851_v34 = vpack.c.bf16 %v392_v31, %v390_v29  ;;  %v397_v36 = vld [vmem:[%s5683_s4 + $0x78] sm:$0xff]  ;;  %v2448_v37 = vld [vmem:[%s5683_s4 + $0x268] sm:$0xff] }
  0x1e   : > { %2912 = vmatpush1.bf16.msra.mxu1 %v2911_v25  ;;  %2850 = vmatprep.subr.bf16.mxu0 %v2849_v26  ;;  %v2915_v38 = vpack.c.bf16 %v2445_v33, %v2443_v32  ;;  %v2853_v39 = vpack.c.bf16 %v397_v36, %v395_v35  ;;  %v2450_v40 = vld [vmem:[%s5683_s4 + $0x278] sm:$0xff]  ;;  %v394_v41 = vld [vmem:[%s5683_s4 + $0x60] sm:$0xff]  ;;  %v396_v42 = vld [vmem:[%s5683_s4 + $0x70] sm:$0xff] }
  0x1f   : > { %2914 = vmatprep.subr.bf16.mxu1 %v2913_v30  ;;  %v2917_v43 = vpack.c.bf16 %v2450_v40, %v2448_v37  ;;  %v2447_v44 = vld [vmem:[%s5683_s4 + $0x260] sm:$0xff]  ;;  %v2449_v45 = vld [vmem:[%s5683_s4 + $0x270] sm:$0xff]  ;;  %v399_v46 = vld [vmem:[%s5683_s4 + $0x88] sm:$0xff]  ;;  %v2855_v50 = vpack.c.bf16 %v396_v42, %v394_v41 }
  0x20   : > { %v401_v47 = vld [vmem:[%s5683_s4 + $0x98] sm:$0xff]  ;;  %v2452_v48 = vld [vmem:[%s5683_s4 + $0x288] sm:$0xff]  ;;  %v2919_v51 = vpack.c.bf16 %v2449_v45, %v2447_v44  ;;  %v398_v53 = vld [vmem:[%s5683_s4 + $0x80] sm:$0xff] }
  0x21   : > { %v2454_v49 = vld [vmem:[%s5683_s4 + $0x298] sm:$0xff]  ;;  %2852 = vmatpush1.bf16.msra.mxu0 %v2851_v34  ;;  %v2857_v52 = vpack.c.bf16 %v401_v47, %v399_v46  ;;  %v400_v54 = vld [vmem:[%s5683_s4 + $0x90] sm:$0xff]  ;;  %v2451_v55 = vld [vmem:[%s5683_s4 + $0x280] sm:$0xff] }
  0x22   : > { %2916 = vmatpush1.bf16.msra.mxu1 %v2915_v38  ;;  %2854 = vmatprep.subr.bf16.mxu0 %v2853_v39  ;;  %v2921_v56 = vpack.c.bf16 %v2454_v49, %v2452_v48  ;;  %v2453_v57 = vld [vmem:[%s5683_s4 + $0x290] sm:$0xff]  ;;  %v403_v58 = vld [vmem:[%s5683_s4 + $0xa8] sm:$0xff]  ;;  %v405_v59 = vld [vmem:[%s5683_s4 + $0xb8] sm:$0xff]  ;;  %v2859_v62 = vpack.c.bf16 %v400_v54, %v398_v53 }
  0x23   : > { %2918 = vmatprep.subr.bf16.mxu1 %v2917_v43  ;;  %v2456_v60 = vld [vmem:[%s5683_s4 + $0x2a8] sm:$0xff]  ;;  %v2458_v61 = vld [vmem:[%s5683_s4 + $0x2b8] sm:$0xff]  ;;  %v2923_v63 = vpack.c.bf16 %v2453_v57, %v2451_v55  ;;  %v2861_v0 = vpack.c.bf16 %v405_v59, %v403_v58  ;;  %v402_v1 = vld [vmem:[%s5683_s4 + $0xa0] sm:$0xff] }
  0x24   : > { %v404_v2 = vld [vmem:[%s5683_s4 + $0xb0] sm:$0xff]  ;;  %v2455_v3 = vld [vmem:[%s5683_s4 + $0x2a0] sm:$0xff]  ;;  %v2925_v4 = vpack.c.bf16 %v2458_v61, %v2456_v60  ;;  %v407_v6 = vld [vmem:[%s5683_s4 + $0xc8] sm:$0xff] }
  0x25   : > { %2856 = vmatpush1.bf16.msra.mxu0 %v2855_v50  ;;  %v2457_v5 = vld [vmem:[%s5683_s4 + $0x2b0] sm:$0xff]  ;;  %v409_v7 = vld [vmem:[%s5683_s4 + $0xd8] sm:$0xff]  ;;  %v2460_v8 = vld [vmem:[%s5683_s4 + $0x2c8] sm:$0xff]  ;;  %v2863_v10 = vpack.c.bf16 %v404_v2, %v402_v1 }
  0x26   : > { %2920 = vmatpush1.bf16.msra.mxu1 %v2919_v51  ;;  %2858 = vmatprep.subr.bf16.mxu0 %v2857_v52  ;;  %v2462_v9 = vld [vmem:[%s5683_s4 + $0x2d8] sm:$0xff]  ;;  %v2927_v11 = vpack.c.bf16 %v2457_v5, %v2455_v3  ;;  %v2865_v12 = vpack.c.bf16 %v409_v7, %v407_v6  ;;  %v406_v13 = vld [vmem:[%s5683_s4 + $0xc0] sm:$0xff]  ;;  %v408_v14 = vld [vmem:[%s5683_s4 + $0xd0] sm:$0xff] }
  0x27   : > { %2922 = vmatprep.subr.bf16.mxu1 %v2921_v56  ;;  %v2459_v15 = vld [vmem:[%s5683_s4 + $0x2c0] sm:$0xff]  ;;  %v2929_v16 = vpack.c.bf16 %v2462_v9, %v2460_v8  ;;  %v2461_v17 = vld [vmem:[%s5683_s4 + $0x2d0] sm:$0xff]  ;;  %v411_v18 = vld [vmem:[%s5683_s4 + $0xe8] sm:$0xff]  ;;  %v2867_v22 = vpack.c.bf16 %v408_v14, %v406_v13 }
  0x28   : > { %v413_v19 = vld [vmem:[%s5683_s4 + $0xf8] sm:$0xff]  ;;  %v2464_v20 = vld [vmem:[%s5683_s4 + $0x2e8] sm:$0xff]  ;;  %v2931_v23 = vpack.c.bf16 %v2461_v17, %v2459_v15  ;;  %v410_v25 = vld [vmem:[%s5683_s4 + $0xe0] sm:$0xff] }
  0x29   : > { %2860 = vmatpush1.bf16.msra.mxu0 %v2859_v62  ;;  %v2466_v21 = vld [vmem:[%s5683_s4 + $0x2f8] sm:$0xff]  ;;  %v2869_v24 = vpack.c.bf16 %v413_v19, %v411_v18  ;;  %v412_v26 = vld [vmem:[%s5683_s4 + $0xf0] sm:$0xff]  ;;  %v2463_v27 = vld [vmem:[%s5683_s4 + $0x2e0] sm:$0xff] }
  0x2a   : > { %2924 = vmatpush1.bf16.msra.mxu1 %v2923_v63  ;;  %2862 = vmatprep.subr.bf16.mxu0 %v2861_v0  ;;  %v2933_v28 = vpack.c.bf16 %v2466_v21, %v2464_v20  ;;  %v2465_v29 = vld [vmem:[%s5683_s4 + $0x2f0] sm:$0xff]  ;;  %v415_v30 = vld [vmem:[%s5683_s4 + $0x108] sm:$0xff]  ;;  %v417_v31 = vld [vmem:[%s5683_s4 + $0x118] sm:$0xff]  ;;  %v2871_v34 = vpack.c.bf16 %v412_v26, %v410_v25 }
  0x2b   : > { %2926 = vmatprep.subr.bf16.mxu1 %v2925_v4  ;;  %v2468_v32 = vld [vmem:[%s5683_s4 + $0x308] sm:$0xff]  ;;  %v2470_v33 = vld [vmem:[%s5683_s4 + $0x318] sm:$0xff]  ;;  %v2935_v35 = vpack.c.bf16 %v2465_v29, %v2463_v27  ;;  %v2873_v36 = vpack.c.bf16 %v417_v31, %v415_v30  ;;  %v414_v37 = vld [vmem:[%s5683_s4 + $0x100] sm:$0xff] }
  0x2c   : > { %v416_v38 = vld [vmem:[%s5683_s4 + $0x110] sm:$0xff]  ;;  %v2467_v39 = vld [vmem:[%s5683_s4 + $0x300] sm:$0xff]  ;;  %v2937_v40 = vpack.c.bf16 %v2470_v33, %v2468_v32  ;;  %v419_v42 = vld [vmem:[%s5683_s4 + $0x128] sm:$0xff] }
  0x2d   : > { %2864 = vmatpush1.bf16.msra.mxu0 %v2863_v10  ;;  %v2469_v41 = vld [vmem:[%s5683_s4 + $0x310] sm:$0xff]  ;;  %v421_v43 = vld [vmem:[%s5683_s4 + $0x138] sm:$0xff]  ;;  %v2472_v44 = vld [vmem:[%s5683_s4 + $0x328] sm:$0xff]  ;;  %v2875_v46 = vpack.c.bf16 %v416_v38, %v414_v37 }
  0x2e   : > { %2928 = vmatpush1.bf16.msra.mxu1 %v2927_v11  ;;  %2866 = vmatprep.subr.bf16.mxu0 %v2865_v12  ;;  %v2474_v45 = vld [vmem:[%s5683_s4 + $0x338] sm:$0xff]  ;;  %v2939_v47 = vpack.c.bf16 %v2469_v41, %v2467_v39  ;;  %v2877_v48 = vpack.c.bf16 %v421_v43, %v419_v42  ;;  %v418_v49 = vld [vmem:[%s5683_s4 + $0x120] sm:$0xff]  ;;  %v420_v50 = vld [vmem:[%s5683_s4 + $0x130] sm:$0xff] }
  0x2f   : > { %2930 = vmatprep.subr.bf16.mxu1 %v2929_v16  ;;  %v2471_v51 = vld [vmem:[%s5683_s4 + $0x320] sm:$0xff]  ;;  %v2941_v52 = vpack.c.bf16 %v2474_v45, %v2472_v44  ;;  %v2473_v53 = vld [vmem:[%s5683_s4 + $0x330] sm:$0xff]  ;;  %v423_v54 = vld [vmem:[%s5683_s4 + $0x148] sm:$0xff]  ;;  %v2879_v58 = vpack.c.bf16 %v420_v50, %v418_v49 }
  0x30   : > { %v425_v55 = vld [vmem:[%s5683_s4 + $0x158] sm:$0xff]  ;;  %v2476_v56 = vld [vmem:[%s5683_s4 + $0x348] sm:$0xff]  ;;  %v2943_v59 = vpack.c.bf16 %v2473_v53, %v2471_v51  ;;  %v422_v61 = vld [vmem:[%s5683_s4 + $0x140] sm:$0xff] }
  0x31   : > { %2868 = vmatpush1.bf16.msra.mxu0 %v2867_v22  ;;  %v2478_v57 = vld [vmem:[%s5683_s4 + $0x358] sm:$0xff]  ;;  %v2881_v60 = vpack.c.bf16 %v425_v55, %v423_v54  ;;  %v424_v62 = vld [vmem:[%s5683_s4 + $0x150] sm:$0xff]  ;;  %v2475_v63 = vld [vmem:[%s5683_s4 + $0x340] sm:$0xff] }
  0x32   : > { %2932 = vmatpush1.bf16.msra.mxu1 %v2931_v23  ;;  %2870 = vmatprep.subr.bf16.mxu0 %v2869_v24  ;;  %v2945_v0 = vpack.c.bf16 %v2478_v57, %v2476_v56  ;;  %v2477_v1 = vld [vmem:[%s5683_s4 + $0x350] sm:$0xff]  ;;  %v427_v2 = vld [vmem:[%s5683_s4 + $0x168] sm:$0xff]  ;;  %v429_v3 = vld [vmem:[%s5683_s4 + $0x178] sm:$0xff]  ;;  %v2883_v6 = vpack.c.bf16 %v424_v62, %v422_v61 }
  0x33   : > { %2934 = vmatprep.subr.bf16.mxu1 %v2933_v28  ;;  %v2480_v4 = vld [vmem:[%s5683_s4 + $0x368] sm:$0xff]  ;;  %v2482_v5 = vld [vmem:[%s5683_s4 + $0x378] sm:$0xff]  ;;  %v426_v7 = vld [vmem:[%s5683_s4 + $0x160] sm:$0xff]  ;;  %v2947_v8 = vpack.c.bf16 %v2477_v1, %v2475_v63  ;;  %v2885_v9 = vpack.c.bf16 %v429_v3, %v427_v2 }
  0x34   : > { %v428_v10 = vld [vmem:[%s5683_s4 + $0x170] sm:$0xff]  ;;  %v2479_v11 = vld [vmem:[%s5683_s4 + $0x360] sm:$0xff]  ;;  %v2949_v13 = vpack.c.bf16 %v2482_v5, %v2480_v4  ;;  %v431_v14 = vld [vmem:[%s5683_s4 + $0x188] sm:$0xff] }
  0x35   : > { %2872 = vmatpush1.bf16.msra.mxu0 %v2871_v34  ;;  %v2481_v12 = vld [vmem:[%s5683_s4 + $0x370] sm:$0xff]  ;;  %v433_v15 = vld [vmem:[%s5683_s4 + $0x198] sm:$0xff]  ;;  %v345_v16 = vld [vmem:[%s3984_s26 + $0x8] sm:$0xff]  ;;  %v2887_v20 = vpack.c.bf16 %v428_v10, %v426_v7 }
  0x36   : > { %2936 = vmatpush1.bf16.msra.mxu1 %v2935_v35  ;;  %2874 = vmatprep.subr.bf16.mxu0 %v2873_v36  ;;  %v2484_v17 = vld [vmem:[%s5683_s4 + $0x388] sm:$0xff]  ;;  %v2486_v18 = vld [vmem:[%s5683_s4 + $0x398] sm:$0xff]  ;;  %v2951_v22 = vpack.c.bf16 %v2481_v12, %v2479_v11  ;;  %v2889_v23 = vpack.c.bf16 %v433_v15, %v431_v14  ;;  %v430_v24 = vld [vmem:[%s5683_s4 + $0x180] sm:$0xff] }
  0x37   : > { %2938 = vmatprep.subr.bf16.mxu1 %v2937_v40  ;;  %v349_v19 = vld [vmem:[%s5682_s3 + $0x8] sm:$0xff]  ;;  %v432_v25 = vld [vmem:[%s5683_s4 + $0x190] sm:$0xff]  ;;  %v2483_v26 = vld [vmem:[%s5683_s4 + $0x380] sm:$0xff]  ;;  %v2953_v27 = vpack.c.bf16 %v2486_v18, %v2484_v17 }
  0x38   : > { %v4014_v21 = vadd.f32 %v349_v19, %v345_v16  ;;  %v2485_v28 = vld [vmem:[%s5683_s4 + $0x390] sm:$0xff]  ;;  %v435_v29 = vld [vmem:[%s5683_s4 + $0x1a8] sm:$0xff]  ;;  %v437_v30 = vld [vmem:[%s5683_s4 + $0x1b8] sm:$0xff]  ;;  %v2891_v33 = vpack.c.bf16 %v432_v25, %v430_v24 }
  0x39   : > { %2876 = vmatpush1.bf16.msra.mxu0 %v2875_v46  ;;  %v2488_v31 = vld [vmem:[%s5683_s4 + $0x3a8] sm:$0xff]  ;;  %v2490_v32 = vld [vmem:[%s5683_s4 + $0x3b8] sm:$0xff]  ;;  %v2955_v34 = vpack.c.bf16 %v2485_v28, %v2483_v26  ;;  %v2893_v35 = vpack.c.bf16 %v437_v30, %v435_v29  ;;  %v434_v36 = vld [vmem:[%s5683_s4 + $0x1a0] sm:$0xff] }
  0x3a   : > { %2940 = vmatpush1.bf16.msra.mxu1 %v2939_v47  ;;  %2878 = vmatprep.subr.bf16.mxu0 %v2877_v48  ;;  %v436_v37 = vld [vmem:[%s5683_s4 + $0x1b0] sm:$0xff]  ;;  %v2487_v38 = vld [vmem:[%s5683_s4 + $0x3a0] sm:$0xff]  ;;  %v2957_v39 = vpack.c.bf16 %v2490_v32, %v2488_v31  ;;  %v439_v41 = vld [vmem:[%s5683_s4 + $0x1c8] sm:$0xff] }
  0x3b   : > { %2942 = vmatprep.subr.bf16.mxu1 %v2941_v52  ;;  %522 = vmatprep.mubr.f32.mxu0 %v4014_v21  ;;  %v2489_v40 = vld [vmem:[%s5683_s4 + $0x3b0] sm:$0xff]  ;;  %v441_v42 = vld [vmem:[%s5683_s4 + $0x1d8] sm:$0xff]  ;;  %v2492_v43 = vld [vmem:[%s5683_s4 + $0x3c8] sm:$0xff]  ;;  %v2895_v45 = vpack.c.bf16 %v436_v37, %v434_v36 }
  0x3c   : > { %677 = vmatprep.mubr.f32.mxu1 %v4014_v21  ;;  %v2494_v44 = vld [vmem:[%s5683_s4 + $0x3d8] sm:$0xff]  ;;  %v2959_v46 = vpack.c.bf16 %v2489_v40, %v2487_v38  ;;  %v2897_v47 = vpack.c.bf16 %v441_v42, %v439_v41  ;;  %v438_v48 = vld [vmem:[%s5683_s4 + $0x1c0] sm:$0xff]  ;;  %v440_v49 = vld [vmem:[%s5683_s4 + $0x1d0] sm:$0xff] }
  0x3d   : > { %2880 = vmatpush1.bf16.msra.mxu0 %v2879_v58  ;;  %v2491_v50 = vld [vmem:[%s5683_s4 + $0x3c0] sm:$0xff]  ;;  %v2961_v51 = vpack.c.bf16 %v2494_v44, %v2492_v43  ;;  %v2493_v52 = vld [vmem:[%s5683_s4 + $0x3d0] sm:$0xff]  ;;  %v443_v53 = vld [vmem:[%s5683_s4 + $0x1e8] sm:$0xff]  ;;  %v2899_v57 = vpack.c.bf16 %v440_v49, %v438_v48 }
  0x3e   : > { %2944 = vmatpush1.bf16.msra.mxu1 %v2943_v59  ;;  %2882 = vmatprep.subr.bf16.mxu0 %v2881_v60  ;;  %v445_v54 = vld [vmem:[%s5683_s4 + $0x1f8] sm:$0xff]  ;;  %v2496_v55 = vld [vmem:[%s5683_s4 + $0x3e8] sm:$0xff]  ;;  %v2963_v58 = vpack.c.bf16 %v2493_v52, %v2491_v50  ;;  %v442_v60 = vld [vmem:[%s5683_s4 + $0x1e0] sm:$0xff] }
  0x3f   : > { %2946 = vmatprep.subr.bf16.mxu1 %v2945_v0  ;;  %v2498_v56 = vld [vmem:[%s5683_s4 + $0x3f8] sm:$0xff]  ;;  %v2901_v59 = vpack.c.bf16 %v445_v54, %v443_v53  ;;  %v444_v61 = vld [vmem:[%s5683_s4 + $0x1f0] sm:$0xff]  ;;  %v2495_v62 = vld [vmem:[%s5683_s4 + $0x3e0] sm:$0xff] }
  0x40   : > { %v2965_v63 = vpack.c.bf16 %v2498_v56, %v2496_v55  ;;  %v2497_v0 = vld [vmem:[%s5683_s4 + $0x3f0] sm:$0xff]  ;;  %v2501_v1 = vld [vmem:[%s5683_s4 + $0x408] sm:$0xff]  ;;  %v2503_v2 = vld [vmem:[%s5683_s4 + $0x418] sm:$0xff]  ;;  %v2903_v3 = vpack.c.bf16 %v444_v61, %v442_v60 }
  0x41   : > { %2884 = vmatpush1.bf16.msra.mxu0 %v2883_v6  ;;  %v344_v4 = vld [vmem:[%s3984_s26] sm:$0xff]  ;;  %v2967_v6 = vpack.c.bf16 %v2497_v0, %v2495_v62  ;;  %v2969_v7 = vpack.c.bf16 %v2503_v2, %v2501_v1  ;;  %v347_v10 = vld [vmem:[%s3984_s26 + $0x18] sm:$0xff]  ;;  %v2505_v12 = vld [vmem:[%s5683_s4 + $0x428] sm:$0xff] }
  0x42   : > { %2948 = vmatpush1.bf16.msra.mxu1 %v2947_v8  ;;  %2886 = vmatprep.subr.bf16.mxu0 %v2885_v9  ;;  %v348_v5 = vld [vmem:[%s5682_s3] sm:$0xff]  ;;  %v2502_v9 = vld [vmem:[%s5683_s4 + $0x410] sm:$0xff]  ;;  %v351_v11 = vld [vmem:[%s5682_s3 + $0x18] sm:$0xff] }
  0x43   : > { %2950 = vmatprep.subr.bf16.mxu1 %v2949_v13  ;;  %v2500_v8 = vld [vmem:[%s5683_s4 + $0x400] sm:$0xff]  ;;  %v2507_v13 = vld [vmem:[%s5683_s4 + $0x438] sm:$0xff]  ;;  %v4128_v14 = vadd.f32 %v348_v5, %v344_v4  ;;  %v346_v16 = vld [vmem:[%s3984_s26 + $0x10] sm:$0xff]  ;;  %v4131_v17 = vadd.f32 %v351_v11, %v347_v10  ;;  %s4335_s26 = scalar_lea.vmem %s5680_s1, %s3954_s18  ;;  %s326_s18 = sand.u32 1, %s3592_s28  }
  0x44   : > { %v2971_v15 = vpack.c.bf16 %v2502_v9, %v2500_v8  ;;  %v350_v18 = vld [vmem:[%s5682_s3 + $0x10] sm:$0xff]  ;;  %v2973_v19 = vpack.c.bf16 %v2507_v13, %v2505_v12  ;;  %v2511_v24 = vld [vmem:[%s5683_s4 + $0x458] sm:$0xff]  ;;  %v2508_v28 = vld [vmem:[%s5683_s4 + $0x440] sm:$0xff]  ;;  %s2420_s21 = sshll.u32 %s326_s18, 5  ;;  %s5638_s12 = scalar_lea.sflag [#allocation3], %s326_s18 }
  0x45   : > { %2888 = vmatpush1.bf16.msra.mxu0 %v2887_v20  ;;  %v2504_v20 = vld [vmem:[%s5683_s4 + $0x420] sm:$0xff]  ;;  %v4150_v25 = vadd.f32 %v350_v18, %v346_v16  ;;  %v2510_v29 = vld [vmem:[%s5683_s4 + $0x450] sm:$0xff]  ;;  %v2513_v30 = vld [vmem:[%s5683_s4 + $0x468] sm:$0xff]  ;;  %s328_s22 = scalar_lea.vmem [#allocation2], %s2420_s21 }
  0x46   : > { %2952 = vmatpush1.bf16.msra.mxu1 %v2951_v22  ;;  %2890 = vmatprep.subr.bf16.mxu0 %v2889_v23  ;;  %v2506_v22 = vld [vmem:[%s5683_s4 + $0x430] sm:$0xff]  ;;  %v2509_v23 = vld [vmem:[%s5683_s4 + $0x448] sm:$0xff]  ;;  %v2515_v31 = vld [vmem:[%s5683_s4 + $0x478] sm:$0xff]  ;;  %v2979_v32 = vpack.c.bf16 %v2510_v29, %v2508_v28  ;;  %s2330_s23 = sshll.u32 %s328_s22, 4  ;;  %s5631_s23 = int_to_ptr.vmem [resolvable:$true] %s2330_s23 }
  0x47   : > { %2954 = vmatprep.subr.bf16.mxu1 %v2953_v27  ;;  %v2975_v26 = vpack.c.bf16 %v2506_v22, %v2504_v20  ;;  %v2977_v27 = vpack.c.bf16 %v2511_v24, %v2509_v23  ;;  %v2981_v36 = vpack.c.bf16 %v2515_v31, %v2513_v30  ;;  %v2514_v37 = vld [vmem:[%s5683_s4 + $0x470] sm:$0xff]  ;;  %v2517_v41 = vld [vmem:[%s5683_s4 + $0x488] sm:$0xff]  ;;  %v2519_v42 = vld [vmem:[%s5683_s4 + $0x498] sm:$0xff]  ;;  %p3545_p0 = scmp.lt.s32.totalorder %s5631_s23, %s3543_s17 }
  0x48   : > { %v2567_v40 = vld [vmem:[%s5683_s4 + $0x610] sm:$0xff]  ;;  %v2570_v44 = vld [vmem:[%s5683_s4 + $0x628] sm:$0xff]  ;;  %v2569_v49 = vld [vmem:[%s5683_s4 + $0x620] sm:$0xff] }
  0x49   : > { %2892 = vmatpush1.bf16.msra.mxu0 %v2891_v33  ;;  %v2512_v33 = vld [vmem:[%s5683_s4 + $0x460] sm:$0xff]  ;;  %v2571_v50 = vld [vmem:[%s5683_s4 + $0x630] sm:$0xff]  ;;  %v2574_v54 = vld [vmem:[%s5683_s4 + $0x648] sm:$0xff] }
  0x4a   : > { %2956 = vmatpush1.bf16.msra.mxu1 %v2955_v34  ;;  %2894 = vmatprep.subr.bf16.mxu0 %v2893_v35  ;;  %v2566_v34 = vld [vmem:[%s5683_s4 + $0x608] sm:$0xff]  ;;  %v2568_v35 = vld [vmem:[%s5683_s4 + $0x618] sm:$0xff]  ;;  %v2518_v52 = vld [vmem:[%s5683_s4 + $0x490] sm:$0xff]  ;;  %v3039_v53 = vpack.c.bf16 %v2571_v50, %v2569_v49 }
  0x4b   : > { %2958 = vmatprep.subr.bf16.mxu1 %v2957_v39  ;;  %v3033_v38 = vpack.c.bf16 %v2568_v35, %v2566_v34  ;;  %v2565_v39 = vld [vmem:[%s5683_s4 + $0x600] sm:$0xff]  ;;  %v2576_v55 = vld [vmem:[%s5683_s4 + $0x658] sm:$0xff]  ;;  %v2521_v56 = vld [vmem:[%s5683_s4 + $0x4a8] sm:$0xff] }
  0x4c   : > { %v3035_v43 = vpack.c.bf16 %v2567_v40, %v2565_v39  ;;  %v2575_v60 = vld [vmem:[%s5683_s4 + $0x650] sm:$0xff]  ;;  %v2520_v62 = vld [vmem:[%s5683_s4 + $0x4a0] sm:$0xff]  ;;  %v2578_v0 = vld [vmem:[%s5683_s4 + $0x668] sm:$0xff] }
  0x4d   : > { %2896 = vmatpush1.bf16.msra.mxu0 %v2895_v45  ;;  %v2572_v45 = vld [vmem:[%s5683_s4 + $0x638] sm:$0xff]  ;;  %v2577_v5 = vld [vmem:[%s5683_s4 + $0x660] sm:$0xff]  ;;  %v2582_v9 = vld [vmem:[%s5683_s4 + $0x688] sm:$0xff] }
  0x4e   : > { %2960 = vmatpush1.bf16.msra.mxu1 %v2959_v46  ;;  %2898 = vmatprep.subr.bf16.mxu0 %v2897_v47  ;;  %v2983_v46 = vpack.c.bf16 %v2514_v37, %v2512_v33  ;;  %v2516_v47 = vld [vmem:[%s5683_s4 + $0x480] sm:$0xff]  ;;  %v3037_v48 = vpack.c.bf16 %v2572_v45, %v2570_v44  ;;  %v2580_v1 = vld [vmem:[%s5683_s4 + $0x678] sm:$0xff]  ;;  %v2526_v13 = vld [vmem:[%s5683_s4 + $0x4d0] sm:$0xff] }
  0x4f   : > { %2962 = vmatprep.subr.bf16.mxu1 %v2961_v51  ;;  %v2985_v51 = vpack.c.bf16 %v2519_v42, %v2517_v41  ;;  %v2987_v61 = vpack.c.bf16 %v2518_v52, %v2516_v47  ;;  %v3045_v4 = vpack.c.bf16 %v2580_v1, %v2578_v0  ;;  %v2527_v8 = vld [vmem:[%s5683_s4 + $0x4d8] sm:$0xff]  ;;  %v2524_v12 = vld [vmem:[%s5683_s4 + $0x4c0] sm:$0xff]  ;;  %v2529_v18 = vld [vmem:[%s5683_s4 + $0x4e8] sm:$0xff] }
  0x50   : > { %v2584_v10 = vld [vmem:[%s5683_s4 + $0x698] sm:$0xff]  ;;  %v2581_v20 = vld [vmem:[%s5683_s4 + $0x680] sm:$0xff]  ;;  %v2583_v22 = vld [vmem:[%s5683_s4 + $0x690] sm:$0xff] }
  0x51   : > { %2900 = vmatpush1.bf16.msra.mxu0 %v2899_v57  ;;  %v2523_v57 = vld [vmem:[%s5683_s4 + $0x4b8] sm:$0xff]  ;;  %v2586_v24 = vld [vmem:[%s5683_s4 + $0x6a8] sm:$0xff]  ;;  %v2528_v28 = vld [vmem:[%s5683_s4 + $0x4e0] sm:$0xff]  ;;  %v3051_v30 = vpack.c.bf16 %v2583_v22, %v2581_v20 }
  0x52   : > { %2964 = vmatpush1.bf16.msra.mxu1 %v2963_v58  ;;  %2902 = vmatprep.subr.bf16.mxu0 %v2901_v59  ;;  %v3041_v58 = vpack.c.bf16 %v2576_v55, %v2574_v54  ;;  %v2573_v59 = vld [vmem:[%s5683_s4 + $0x640] sm:$0xff]  ;;  %v2989_v2 = vpack.c.bf16 %v2523_v57, %v2521_v56  ;;  %v2531_v23 = vld [vmem:[%s5683_s4 + $0x4f8] sm:$0xff]  ;;  %v2530_v29 = vld [vmem:[%s5683_s4 + $0x4f0] sm:$0xff] }
  0x53   : > { %2966 = vmatprep.subr.bf16.mxu1 %v2965_v63  ;;  %v3043_v63 = vpack.c.bf16 %v2575_v60, %v2573_v59  ;;  %v2997_v31 = vpack.c.bf16 %v2531_v23, %v2529_v18  ;;  %v2585_v34 = vld [vmem:[%s5683_s4 + $0x6a0] sm:$0xff]  ;;  %v2587_v35 = vld [vmem:[%s5683_s4 + $0x6b0] sm:$0xff]  ;;  %v2590_v37 = vld [vmem:[%s5683_s4 + $0x6c8] sm:$0xff]  ;;  %v2999_v39 = vpack.c.bf16 %v2530_v29, %v2528_v28 }
  0x54   : > { %v2532_v40 = vld [vmem:[%s5683_s4 + $0x500] sm:$0xff]  ;;  %v2534_v41 = vld [vmem:[%s5683_s4 + $0x510] sm:$0xff]  ;;  %v3055_v42 = vpack.c.bf16 %v2587_v35, %v2585_v34  ;;  %v2537_v44 = vld [vmem:[%s5683_s4 + $0x528] sm:$0xff] }
  0x55   : > { %2904 = vmatpush1.bf16.msra.mxu0 %v2903_v3  ;;  %v2522_v3 = vld [vmem:[%s5683_s4 + $0x4b0] sm:$0xff]  ;;  %v2594_v49 = vld [vmem:[%s5683_s4 + $0x6e8] sm:$0xff]  ;;  %v2596_v50 = vld [vmem:[%s5683_s4 + $0x6f8] sm:$0xff] }
  0x56   : > { %2968 = vmatpush1.bf16.msra.mxu1 %v2967_v6  ;;  %2970 = vmatprep.subr.bf16.mxu0 %v2969_v7  ;;  %v2579_v6 = vld [vmem:[%s5683_s4 + $0x670] sm:$0xff]  ;;  %v2525_v7 = vld [vmem:[%s5683_s4 + $0x4c8] sm:$0xff]  ;;  %v2991_v11 = vpack.c.bf16 %v2522_v3, %v2520_v62  ;;  %v2536_v52 = vld [vmem:[%s5683_s4 + $0x520] sm:$0xff] }
  0x57   : > { %3034 = vmatprep.subr.bf16.mxu1 %v3033_v38  ;;  %v2993_v16 = vpack.c.bf16 %v2527_v8, %v2525_v7  ;;  %v2592_v38 = vld [vmem:[%s5683_s4 + $0x6d8] sm:$0xff]  ;;  %v2591_v47 = vld [vmem:[%s5683_s4 + $0x6d0] sm:$0xff]  ;;  %v2541_v54 = vld [vmem:[%s5683_s4 + $0x548] sm:$0xff] }
  0x58   : > { %523 = vmatmul.mubr.f32.vlgmr.msra.gmra.mrb[0].mxu0 %v4128_v14  ;;  %v3057_v45 = vpack.c.bf16 %v2592_v38, %v2590_v37  ;;  %v2543_v57 = vld [vmem:[%s5683_s4 + $0x558] sm:$0xff]  ;;  %v2593_v59 = vld [vmem:[%s5683_s4 + $0x6e0] sm:$0xff]  ;;  %v2595_v60 = vld [vmem:[%s5683_s4 + $0x6f0] sm:$0xff] }
  0x59   : > { %678 = vmatmul.mubr.f32.vlgmr.msra.gmra.mrb[0].mxu1 %v4128_v14  ;;  %2972 = vmatpush1.bf16.msra.mxu0 %v2971_v15  ;;  %v3047_v15 = vpack.c.bf16 %v2579_v6, %v2577_v5  ;;  %v2600_v62 = vld [vmem:[%s5683_s4 + $0x718] sm:$0xff]  ;;  %v2428_v0 = vld [vmem:[%s5682_s3 + $0x28] sm:$0xff]  ;;  %v356_v1 = vld [vmem:[%s4335_s26] sm:$0xff]  ;;  %v3063_v7 = vpack.c.bf16 %v2595_v60, %v2593_v59 }
  0x5a   : > { %683 = vmatprep.mubr.f32.mxu1 %v4131_v17  ;;  %2974 = vmatprep.subr.bf16.mxu0 %v2973_v19  ;;  %v3049_v19 = vpack.c.bf16 %v2584_v10, %v2582_v9  ;;  %v2542_v5 = vld [vmem:[%s5683_s4 + $0x550] sm:$0xff]  ;;  %v2545_v6 = vld [vmem:[%s5683_s4 + $0x568] sm:$0xff]  ;;  %v3009_v9 = vpack.c.bf16 %v2543_v57, %v2541_v54  ;;  %v2547_v10 = vld [vmem:[%s5683_s4 + $0x578] sm:$0xff] }
  0x5b   : > { %528 = vmatprep.mubr.f32.mxu0 %v4131_v17  ;;  %3036 = vmatpush1.bf16.msra.mxu1 %v3035_v43  ;;  %v2604_v18 = vld [vmem:[%s5683_s4 + $0x738] sm:$0xff]  ;;  %v358_v22 = vld [vmem:[%s4335_s26 + $0x10] sm:$0xff]  ;;  %v2606_v37 = vld [vmem:[%s5683_s4 + $0x748] sm:$0xff] }
  0x5c   : > { %529 = vmatmul.mubr.f32.gmra.mrb[2].mxu0 %v4150_v25  ;;  %3038 = vmatprep.subr.bf16.mxu1 %v3037_v48  ;;  %v2539_v48 = vld [vmem:[%s5683_s4 + $0x538] sm:$0xff]  ;;  %v2429_v23 = vld [vmem:[%s5682_s3 + $0x30] sm:$0xff] }
  0x5d   : > { %684 = vmatmul.mubr.f32.gmra.mrb[2].mxu1 %v4150_v25  ;;  %2976 = vmatpush1.bf16.msra.mxu0 %v2975_v26  ;;  %v2588_v26 = vld [vmem:[%s5683_s4 + $0x6b8] sm:$0xff]  ;;  %v3005_v56 = vpack.c.bf16 %v2539_v48, %v2537_v44  ;;  %v2603_v34 = vld [vmem:[%s5683_s4 + $0x730] sm:$0xff]  ;;  %v4424_v35 = vadd.f32 %v2429_v23, %v358_v22  ;;  %v2553_v44 = vld [vmem:[%s5683_s4 + $0x5a8] sm:$0xff] }
  0x5e   : > { %2978 = vmatprep.subr.bf16.mxu0 %v2977_v27  ;;  %844 = vmatprep.mubr.f32.mxu0 %v4014_v21  ;;  %v2995_v27 = vpack.c.bf16 %v2526_v13, %v2524_v12  ;;  %v3053_v33 = vpack.c.bf16 %v2588_v26, %v2586_v24  ;;  %v2597_v12 = vld [vmem:[%s5683_s4 + $0x700] sm:$0xff]  ;;  %v2599_v13 = vld [vmem:[%s5683_s4 + $0x710] sm:$0xff]  ;;  %v2430_v20 = vld [vmem:[%s5682_s3 + $0x38] sm:$0xff] }
  0x5f   : > { %3040 = vmatpush1.bf16.msra.mxu1 %v3039_v53  ;;  %v2538_v53 = vld [vmem:[%s5683_s4 + $0x530] sm:$0xff]  ;;  %v2544_v26 = vld [vmem:[%s5683_s4 + $0x560] sm:$0xff]  ;;  %v3067_v28 = vpack.c.bf16 %v2599_v13, %v2597_v12  ;;  %v2608_v38 = vld [vmem:[%s5683_s4 + $0x758] sm:$0xff] }
  0x60   : > { %3042 = vmatprep.subr.bf16.mxu1 %v3041_v58  ;;  %v3061_v58 = vpack.c.bf16 %v2596_v50, %v2594_v49  ;;  %v3007_v3 = vpack.c.bf16 %v2538_v53, %v2536_v52  ;;  %v2555_v48 = vld [vmem:[%s5683_s4 + $0x5b8] sm:$0xff]  ;;  %v2610_v49 = vld [vmem:[%s5683_s4 + $0x768] sm:$0xff]  ;;  %v2552_v52 = vld [vmem:[%s5683_s4 + $0x5a0] sm:$0xff] }
  0x61   : > { %2980 = vmatpush1.bf16.msra.mxu0 %v2979_v32  ;;  %v2533_v32 = vld [vmem:[%s5683_s4 + $0x508] sm:$0xff]  ;;  %v2612_v50 = vld [vmem:[%s5683_s4 + $0x778] sm:$0xff]  ;;  %v2554_v53 = vld [vmem:[%s5683_s4 + $0x5b0] sm:$0xff] }
  0x62   : > { %2982 = vmatprep.subr.bf16.mxu0 %v2981_v36  ;;  %v2535_v36 = vld [vmem:[%s5683_s4 + $0x518] sm:$0xff]  ;;  %v3077_v57 = vpack.c.bf16 %v2612_v50, %v2610_v49  ;;  %v2611_v59 = vld [vmem:[%s5683_s4 + $0x770] sm:$0xff]  ;;  %v2560_v13 = vld [vmem:[%s5683_s4 + $0x5e0] sm:$0xff] }
  0x63   : > { %3044 = vmatpush1.bf16.msra.mxu1 %v3043_v63  ;;  %v3001_v43 = vpack.c.bf16 %v2535_v36, %v2533_v32  ;;  %v357_v63 = vld [vmem:[%s4335_s26 + $0x8] sm:$0xff]  ;;  %v2551_v36 = vld [vmem:[%s5683_s4 + $0x598] sm:$0xff]  ;;  %v2617_v23 = vld [vmem:[%s5683_s4 + $0x7a0] sm:$0xff] }
  0x64   : > { %3046 = vmatprep.subr.bf16.mxu1 %v3045_v4  ;;  %v2540_v4 = vld [vmem:[%s5683_s4 + $0x540] sm:$0xff]  ;;  %v4378_v8 = vadd.f32 %v2428_v0, %v357_v63  ;;  %v2559_v60 = vld [vmem:[%s5683_s4 + $0x5d8] sm:$0xff]  ;;  %v3023_v63 = vpack.c.bf16 %v2554_v53, %v2552_v52  ;;  %v2627_v52 = vld [vmem:[%s5683_s4 + $0x7f0] sm:$0xff] }
  0x65   : > { %2984 = vmatpush1.bf16.msra.mxu0 %v2983_v46  ;;  %v2589_v46 = vld [vmem:[%s5683_s4 + $0x6c0] sm:$0xff]  ;;  %v3011_v24 = vpack.c.bf16 %v2542_v5, %v2540_v4  ;;  %v2561_v4 = vld [vmem:[%s5683_s4 + $0x5e8] sm:$0xff]  ;;  %v2641_v49 = vld [vmem:[%s5683_s4 + $0x858] sm:$0xff] }
  0x66   : > { %2986 = vmatprep.subr.bf16.mxu0 %v2985_v51  ;;  %v3003_v51 = vpack.c.bf16 %v2534_v41, %v2532_v40  ;;  %v3059_v55 = vpack.c.bf16 %v2591_v47, %v2589_v46  ;;  %689 = vmatprep.mubr.f32.mxu1 %v4378_v8  ;;  %v2548_v40 = vld [vmem:[%s5683_s4 + $0x580] sm:$0xff]  ;;  %v2550_v41 = vld [vmem:[%s5683_s4 + $0x590] sm:$0xff] }
  0x67   : > { %3048 = vmatpush1.bf16.msra.mxu1 %v3047_v15  ;;  %v2605_v46 = vld [vmem:[%s5683_s4 + $0x740] sm:$0xff]  ;;  %v2607_v47 = vld [vmem:[%s5683_s4 + $0x750] sm:$0xff] }
  0x68   : > { %3050 = vmatprep.subr.bf16.mxu1 %v3049_v19  ;;  %v359_v19 = vld [vmem:[%s4335_s26 + $0x18] sm:$0xff]  ;;  %v3075_v54 = vpack.c.bf16 %v2607_v47, %v2605_v46  ;;  %v2556_v0 = vld [vmem:[%s5683_s4 + $0x5c0] sm:$0xff]  ;;  %v2636_v46 = vld [vmem:[%s5683_s4 + $0x830] sm:$0xff]  ;;  %s2772_s26 = sshll.u32 %s3671_s9, 9  ;;  %s3538_s9 = scalar_lea.vmem %s5631_s23, 512 }
  0x69   : > { %2988 = vmatpush1.bf16.msra.mxu0 %v2987_v61  ;;  %v2598_v61 = vld [vmem:[%s5683_s4 + $0x708] sm:$0xff]  ;;  %v4413_v29 = vadd.f32 %v2430_v20, %v359_v19  ;;  %s5636_s10 = scalar_lea.hbm %s5687_s8, %s2772_s26  ;;  %p3539_p11 = scmp.ne.s32.totalorder %s5631_s23, %s3538_s9 }
  0x6a   : > { %2990 = vmatprep.subr.bf16.mxu0 %v2989_v2  ;;  %v2427_v2 = vld [vmem:[%s5682_s3 + $0x20] sm:$0xff]  ;;  %v2631_v20 = vld [vmem:[%s5683_s4 + $0x808] sm:$0xff]  ;;  %p3546_p1 = scmp.lt.s32.totalorder %s3544_s19, %s3538_s9 }
  0x6b   : > { %3052 = vmatpush1.bf16.msra.mxu1 %v3051_v30  ;;  %v4389_v15 = vadd.f32 %v2427_v2, %v356_v1  ;;  %v3013_v30 = vpack.c.bf16 %v2547_v10, %v2545_v6  ;;  %v2558_v1 = vld [vmem:[%s5683_s4 + $0x5d0] sm:$0xff]  ;;  %v2613_v6 = vld [vmem:[%s5683_s4 + $0x780] sm:$0xff]  ;;  %v2618_v10 = vld [vmem:[%s5683_s4 + $0x7a8] sm:$0xff]  ;;  %p3540_p12 = pnand %p3539_p11, %p3688_p5 }
  0x6c   : > { %3054 = vmatprep.subr.bf16.mxu1 %v3053_v33  ;;  %v2601_v33 = vld [vmem:[%s5683_s4 + $0x720] sm:$0xff]  ;;  %v3027_v12 = vpack.c.bf16 %v2558_v1, %v2556_v0  ;;  %v2639_v47 = vld [vmem:[%s5683_s4 + $0x848] sm:$0xff]  ;;  %v2649_v1 = vld [vmem:[%s5683_s4 + $0x898] sm:$0xff]  ;;  %p3547_p2 = por %p3546_p1, %p3545_p0 }
  0x6d   : > { %2992 = vmatpush1.bf16.msra.mxu0 %v2991_v11  ;;  %v3065_v11 = vpack.c.bf16 %v2600_v62, %v2598_v61  ;;  %690 = vmatmul.mubr.f32.gmra.mrb[4].mxu1 %v4389_v15  ;;  %v2614_v61 = vld [vmem:[%s5683_s4 + $0x788] sm:$0xff]  ;;  %v2616_v62 = vld [vmem:[%s5683_s4 + $0x798] sm:$0xff]  ;;  %p3541_p13 = pneg %p3540_p12 }
  0x6e   : > { %2994 = vmatprep.subr.bf16.mxu0 %v2993_v16  ;;  %v2602_v16 = vld [vmem:[%s5683_s4 + $0x728] sm:$0xff]  ;;  %695 = vmatprep.mubr.f32.mxu1 %v4413_v29  ;;  %v3081_v5 = vpack.c.bf16 %v2616_v62, %v2614_v61  ;;  %v2642_v62 = vld [vmem:[%s5683_s4 + $0x860] sm:$0xff] }
  0x6f   : > { %3056 = vmatpush1.bf16.msra.mxu1 %v3055_v42  ;;  %v3069_v32 = vpack.c.bf16 %v2604_v18, %v2602_v16  ;;  %v3071_v42 = vpack.c.bf16 %v2603_v34, %v2601_v33  ;;  %v2562_v16 = vld [vmem:[%s5683_s4 + $0x5f0] sm:$0xff]  ;;  %v2630_v33 = vld [vmem:[%s5683_s4 + $0x800] sm:$0xff]  ;;  %v2647_v0 = vld [vmem:[%s5683_s4 + $0x888] sm:$0xff]  ;;  %p3548_p3 = pnand %p3547_p2, %p3541_p13 }
  0x70   : > { %3058 = vmatprep.subr.bf16.mxu1 %v3057_v45  ;;  %v3073_v45 = vpack.c.bf16 %v2608_v38, %v2606_v37  ;;  %v2632_v34 = vld [vmem:[%s5683_s4 + $0x810] sm:$0xff]  ;;  %v2637_v38 = vld [vmem:[%s5683_s4 + $0x838] sm:$0xff] }
  0x71   : > { %2996 = vmatpush1.bf16.msra.mxu0 %v2995_v27  ;;  %v2546_v27 = vld [vmem:[%s5683_s4 + $0x570] sm:$0xff]  ;;  %696 = vmatmul.mubr.f32.gmra.mrb[6].mxu1 %v4424_v35 }
  0x72   : > { %2998 = vmatprep.subr.bf16.mxu0 %v2997_v31  ;;  %v2549_v31 = vld [vmem:[%s5683_s4 + $0x588] sm:$0xff]  ;;  %1011 = vmatprep.mubr.f32.mxu1 %v4014_v21 }
  0x73   : > { %3060 = vmatpush1.bf16.msra.mxu1 %v3059_v55  ;;  %v3021_v55 = vpack.c.bf16 %v2555_v48, %v2553_v44 }
  0x74   : > { %3062 = vmatprep.subr.bf16.mxu1 %v3061_v58  ;;  %v2609_v58 = vld [vmem:[%s5683_s4 + $0x760] sm:$0xff] }
  0x75   : > { %3000 = vmatpush1.bf16.msra.mxu0 %v2999_v39  ;;  %v3015_v39 = vpack.c.bf16 %v2546_v27, %v2544_v26  ;;  %v3079_v2 = vpack.c.bf16 %v2611_v59, %v2609_v58  ;;  %v2633_v26 = vld [vmem:[%s5683_s4 + $0x818] sm:$0xff]  ;;  %v2622_v27 = vld [vmem:[%s5683_s4 + $0x7c8] sm:$0xff] }
  0x76   : > { %3002 = vmatprep.subr.bf16.mxu0 %v3001_v43  ;;  %v3017_v43 = vpack.c.bf16 %v2551_v36, %v2549_v31  ;;  %v2635_v36 = vld [vmem:[%s5683_s4 + $0x828] sm:$0xff]  ;;  %v2645_v59 = vld [vmem:[%s5683_s4 + $0x878] sm:$0xff] }
  0x77   : > { %3064 = vmatpush1.bf16.msra.mxu1 %v3063_v7  ;;  %v2615_v7 = vld [vmem:[%s5683_s4 + $0x790] sm:$0xff]  ;;  %v3101_v44 = vpack.c.bf16 %v2637_v38, %v2635_v36  ;;  %v2643_v58 = vld [vmem:[%s5683_s4 + $0x868] sm:$0xff]  ;;  %v2698_v36 = vld [vmem:[%s5683_s4 + $0xa18] sm:$0xff] }
  0x78   : > { %3066 = vmatprep.subr.bf16.mxu1 %v3065_v11  ;;  %v2620_v11 = vld [vmem:[%s5683_s4 + $0x7b8] sm:$0xff]  ;;  %v3083_v18 = vpack.c.bf16 %v2615_v7, %v2613_v6  ;;  %v3109_v61 = vpack.c.bf16 %v2645_v59, %v2643_v58  ;;  %v2650_v7 = vld [vmem:[%s5683_s4 + $0x8a0] sm:$0xff]  ;;  %v2708_v59 = vld [vmem:[%s5683_s4 + $0xa68] sm:$0xff] }
  0x79   : > { %3004 = vmatpush1.bf16.msra.mxu0 %v3003_v51  ;;  %v3019_v51 = vpack.c.bf16 %v2550_v41, %v2548_v40  ;;  %v3085_v22 = vpack.c.bf16 %v2620_v11, %v2618_v10  ;;  %v2623_v40 = vld [vmem:[%s5683_s4 + $0x7d0] sm:$0xff]  ;;  %v2626_v41 = vld [vmem:[%s5683_s4 + $0x7e8] sm:$0xff]  ;;  %v2657_v10 = vld [vmem:[%s5683_s4 + $0x8d8] sm:$0xff] }
  0x7a   : > { %3006 = vmatprep.subr.bf16.mxu0 %v3005_v56  ;;  %v2557_v56 = vld [vmem:[%s5683_s4 + $0x5c8] sm:$0xff] }
  0x7b   : > { %3068 = vmatpush1.bf16.msra.mxu1 %v3067_v28  ;;  %v2624_v28 = vld [vmem:[%s5683_s4 + $0x7d8] sm:$0xff] }
  0x7c   : > { %3070 = vmatprep.subr.bf16.mxu1 %v3069_v32  ;;  %v3097_v32 = vpack.c.bf16 %v2633_v26, %v2631_v20  ;;  %v3089_v37 = vpack.c.bf16 %v2624_v28, %v2622_v27  ;;  %v2665_v26 = vld [vmem:[%s5683_s4 + $0x918] sm:$0xff]  ;;  %v2662_v28 = vld [vmem:[%s5683_s4 + $0x900] sm:$0xff] }
  0x7d   : > { %3008 = vmatpush1.bf16.msra.mxu0 %v3007_v3  ;;  %v3025_v3 = vpack.c.bf16 %v2559_v60, %v2557_v56  ;;  %v2640_v56 = vld [vmem:[%s5683_s4 + $0x850] sm:$0xff] }
  0x7e   : > { %3010 = vmatprep.subr.bf16.mxu0 %v3009_v9  ;;  %v2563_v9 = vld [vmem:[%s5683_s4 + $0x5f8] sm:$0xff] }
  0x7f   : > { %3072 = vmatpush1.bf16.msra.mxu1 %v3071_v42  ;;  %v3029_v19 = vpack.c.bf16 %v2563_v9, %v2561_v4  ;;  %v2628_v42 = vld [vmem:[%s5683_s4 + $0x7f8] sm:$0xff]  ;;  %v2648_v4 = vld [vmem:[%s5683_s4 + $0x890] sm:$0xff] }
  0x80   : > { %3074 = vmatprep.subr.bf16.mxu1 %v3073_v45  ;;  %v2634_v45 = vld [vmem:[%s5683_s4 + $0x820] sm:$0xff]  ;;  %v3093_v50 = vpack.c.bf16 %v2628_v42, %v2626_v41  ;;  %v2652_v9 = vld [vmem:[%s5683_s4 + $0x8b0] sm:$0xff]  ;;  %v2702_v41 = vld [vmem:[%s5683_s4 + $0xa38] sm:$0xff] }
  0x81   : > { %3012 = vmatpush1.bf16.msra.mxu0 %v3011_v24  ;;  %v2619_v24 = vld [vmem:[%s5683_s4 + $0x7b0] sm:$0xff]  ;;  %v3103_v53 = vpack.c.bf16 %v2636_v46, %v2634_v45  ;;  %v3119_v11 = vpack.c.bf16 %v2652_v9, %v2650_v7  ;;  %v2699_v45 = vld [vmem:[%s5683_s4 + $0xa20] sm:$0xff] }
  0x82   : > { %3014 = vmatprep.subr.bf16.mxu0 %v3013_v30  ;;  %v3031_v30 = vpack.c.bf16 %v2562_v16, %v2560_v13  ;;  %v3087_v31 = vpack.c.bf16 %v2619_v24, %v2617_v23  ;;  %v2654_v13 = vld [vmem:[%s5683_s4 + $0x8c0] sm:$0xff]  ;;  %v2656_v16 = vld [vmem:[%s5683_s4 + $0x8d0] sm:$0xff]  ;;  %v2663_v24 = vld [vmem:[%s5683_s4 + $0x908] sm:$0xff] }
  0x83   : > { %3076 = vmatpush1.bf16.msra.mxu1 %v3075_v54  ;;  %v3105_v54 = vpack.c.bf16 %v2641_v49, %v2639_v47  ;;  %v2660_v23 = vld [vmem:[%s5683_s4 + $0x8f0] sm:$0xff]  ;;  %v2704_v47 = vld [vmem:[%s5683_s4 + $0xa48] sm:$0xff]  ;;  %v2666_v49 = vld [vmem:[%s5683_s4 + $0x920] sm:$0xff] }
  0x84   : > { %3078 = vmatprep.subr.bf16.mxu1 %v3077_v57  ;;  %v2701_v46 = vld [vmem:[%s5683_s4 + $0xa30] sm:$0xff]  ;;  %v2674_v7 = vld [vmem:[%s5683_s4 + $0x960] sm:$0xff] }
  0x85   : > { %3016 = vmatpush1.bf16.msra.mxu0 %v3015_v39  ;;  %v2621_v39 = vld [vmem:[%s5683_s4 + $0x7c0] sm:$0xff]  ;;  %v2676_v9 = vld [vmem:[%s5683_s4 + $0x970] sm:$0xff] }
  0x86   : > { %3018 = vmatprep.subr.bf16.mxu0 %v3017_v43  ;;  %v3099_v43 = vpack.c.bf16 %v2632_v34, %v2630_v33  ;;  %v3091_v48 = vpack.c.bf16 %v2623_v40, %v2621_v39  ;;  %v2669_v33 = vld [vmem:[%s5683_s4 + $0x938] sm:$0xff]  ;;  %v2696_v34 = vld [vmem:[%s5683_s4 + $0xa08] sm:$0xff]  ;;  %v2697_v39 = vld [vmem:[%s5683_s4 + $0xa10] sm:$0xff] }
  0x87   : > { %3080 = vmatpush1.bf16.msra.mxu1 %v3079_v2  ;;  %v3113_v2 = vpack.c.bf16 %v2649_v1, %v2647_v0  ;;  %v3161_v38 = vpack.c.bf16 %v2698_v36, %v2696_v34  ;;  %v2700_v40 = vld [vmem:[%s5683_s4 + $0xa28] sm:$0xff]  ;;  %v2677_v1 = vld [vmem:[%s5683_s4 + $0x978] sm:$0xff] }
  0x88   : > { %3082 = vmatprep.subr.bf16.mxu1 %v3081_v5  ;;  %v2675_v0 = vld [vmem:[%s5683_s4 + $0x968] sm:$0xff]  ;;  %v2722_v34 = vld [vmem:[%s5683_s4 + $0xad8] sm:$0xff] }
  0x89   : > { %3020 = vmatpush1.bf16.msra.mxu0 %v3019_v51  ;;  %v2625_v51 = vld [vmem:[%s5683_s4 + $0x7e0] sm:$0xff] }
  0x8a   : > { %3022 = vmatprep.subr.bf16.mxu0 %v3021_v55  ;;  %v2638_v55 = vld [vmem:[%s5683_s4 + $0x840] sm:$0xff]  ;;  %v3095_v57 = vpack.c.bf16 %v2627_v52, %v2625_v51  ;;  %v2706_v51 = vld [vmem:[%s5683_s4 + $0xa58] sm:$0xff]  ;;  %v2671_v52 = vld [vmem:[%s5683_s4 + $0x948] sm:$0xff] }
  0x8b   : > { %3084 = vmatpush1.bf16.msra.mxu1 %v3083_v18  ;;  %v3107_v60 = vpack.c.bf16 %v2640_v56, %v2638_v55  ;;  %v2659_v18 = vld [vmem:[%s5683_s4 + $0x8e8] sm:$0xff]  ;;  %v3169_v55 = vpack.c.bf16 %v2706_v51, %v2704_v47  ;;  %v2703_v56 = vld [vmem:[%s5683_s4 + $0xa40] sm:$0xff]  ;;  %v2726_v47 = vld [vmem:[%s5683_s4 + $0xaf8] sm:$0xff] }
  0x8c   : > { %3086 = vmatprep.subr.bf16.mxu1 %v3085_v22  ;;  %v2658_v22 = vld [vmem:[%s5683_s4 + $0x8e0] sm:$0xff]  ;;  %v2691_v51 = vld [vmem:[%s5683_s4 + $0x9e8] sm:$0xff] }
  0x8d   : > { %3024 = vmatpush1.bf16.msra.mxu0 %v3023_v63  ;;  %v2644_v63 = vld [vmem:[%s5683_s4 + $0x870] sm:$0xff]  ;;  %v3127_v27 = vpack.c.bf16 %v2660_v23, %v2658_v22  ;;  %v2678_v22 = vld [vmem:[%s5683_s4 + $0x980] sm:$0xff] }
  0x8e   : > { %3026 = vmatprep.subr.bf16.mxu0 %v3025_v3  ;;  %v2646_v3 = vld [vmem:[%s5683_s4 + $0x880] sm:$0xff]  ;;  %v2680_v23 = vld [vmem:[%s5683_s4 + $0x990] sm:$0xff] }
  0x8f   : > { %3088 = vmatpush1.bf16.msra.mxu1 %v3087_v31  ;;  %v3115_v5 = vpack.c.bf16 %v2648_v4, %v2646_v3  ;;  %v2664_v31 = vld [vmem:[%s5683_s4 + $0x910] sm:$0xff]  ;;  %v2707_v3 = vld [vmem:[%s5683_s4 + $0xa60] sm:$0xff] }
  0x90   : > { %3090 = vmatprep.subr.bf16.mxu1 %v3089_v37  ;;  %v2695_v37 = vld [vmem:[%s5683_s4 + $0xa00] sm:$0xff]  ;;  %v3131_v42 = vpack.c.bf16 %v2664_v31, %v2662_v28  ;;  %v2709_v4 = vld [vmem:[%s5683_s4 + $0xa70] sm:$0xff] }
  0x91   : > { %3028 = vmatpush1.bf16.msra.mxu0 %v3027_v12  ;;  %v2717_v31 = vld [vmem:[%s5683_s4 + $0xab0] sm:$0xff] }
  0x92   : > { %3030 = vmatprep.subr.bf16.mxu0 %v3029_v19  ;;  %v3123_v19 = vpack.c.bf16 %v2656_v16, %v2654_v13  ;;  %v2711_v13 = vld [vmem:[%s5683_s4 + $0xa80] sm:$0xff]  ;;  %v2713_v16 = vld [vmem:[%s5683_s4 + $0xa90] sm:$0xff] }
  0x93   : > { %3092 = vmatpush1.bf16.msra.mxu1 %v3091_v48 }
  0x94   : > { %3094 = vmatprep.subr.bf16.mxu1 %v3093_v50  ;;  %v2668_v50 = vld [vmem:[%s5683_s4 + $0x930] sm:$0xff] }
  0x95   : > { %3032 = vmatpush1.bf16.msra.mxu0 %v3031_v30  ;;  %v3129_v30 = vpack.c.bf16 %v2665_v26, %v2663_v24  ;;  %v3135_v58 = vpack.c.bf16 %v2668_v50, %v2666_v49  ;;  %v2683_v24 = vld [vmem:[%s5683_s4 + $0x9a8] sm:$0xff]  ;;  %v2685_v26 = vld [vmem:[%s5683_s4 + $0x9b8] sm:$0xff]  ;;  %v2686_v49 = vld [vmem:[%s5683_s4 + $0x9c0] sm:$0xff] }
  0x96   : > { %3098 = vmatprep.subr.bf16.mxu0 %v3097_v32  ;;  %v2667_v32 = vld [vmem:[%s5683_s4 + $0x928] sm:$0xff]  ;;  %v3149_v36 = vpack.c.bf16 %v2685_v26, %v2683_v24  ;;  %v2688_v50 = vld [vmem:[%s5683_s4 + $0x9d0] sm:$0xff] }
  0x97   : > { %3096 = vmatpush1.bf16.msra.mxu1 %v3095_v57  ;;  %v3133_v48 = vpack.c.bf16 %v2669_v33, %v2667_v32  ;;  %v2705_v57 = vld [vmem:[%s5683_s4 + $0xa50] sm:$0xff]  ;;  %v3147_v32 = vpack.c.bf16 %v2680_v23, %v2678_v22  ;;  %v2720_v33 = vld [vmem:[%s5683_s4 + $0xac8] sm:$0xff]  ;;  %v2738_v23 = vld [vmem:[%s5683_s4 + $0xb58] sm:$0xff] }
  0x98   : > { %845 = vmatmul.mubr.f32.vlgmr.msra.gmra.mrb[4].mxu0 %v4128_v14  ;;  %3162 = vmatprep.subr.bf16.mxu1 %v3161_v38  ;;  %v2684_v38 = vld [vmem:[%s5683_s4 + $0x9b0] sm:$0xff]  ;;  %v2736_v22 = vld [vmem:[%s5683_s4 + $0xb48] sm:$0xff] }
  0x99   : > { %3100 = vmatpush1.bf16.msra.mxu0 %v3099_v43  ;;  %850 = vmatprep.mubr.f32.mxu0 %v4131_v17  ;;  %v3163_v43 = vpack.c.bf16 %v2697_v39, %v2695_v37  ;;  %v2682_v37 = vld [vmem:[%s5683_s4 + $0x9a0] sm:$0xff]  ;;  %v2687_v39 = vld [vmem:[%s5683_s4 + $0x9c8] sm:$0xff]  ;;  %v3201_v26 = vpack.c.bf16 %v2738_v23, %v2736_v22 }
  0x9a   : > { %3102 = vmatprep.subr.bf16.mxu0 %v3101_v44  ;;  %1012 = vmatmul.mubr.f32.vlgmr.msra.gmra.mrb[8].mxu1 %v4128_v14  ;;  %v3165_v44 = vpack.c.bf16 %v2702_v41, %v2700_v40  ;;  %v2689_v40 = vld [vmem:[%s5683_s4 + $0x9d8] sm:$0xff] }
  0x9b   : > { %1017 = vmatprep.mubr.f32.mxu1 %v4131_v17  ;;  %3164 = vmatpush1.bf16.msra.mxu1 %v3163_v43  ;;  %v2719_v43 = vld [vmem:[%s5683_s4 + $0xac0] sm:$0xff] }
  0x9c   : > { %851 = vmatmul.mubr.f32.gmra.mrb[6].mxu0 %v4150_v25  ;;  %3166 = vmatprep.subr.bf16.mxu1 %v3165_v44  ;;  %v2721_v44 = vld [vmem:[%s5683_s4 + $0xad0] sm:$0xff] }
  0x9d   : > { %3104 = vmatpush1.bf16.msra.mxu0 %v3103_v53  ;;  %856 = vmatprep.mubr.f32.mxu0 %v4378_v8  ;;  %v3111_v8 = vpack.c.bf16 %v2644_v63, %v2642_v62  ;;  %v2673_v53 = vld [vmem:[%s5683_s4 + $0x958] sm:$0xff]  ;;  %v2670_v62 = vld [vmem:[%s5683_s4 + $0x940] sm:$0xff]  ;;  %v2672_v63 = vld [vmem:[%s5683_s4 + $0x950] sm:$0xff] }
  0x9e   : > { %3106 = vmatprep.subr.bf16.mxu0 %v3105_v54  ;;  %1018 = vmatmul.mubr.f32.gmra.mrb[10].mxu1 %v4150_v25  ;;  %v3167_v54 = vpack.c.bf16 %v2701_v46, %v2699_v45  ;;  %v3151_v45 = vpack.c.bf16 %v2684_v38, %v2682_v37  ;;  %v2724_v46 = vld [vmem:[%s5683_s4 + $0xae8] sm:$0xff]  ;;  %v2746_v38 = vld [vmem:[%s5683_s4 + $0xb98] sm:$0xff] }
  0x9f   : > { %1333 = vmatprep.mubr.f32.mxu1 %v4014_v21  ;;  %v2744_v37 = vld [vmem:[%s5683_s4 + $0xb88] sm:$0xff] }
  0xa0   : > { %857 = vmatmul.mubr.f32.gmra.mrb[8].mxu0 %v4389_v15  ;;  %v2651_v15 = vld [vmem:[%s5683_s4 + $0x8a8] sm:$0xff]  ;;  %3168 = vmatpush1.bf16.msra.mxu1 %v3167_v54  ;;  %v3189_v54 = vpack.c.bf16 %v2726_v47, %v2724_v46  ;;  %v2747_v47 = vld [vmem:[%s5683_s4 + $0xba0] sm:$0xff] }
  0xa1   : > { %3108 = vmatpush1.bf16.msra.mxu0 %v3107_v60  ;;  %862 = vmatprep.mubr.f32.mxu0 %v4413_v29  ;;  %v2653_v29 = vld [vmem:[%s5683_s4 + $0x8b8] sm:$0xff] }
  0xa2   : > { %3110 = vmatprep.subr.bf16.mxu0 %v3109_v61  ;;  %v3117_v6 = vpack.c.bf16 %v2653_v29, %v2651_v15  ;;  %v2710_v60 = vld [vmem:[%s5683_s4 + $0xa78] sm:$0xff]  ;;  %v3137_v61 = vpack.c.bf16 %v2673_v53, %v2671_v52  ;;  %3170 = vmatprep.subr.bf16.mxu1 %v3169_v55  ;;  %v3139_v15 = vpack.c.bf16 %v2672_v63, %v2670_v62  ;;  %v2712_v29 = vld [vmem:[%s5683_s4 + $0xa88] sm:$0xff]  ;;  %v2723_v55 = vld [vmem:[%s5683_s4 + $0xae0] sm:$0xff] }
  0xa3   : > { %v2693_v52 = vld [vmem:[%s5683_s4 + $0x9f8] sm:$0xff]  ;;  %v3187_v53 = vpack.c.bf16 %v2721_v44, %v2719_v43  ;;  %v370_v63 = vld [vmem:[%s343_s25 + $0x8] sm:$0xff] }
  0xa4   : > { %863 = vmatmul.mubr.f32.gmra.mrb[10].mxu0 %v4424_v35  ;;  %v2655_v35 = vld [vmem:[%s5683_s4 + $0x8c8] sm:$0xff]  ;;  %v2750_v44 = vld [vmem:[%s5683_s4 + $0xbb8] sm:$0xff] }
  0xa5   : > { %3112 = vmatpush1.bf16.msra.mxu0 %v3111_v8  ;;  %1166 = vmatprep.mubr.f32.mxu0 %v4014_v21  ;;  %v3121_v12 = vpack.c.bf16 %v2657_v10, %v2655_v35  ;;  %v2661_v21 = vld [vmem:[%s5683_s4 + $0x8f8] sm:$0xff]  ;;  %v3171_v8 = vpack.c.bf16 %v2705_v57, %v2703_v56  ;;  %v2679_v35 = vld [vmem:[%s5683_s4 + $0x988] sm:$0xff]  ;;  %v2725_v56 = vld [vmem:[%s5683_s4 + $0xaf0] sm:$0xff]  ;;  %v3155_v57 = vpack.c.bf16 %v2688_v50, %v2686_v49 }
  0xa6   : > { %3114 = vmatprep.subr.bf16.mxu0 %v3113_v2  ;;  %v3125_v20 = vpack.c.bf16 %v2661_v21, %v2659_v18  ;;  %v3173_v2 = vpack.c.bf16 %v2710_v60, %v2708_v59  ;;  %v2681_v10 = vld [vmem:[%s5683_s4 + $0x998] sm:$0xff]  ;;  %v3143_v18 = vpack.c.bf16 %v2676_v9, %v2674_v7  ;;  %v2716_v21 = vld [vmem:[%s5683_s4 + $0xaa8] sm:$0xff]  ;;  %v2690_v59 = vld [vmem:[%s5683_s4 + $0x9e0] sm:$0xff] }
  0xa7   : > { %3172 = vmatpush1.bf16.msra.mxu1 %v3171_v8  ;;  %v2692_v60 = vld [vmem:[%s5683_s4 + $0x9f0] sm:$0xff]  ;;  %v369_v8 = vld [vmem:[%s343_s25] sm:$0xff]  ;;  %v2728_v9 = vld [vmem:[%s5683_s4 + $0xb08] sm:$0xff] }
  0xa8   : > { %3174 = vmatprep.subr.bf16.mxu1 %v3173_v2  ;;  %v3159_v62 = vpack.c.bf16 %v2692_v60, %v2690_v59  ;;  %v2431_v2 = vld [vmem:[%s5682_s3 + $0x40] sm:$0xff]  ;;  %v2748_v43 = vld [vmem:[%s5683_s4 + $0xba8] sm:$0xff]  ;;  %v2754_v50 = vld [vmem:[%s5683_s4 + $0xbd8] sm:$0xff] }
  0xa9   : > { %3116 = vmatpush1.bf16.msra.mxu0 %v3115_v5  ;;  %v2714_v5 = vld [vmem:[%s5683_s4 + $0xa98] sm:$0xff]  ;;  %v3213_v46 = vpack.c.bf16 %v2750_v44, %v2748_v43  ;;  %v2752_v49 = vld [vmem:[%s5683_s4 + $0xbc8] sm:$0xff]  ;;  %v2755_v59 = vld [vmem:[%s5683_s4 + $0xbe0] sm:$0xff] }
  0xaa   : > { %3118 = vmatprep.subr.bf16.mxu0 %v3117_v6  ;;  %v3141_v6 = vpack.c.bf16 %v2677_v1, %v2675_v0  ;;  %v2432_v0 = vld [vmem:[%s5682_s3 + $0x48] sm:$0xff]  ;;  %v2757_v60 = vld [vmem:[%s5683_s4 + $0xbf0] sm:$0xff] }
  0xab   : > { %v4855_v1 = vadd.f32 %v2432_v0, %v370_v63 }
  0xad   : > { %3120 = vmatpush1.bf16.msra.mxu0 %v3119_v11  ;;  %v3175_v11 = vpack.c.bf16 %v2709_v4, %v2707_v3  ;;  %v372_v3 = vld [vmem:[%s343_s25 + $0x18] sm:$0xff] }
  0xae   : > { %3122 = vmatprep.subr.bf16.mxu0 %v3121_v12  ;;  %v3177_v12 = vpack.c.bf16 %v2714_v5, %v2712_v29  ;;  %v2434_v4 = vld [vmem:[%s5682_s3 + $0x58] sm:$0xff]  ;;  %v371_v5 = vld [vmem:[%s343_s25 + $0x10] sm:$0xff] }
  0xaf   : > { %3176 = vmatpush1.bf16.msra.mxu1 %v3175_v11  ;;  %v4867_v29 = vadd.f32 %v2434_v4, %v372_v3  ;;  %v2727_v11 = vld [vmem:[%s5683_s4 + $0xb00] sm:$0xff] }
  0xb0   : > { %3178 = vmatprep.subr.bf16.mxu1 %v3177_v12  ;;  %v2729_v12 = vld [vmem:[%s5683_s4 + $0xb10] sm:$0xff] }
  0xb1   : > { %3124 = vmatpush1.bf16.msra.mxu0 %v3123_v19  ;;  %v2718_v19 = vld [vmem:[%s5683_s4 + $0xab8] sm:$0xff] }
  0xb2   : > { %3126 = vmatprep.subr.bf16.mxu0 %v3125_v20  ;;  %v3145_v20 = vpack.c.bf16 %v2681_v10, %v2679_v35  ;;  %v3181_v28 = vpack.c.bf16 %v2718_v19, %v2716_v21  ;;  %v2730_v35 = vld [vmem:[%s5683_s4 + $0xb18] sm:$0xff]  ;;  %v2731_v21 = vld [vmem:[%s5683_s4 + $0xb20] sm:$0xff] }
  0xb3   : > { %v3193_v10 = vpack.c.bf16 %v2730_v35, %v2728_v9 }
  0xb5   : > { %3128 = vmatpush1.bf16.msra.mxu0 %v3127_v27  ;;  %v3179_v27 = vpack.c.bf16 %v2713_v16, %v2711_v13  ;;  %v3195_v13 = vpack.c.bf16 %v2729_v12, %v2727_v11  ;;  %v2732_v16 = vld [vmem:[%s5683_s4 + $0xb28] sm:$0xff] }
  0xb6   : > { %3130 = vmatprep.subr.bf16.mxu0 %v3129_v30  ;;  %v2715_v30 = vld [vmem:[%s5683_s4 + $0xaa0] sm:$0xff] }
  0xb7   : > { %3180 = vmatpush1.bf16.msra.mxu1 %v3179_v27  ;;  %v3183_v41 = vpack.c.bf16 %v2717_v31, %v2715_v30  ;;  %v2735_v27 = vld [vmem:[%s5683_s4 + $0xb40] sm:$0xff]  ;;  %v2740_v30 = vld [vmem:[%s5683_s4 + $0xb68] sm:$0xff]  ;;  %v2742_v31 = vld [vmem:[%s5683_s4 + $0xb78] sm:$0xff] }
  0xb8   : > { %3182 = vmatprep.subr.bf16.mxu1 %v3181_v28  ;;  %v2737_v28 = vld [vmem:[%s5683_s4 + $0xb50] sm:$0xff] }
  0xb9   : > { %3132 = vmatpush1.bf16.msra.mxu0 %v3131_v42  ;;  %v3185_v42 = vpack.c.bf16 %v2722_v34, %v2720_v33  ;;  %v3205_v33 = vpack.c.bf16 %v2742_v31, %v2740_v30  ;;  %v2739_v34 = vld [vmem:[%s5683_s4 + $0xb60] sm:$0xff] }
  0xba   : > { %3134 = vmatprep.subr.bf16.mxu0 %v3133_v48  ;;  %v3153_v48 = vpack.c.bf16 %v2689_v40, %v2687_v39  ;;  %v3209_v40 = vpack.c.bf16 %v2746_v38, %v2744_v37  ;;  %v2629_v37 = vld [vmem:[%s5684_s5 + $0x6] sm:$0x3] }
  0xbb   : > { %3184 = vmatpush1.bf16.msra.mxu1 %v3183_v41  ;;  %v2743_v41 = vld [vmem:[%s5683_s4 + $0xb80] sm:$0xff] }
  0xbc   : > { %3186 = vmatprep.subr.bf16.mxu1 %v3185_v42  ;;  %v2745_v42 = vld [vmem:[%s5683_s4 + $0xb90] sm:$0xff] }
  0xbd   : > { %3136 = vmatpush1.bf16.msra.mxu0 %v3135_v58  ;;  %v3157_v58 = vpack.c.bf16 %v2693_v52, %v2691_v51  ;;  %v3217_v52 = vpack.c.bf16 %v2754_v50, %v2752_v49 }
  0xbe   : > { %3138 = vmatprep.subr.bf16.mxu0 %v3137_v61  ;;  %v3191_v61 = vpack.c.bf16 %v2725_v56, %v2723_v55  ;;  %v2756_v55 = vld [vmem:[%s5683_s4 + $0xbe8] sm:$0xff]  ;;  %v2758_v56 = vld [vmem:[%s5683_s4 + $0xbf8] sm:$0xff] }
  0xbf   : > { %3188 = vmatpush1.bf16.msra.mxu1 %v3187_v53  ;;  %v2751_v53 = vld [vmem:[%s5683_s4 + $0xbc0] sm:$0xff] }
  0xc0   : > { %3190 = vmatprep.subr.bf16.mxu1 %v3189_v54  ;;  %v2753_v54 = vld [vmem:[%s5683_s4 + $0xbd0] sm:$0xff] }
  0xc1   : > { %3140 = vmatpush1.bf16.msra.mxu0 %v3139_v15  ;;  %v4864_v15 = vadd.f32 %v2431_v2, %v369_v8 }
  0xc2   : > { %3142 = vmatprep.subr.bf16.mxu0 %v3141_v6  ;;  %v2433_v6 = vld [vmem:[%s5682_s3 + $0x50] sm:$0xff] }
  0xc3   : > { %3192 = vmatpush1.bf16.msra.mxu1 %v3191_v61  ;;  %v4873_v7 = vadd.f32 %v2433_v6, %v371_v5  ;;  %v3223_v61 = vpack.c.bf16 %v2757_v60, %v2755_v59 }
  0xc4   : > { %3194 = vmatprep.subr.bf16.mxu1 %v3193_v10 }
  0xc5   : > { %3144 = vmatpush1.bf16.msra.mxu0 %v3143_v18  ;;  %v2734_v18 = vld [vmem:[%s5683_s4 + $0xb38] sm:$0xff] }
  0xc6   : > { %3146 = vmatprep.subr.bf16.mxu0 %v3145_v20  ;;  %v3197_v19 = vpack.c.bf16 %v2734_v18, %v2732_v16  ;;  %v2733_v20 = vld [vmem:[%s5683_s4 + $0xb30] sm:$0xff] }
  0xc7   : > { %3196 = vmatpush1.bf16.msra.mxu1 %v3195_v13  ;;  %v3199_v24 = vpack.c.bf16 %v2733_v20, %v2731_v21 }
  0xc8   : > { %3198 = vmatprep.subr.bf16.mxu1 %v3197_v19 }
  0xc9   : > { %3148 = vmatpush1.bf16.msra.mxu0 %v3147_v32  ;;  %v3203_v32 = vpack.c.bf16 %v2737_v28, %v2735_v27  ;;  %v5025_v27 = vld [vmem:[%s5684_s5 + $0x4] sm:$0x3] }
  0xca   : > { %3150 = vmatprep.subr.bf16.mxu0 %v3149_v36  ;;  %v2741_v36 = vld [vmem:[%s5683_s4 + $0xb70] sm:$0xff] }
  0xcb   : > { %3200 = vmatpush1.bf16.msra.mxu1 %v3199_v24  ;;  %v3207_v39 = vpack.c.bf16 %v2741_v36, %v2739_v34 }
  0xcc   : > { %3202 = vmatprep.subr.bf16.mxu1 %v3201_v26 }
  0xcd   : > { %3152 = vmatpush1.bf16.msra.mxu0 %v3151_v45  ;;  %v3211_v45 = vpack.c.bf16 %v2745_v42, %v2743_v41 }
  0xce   : > { %3154 = vmatprep.subr.bf16.mxu0 %v3153_v48  ;;  %v2749_v48 = vld [vmem:[%s5683_s4 + $0xbb0] sm:$0xff] }
  0xcf   : > { %3204 = vmatpush1.bf16.msra.mxu1 %v3203_v32  ;;  %v3215_v51 = vpack.c.bf16 %v2749_v48, %v2747_v47 }
  0xd0   : > { %3206 = vmatprep.subr.bf16.mxu1 %v3205_v33 }
  0xd1   : > { %3156 = vmatpush1.bf16.msra.mxu0 %v3155_v57  ;;  %v3219_v57 = vpack.c.bf16 %v2753_v54, %v2751_v53 }
  0xd2   : > { %3158 = vmatprep.subr.bf16.mxu0 %v3157_v58  ;;  %v3221_v58 = vpack.c.bf16 %v2758_v56, %v2756_v55 }
  0xd3   : > { %3208 = vmatpush1.bf16.msra.mxu1 %v3207_v39 }
  0xd4   : > { %3210 = vmatprep.subr.bf16.mxu1 %v3209_v40 }
  0xd5   : > { %3160 = vmatpush1.bf16.msra.mxu0 %v3159_v62  ;;  %v448_v62 = vlaneseq }
  0xd7   : > { %3212 = vmatpush1.bf16.msra.mxu1 %v3211_v45  ;;  %v449_v63 = vshrl.u32 %v448_v62, 7 }
  0xd8   : > { %1167 = vmatmul.mubr.f32.vlgmr.msra.gmra.mrb[12].mxu0 %v4128_v14  ;;  %3214 = vmatprep.subr.bf16.mxu1 %v3213_v46 }
  0xd9   : > { %1172 = vmatprep.mubr.f32.mxu0 %v4131_v17  ;;  %v4980_v0 = vsub.s32 0, %v449_v63  ;;  %v4982_v8 = vsub.s32 1, %v449_v63 }
  0xdb   : > { %3216 = vmatpush1.bf16.msra.mxu1 %v3215_v51  ;;  %5695 = vst [vmem:[#allocation5_spill] sm:$0xff] %v4980_v0  ;;  %5696 = vst [vmem:[#allocation6_spill] sm:$0xff] %v4982_v8  ;;  %v777_v28 = vrot.slane %v5025_v27, %v4982_v8  ;;  %v944_v39 = vrot.slane %v2629_v37, %v4982_v8  ;;  %v2694_v51 = vld [vmem:[%s5684_s5 + $0x8] sm:$0x3] }
  0xdc   : > { %1173 = vmatmul.mubr.f32.gmra.mrb[14].mxu0 %v4150_v25  ;;  %3218 = vmatprep.subr.bf16.mxu1 %v3217_v52  ;;  %v1095_v52 = vrot.slane %v2694_v51, %v4980_v0  ;;  %v1099_v53 = vrot.slane %v2694_v51, %v4982_v8 }
  0xdd   : > { %1178 = vmatprep.mubr.f32.mxu0 %v4855_v1 }
  0xdf   : > { %3220 = vmatpush1.bf16.msra.mxu1 %v3219_v57 }
  0xe0   : > { %1179 = vmatmul.mubr.f32.gmra.mrb[16].mxu0 %v4864_v15  ;;  %3222 = vmatprep.subr.bf16.mxu1 %v3221_v58 }
  0xe1   : > { %1184 = vmatprep.mubr.f32.mxu0 %v4867_v29 }
  0xe3   : > { %3224 = vmatpush1.bf16.msra.mxu1 %v3223_v61 }
  0xe4   : > { %1185 = vmatmul.mubr.f32.gmra.mrb[18].mxu0 %v4873_v7 }
  0xe6   : > { %1334 = vmatmul.mubr.f32.vlgmr.msra.gmra.mrb[12].mxu1 %v4128_v14  ;;  %v4987_v14 = vld [vmem:[%s5684_s5] sm:$0x3] }
  0xe7   : > { %1339 = vmatprep.mubr.f32.mxu1 %v4131_v17  ;;  %v2499_v17 = vld [vmem:[%s5684_s5 + $0x2] sm:$0x3] }
  0xe8   : > { %v610_v2 = vrot.slane %v2499_v17, %v4982_v8 }
  0xea   : > { %1340 = vmatmul.mubr.f32.gmra.mrb[14].mxu1 %v4150_v25  ;;  %v606_v25 = vrot.slane %v2499_v17, %v4980_v0 }
  0xeb   : > { %1345 = vmatprep.mubr.f32.mxu1 %v4855_v1  ;;  %v455_v1 = vrot.slane %v4987_v14, %v4982_v8 }
  0xee   : > { %1346 = vmatmul.mubr.f32.gmra.mrb[16].mxu1 %v4864_v15 }
  0xef   : > { %1351 = vmatprep.mubr.f32.mxu1 %v4867_v29 }
  0xf2   : > { %1352 = vmatmul.mubr.f32.gmra.mrb[18].mxu1 %v4873_v7 }
 0x12b   : > { %v4996_v3 = vpop.f32.mrb[0].mxu0 }
 0x12c   : > { %v679_v4 = vpop.f32.mrb[0].mxu1  ;;  %v526_v15 = vpop.f32.mrb[1].mxu0 }
 0x12d   : > { %v4998_v29 = vadd.f32 %v679_v4, %v606_v25  ;;  %v5000_v5 = vadd.f32 %v526_v15, %v455_v1  ;;  %v681_v6 = vpop.f32.mrb[1].mxu1 }
 0x12e   : > { %v5002_v7 = vadd.f32 %v681_v6, %v610_v2 }
 0x12f   : > { %1442 = vmax.xlane.f32.xlu1 %v4998_v29  ;;  %v5005_v9 = vpop.f32.mrb[2].mxu0 }
 0x130   : > { %v685_v35 = vpop.f32.mrb[2].mxu1  ;;  %v532_v10 = vpop.f32.mrb[3].mxu0 }
 0x131   : > { %v5007_v11 = vadd.f32 %v685_v35, %v606_v25  ;;  %v5009_v12 = vadd.f32 %v532_v10, %v455_v1  ;;  %v687_v13 = vpop.f32.mrb[3].mxu1  ;;  %v940_v1 = vrot.slane %v2629_v37, %v4980_v0  ;;  %v451_v10 = vrot.slane %v4987_v14, %v4980_v0 }
 0x132   : > { %v5011_v16 = vadd.f32 %v687_v13, %v610_v2 }
 0x133   : > { %1444 = vmax.xlane.f32.xlu1 %v5007_v11 }
 0x140   : > { %v691_v18 = vpop.f32.mrb[4].mxu1 }
 0x141   : > { %v5014_v21 = vadd.f32 %v691_v18, %v606_v25  ;;  %v693_v19 = vpop.f32.mrb[5].mxu1 }
 0x142   : > { %v5016_v20 = vadd.f32 %v693_v19, %v610_v2 }
 0x144   : > { %v697_v22 = vpop.f32.mrb[6].mxu1 }
 0x145   : > { %v5018_v23 = vadd.f32 %v697_v22, %v606_v25  ;;  %v699_v24 = vpop.f32.mrb[7].mxu1 }
 0x146   : > { %v5020_v26 = vadd.f32 %v699_v24, %v610_v2  ;;  %v5090_v24 = vadd.f32 %v4996_v3, %v451_v10 }
 0x16b   : > { %v5029_v30 = vpop.f32.mrb[4].mxu0 }
 0x16c   : > { %v848_v31 = vpop.f32.mrb[5].mxu0 }
 0x16d   : > { %v5031_v32 = vadd.f32 %v848_v31, %v777_v28  ;;  %v1013_v42 = vpop.f32.mrb[8].mxu1 }
 0x16e   : > { %v1015_v43 = vpop.f32.mrb[9].mxu1  ;;  %v5080_v35 = vadd.f32 %v1013_v42, %v940_v1 }
 0x16f   : > { %v5033_v33 = vpop.f32.mrb[6].mxu0  ;;  %v5047_v45 = vadd.f32 %v1015_v43, %v944_v39 }
 0x170   : > { %v854_v34 = vpop.f32.mrb[7].mxu0 }
 0x171   : > { %v5035_v36 = vadd.f32 %v854_v34, %v777_v28  ;;  %v1019_v48 = vpop.f32.mrb[10].mxu1  ;;  %v5096_v34 = vadd.f32 %v5005_v9, %v451_v10 }
 0x172   : > { %v1021_v49 = vpop.f32.mrb[11].mxu1  ;;  %v5087_v19 = vadd.f32 %v1019_v48, %v940_v1 }
 0x173   : > { %v5040_v38 = vpop.f32.mrb[8].mxu0  ;;  %v5051_v50 = vadd.f32 %v1021_v49, %v944_v39  ;;  %v5108_v39 = vld [vmem:[%s5684_s5 + $0xa] sm:$0x3] }
 0x174   : > { %v860_v40 = vpop.f32.mrb[9].mxu0  ;;  %v5112_v9 = vrot.slane %v5108_v39, %v4982_v8 }
 0x175   : > { %v5043_v41 = vadd.f32 %v860_v40, %v777_v28 }
 0x177   : > { %5697 = vst [vmem:[#allocation7_spill] sm:$0xff] %v5043_v41  ;;  %v5045_v44 = vpop.f32.mrb[10].mxu0 }
 0x178   : > { %v866_v46 = vpop.f32.mrb[11].mxu0 }
 0x179   : > { %v5049_v47 = vadd.f32 %v866_v46, %v777_v28 }
 0x17b   : > { %5698 = vst [vmem:[#allocation8_spill] sm:$0xff] %v5049_v47 }
 0x1ab   : > { %v1168_v54 = vpop.f32.mrb[12].mxu0 }
 0x1ac   : > { %v5058_v55 = vadd.f32 %v1168_v54, %v1095_v52  ;;  %v1170_v56 = vpop.f32.mrb[13].mxu0 }
 0x1ad   : > { %v5060_v57 = vadd.f32 %v1170_v56, %v1099_v53 }
 0x1ae   : > { %1402 = vmax.xlane.f32.xlu0 %v5058_v55 }
 0x1af   : > { %v1174_v58 = vpop.f32.mrb[14].mxu0 }
 0x1b0   : > { %v5063_v59 = vadd.f32 %v1174_v58, %v1095_v52  ;;  %v1176_v60 = vpop.f32.mrb[15].mxu0 }
 0x1b1   : > { %v5065_v61 = vadd.f32 %v1176_v60, %v1099_v53 }
 0x1b2   : > { %1404 = vmax.xlane.f32.xlu0 %v5063_v59 }
 0x1b3   : > { %v1180_v62 = vpop.f32.mrb[16].mxu0 }
 0x1b4   : > { %v5068_v63 = vadd.f32 %v1180_v62, %v1095_v52  ;;  %v1182_v17 = vpop.f32.mrb[17].mxu0 }
 0x1b5   : > { %v5070_v25 = vadd.f32 %v1182_v17, %v1099_v53 }
 0x1b6   : > { %1406 = vmax.xlane.f32.xlu0 %v5068_v63 }
 0x1b7   : > { %v1186_v2 = vpop.f32.mrb[18].mxu0 }
 0x1b8   : > { %v5074_v4 = vadd.f32 %v1186_v2, %v1095_v52  ;;  %v1188_v15 = vpop.f32.mrb[19].mxu0 }
 0x1b9   : > { %v5076_v6 = vadd.f32 %v1188_v15, %v1099_v53  ;;  %v5114_v40 = vpop.f32.mrb[12].mxu1 }
 0x1ba   : > { %1408 = vmax.xlane.f32.xlu1 %v5074_v4  ;;  %1446 = vmax.xlane.f32.xlu0 %v5014_v21  ;;  %v1337_v42 = vpop.f32.mrb[13].mxu1 }
 0x1bb   : > { %v5117_v43 = vadd.f32 %v1337_v42, %v5112_v9 }
 0x1bc   : > { %v1443_v13 = vpop.xlane.xlu1 %1442 }
 0x1bd   : > { %v1450_v18 = vsub.f32 %v4998_v29, %v1443_v13  ;;  %v5119_v46 = vpop.f32.mrb[14].mxu1 }
 0x1be   : > { %1448 = vmax.xlane.f32.xlu1 %v5018_v23  ;;  %1358 = vmax.xlane.f32.xlu0 %v5080_v35  ;;  %v1343_v48 = vpop.f32.mrb[15].mxu1 }
 0x1bf   : > { %v1454_v22 = vmul.f32 1.442695, %v1450_v18  ;;  %v5122_v49 = vadd.f32 %v1343_v48, %v5112_v9 }
 0x1c0   : > { %v1445_v28 = vpop.xlane.xlu1 %1444 }
 0x1c1   : > { %3362 = vpow2.f32 %v1454_v22  ;;  %v1451_v31 = vsub.f32 %v5007_v11, %v1445_v28  ;;  %v5124_v51 = vpop.f32.mrb[16].mxu1 }
 0x1c2   : > { %1360 = vmax.xlane.f32.xlu0 %v5087_v19  ;;  %1378 = vmax.xlane.f32.xlu1 %v5090_v24  ;;  %v1349_v52 = vpop.f32.mrb[17].mxu1 }
 0x1c3   : > { %v1456_v14 = vmul.f32 1.442695, %v1451_v31  ;;  %v5127_v53 = vadd.f32 %v1349_v52, %v5112_v9 }
 0x1c5   : > { %3364 = vpow2.f32 %v1456_v14  ;;  %v5129_v54 = vpop.f32.mrb[18].mxu1 }
 0x1c6   : > { %1380 = vmax.xlane.f32.xlu1 %v5096_v34 }
 0x1cb   : > { %v5099_v37 = vpop.eup %3362 }
 0x1cc   : > { %1462 = vadd.xlane.f32.xlu0 %v5099_v37 }
 0x1cf   : > { %v5102_v3 = vpop.eup %3364 }
 0x1d0   : > { %1464 = vadd.xlane.f32.xlu1 %v5102_v3 }
 0x23b   : > { %v1403_v56 = vpop.xlane.xlu0 %1402 }
 0x23c   : > { %v1410_v58 = vsub.f32 %v5058_v55, %v1403_v56 }
 0x23e   : > { %v1414_v60 = vmul.f32 1.442695, %v1410_v58 }
 0x23f   : > { %v1405_v62 = vpop.xlane.xlu0 %1404 }
 0x240   : > { %3366 = vpow2.f32 %v1414_v60  ;;  %v1411_v17 = vsub.f32 %v5063_v59, %v1405_v62 }
 0x242   : > { %v1416_v1 = vmul.f32 1.442695, %v1411_v17 }
 0x243   : > { %v1407_v2 = vpop.xlane.xlu0 %1406 }
 0x244   : > { %3368 = vpow2.f32 %v1416_v1  ;;  %v1412_v15 = vsub.f32 %v5068_v63, %v1407_v2 }
 0x246   : > { %v1418_v10 = vmul.f32 1.442695, %v1412_v15 }
 0x247   : > { %v1409_v13 = vpop.xlane.xlu1 %1408  ;;  %v1447_v18 = vpop.xlane.xlu0 %1446 }
 0x248   : > { %3370 = vpow2.f32 %v1418_v10  ;;  %v1413_v22 = vsub.f32 %v5074_v4, %v1409_v13  ;;  %v1452_v28 = vsub.f32 %v5014_v21, %v1447_v18 }
 0x24a   : > { %v5136_v31 = vpop.eup %3366  ;;  %v1420_v14 = vmul.f32 1.442695, %v1413_v22  ;;  %v1458_v42 = vmul.f32 1.442695, %v1452_v28 }
 0x24b   : > { %v1449_v48 = vpop.xlane.xlu1 %1448  ;;  %1422 = vadd.xlane.f32.xlu0 %v5136_v31  ;;  %v1359_v52 = vpop.xlane.xlu0 %1358 }
 0x24c   : > { %3372 = vpow2.f32 %v1420_v14  ;;  %v1453_v56 = vsub.f32 %v5018_v23, %v1449_v48  ;;  %v1362_v58 = vsub.f32 %v5080_v35, %v1359_v52 }
 0x24d   : > { %3374 = vpow2.f32 %v1458_v42 }
 0x24e   : > { %v5141_v60 = vpop.eup %3368  ;;  %v1460_v62 = vmul.f32 1.442695, %v1453_v56  ;;  %v1364_v17 = vmul.f32 1.442695, %v1362_v58 }
 0x24f   : > { %v1361_v1 = vpop.xlane.xlu0 %1360  ;;  %1424 = vadd.xlane.f32.xlu1 %v5141_v60  ;;  %v1379_v2 = vpop.xlane.xlu1 %1378 }
 0x250   : > { %3376 = vpow2.f32 %v1460_v62  ;;  %v1363_v15 = vsub.f32 %v5087_v19, %v1361_v1  ;;  %v1382_v10 = vsub.f32 %v5090_v24, %v1379_v2  ;;  %v1262_v62 = vrot.slane %v5108_v39, %v4980_v0 }
 0x251   : > { %3378 = vpow2.f32 %v1364_v17 }
 0x252   : > { %v5146_v13 = vpop.eup %3370  ;;  %v1366_v18 = vmul.f32 1.442695, %v1363_v15  ;;  %v1384_v22 = vmul.f32 1.442695, %v1382_v10  ;;  %v5171_v2 = vadd.f32 %v5114_v40, %v1262_v62  ;;  %v773_v10 = vrot.slane %v5025_v27, %v4980_v0 }
 0x253   : > { %1426 = vadd.xlane.f32.xlu0 %v5146_v13  ;;  %v1381_v28 = vpop.xlane.xlu1 %1380  ;;  %v5180_v39 = vadd.f32 %v5119_v46, %v1262_v62  ;;  %v5188_v40 = vadd.f32 %v5124_v51, %v1262_v62  ;;  %v5196_v27 = vadd.f32 %v5129_v54, %v1262_v62 }
 0x254   : > { %3380 = vpow2.f32 %v1366_v18  ;;  %v1383_v14 = vsub.f32 %v5096_v34, %v1381_v28  ;;  %v5183_v18 = vadd.f32 %v5029_v30, %v773_v10  ;;  %v5199_v30 = vadd.f32 %v5040_v38, %v773_v10 }
 0x255   : > { %3382 = vpow2.f32 %v1384_v22  ;;  %v5191_v22 = vadd.f32 %v5033_v33, %v773_v10  ;;  %v5204_v46 = vadd.f32 %v5045_v44, %v773_v10  ;;  %v1355_v33 = vpop.f32.mrb[19].mxu1 }
 0x256   : > { %v5150_v42 = vpop.eup %3372  ;;  %v1386_v48 = vmul.f32 1.442695, %v1383_v14  ;;  %v5214_v38 = vadd.f32 %v1355_v33, %v5112_v9 }
 0x257   : > { %v5152_v52 = vpop.eup %3374  ;;  %1428 = vadd.xlane.f32.xlu1 %v5150_v42 }
 0x258   : > { %3384 = vpow2.f32 %v1386_v48  ;;  %1466 = vadd.xlane.f32.xlu0 %v5152_v52  ;;  %5699 = vst [vmem:[#allocation9_spill] sm:$0xff] %v5214_v38 }
 0x259   : > { %v1463_v44 = vpop.xlane.xlu0 %1462 }
 0x25a   : > { %v5156_v56 = vpop.eup %3376  ;;  %3386 = vrcp.f32 %v1463_v44 }
 0x25b   : > { %v5158_v58 = vpop.eup %3378  ;;  %1468 = vadd.xlane.f32.xlu1 %v5156_v56 }
 0x25c   : > { %1368 = vadd.xlane.f32.xlu0 %v5158_v58 }
 0x25d   : > { %v1465_v51 = vpop.xlane.xlu1 %1464 }
 0x25e   : > { %v5164_v17 = vpop.eup %3380  ;;  %3388 = vrcp.f32 %v1465_v51 }
 0x25f   : > { %v5166_v1 = vpop.eup %3382 }
 0x260   : > { %1370 = vadd.xlane.f32.xlu0 %v5164_v17  ;;  %1388 = vadd.xlane.f32.xlu1 %v5166_v1 }
 0x262   : > { %v5173_v15 = vpop.eup %3384 }
 0x264   : > { %1490 = vmax.xlane.f32.xlu0 %v5171_v2  ;;  %1390 = vadd.xlane.f32.xlu1 %v5173_v15  ;;  %v3387_v48 = vpop.eup %3386 }
 0x265   : > { %v1471_v47 = vmul.f32 %v3387_v48, %v5099_v37 }
 0x267   : > { %v1478_v41 = vmul.f32 %v1471_v47, %v5058_v55 }
 0x268   : > { %1530 = vmax.xlane.f32.xlu0 %v5183_v18  ;;  %1492 = vmax.xlane.f32.xlu1 %v5180_v39  ;;  %v3389_v62 = vpop.eup %3388 }
 0x269   : > { %v1473_v44 = vmul.f32 %v3389_v62, %v5102_v3 }
 0x26c   : > { %1494 = vmax.xlane.f32.xlu0 %v5188_v40  ;;  %1532 = vmax.xlane.f32.xlu1 %v5191_v22 }
 0x270   : > { %1534 = vmax.xlane.f32.xlu0 %v5199_v30  ;;  %1496 = vmax.xlane.f32.xlu1 %v5196_v27 }
 0x274   : > { %1803 = vmax.xlane.f32.xlu0 %v5060_v57  ;;  %1536 = vmax.xlane.f32.xlu1 %v5204_v46 }
 0x278   : > { %1843 = vmax.xlane.f32.xlu0 %v5002_v7  ;;  %1805 = vmax.xlane.f32.xlu1 %v5065_v61 }
 0x27c   : > { %1807 = vmax.xlane.f32.xlu0 %v5070_v25  ;;  %1845 = vmax.xlane.f32.xlu1 %v5011_v16 }
 0x280   : > { %1809 = vmax.xlane.f32.xlu1 %v5076_v6 }
 0x2d8   : > { %v1423_v54 = vpop.xlane.xlu0 %1422 }
 0x2d9   : > { %3390 = vrcp.f32 %v1423_v54 }
 0x2dc   : > { %v1425_v28 = vpop.xlane.xlu1 %1424 }
 0x2dd   : > { %3392 = vrcp.f32 %v1425_v28 }
 0x2e0   : > { %v1427_v14 = vpop.xlane.xlu0 %1426 }
 0x2e1   : > { %3394 = vrcp.f32 %v1427_v14 }
 0x2e3   : > { %v3391_v10 = vpop.eup %3390 }
 0x2e4   : > { %v1429_v8 = vpop.xlane.xlu1 %1428  ;;  %v1431_v0 = vmul.f32 %v3391_v10, %v5136_v31  ;;  %v1479_v31 = vmul.f32 %v1473_v44, %v5063_v59 }
 0x2e5   : > { %v1467_v9 = vpop.xlane.xlu0 %1466  ;;  %3396 = vrcp.f32 %v1429_v8 }
 0x2e6   : > { %3398 = vrcp.f32 %v1467_v9  ;;  %v1438_v33 = vmul.f32 %v1431_v0, %v4998_v29 }
 0x2e7   : > { %v3393_v51 = vpop.eup %3392 }
 0x2e8   : > { %v1469_v54 = vpop.xlane.xlu1 %1468  ;;  %v1433_v28 = vmul.f32 %v3393_v51, %v5141_v60  ;;  %v1482_v37 = vadd.f32 %v1478_v41, %v1438_v33 }
 0x2e9   : > { %v1369_v38 = vpop.xlane.xlu0 %1368  ;;  %3400 = vrcp.f32 %v1469_v54 }
 0x2ea   : > { %v1439_v14 = vmul.f32 %v1433_v28, %v5007_v11  ;;  %3402 = vrcp.f32 %v1369_v38  ;;  %v1486_v29 = vmul.f32 0.5, %v1482_v37 }
 0x2eb   : > { %v3395_v48 = vpop.eup %3394 }
 0x2ec   : > { %v1483_v8 = vadd.f32 %v1479_v31, %v1439_v14  ;;  %v1435_v47 = vmul.f32 %v3395_v48, %v5146_v13 }
 0x2ed   : > { %v1371_v10 = vpop.xlane.xlu0 %1370  ;;  %v1389_v0 = vpop.xlane.xlu1 %1388 }
 0x2ee   : > { %3404 = vrcp.f32 %v1371_v10  ;;  %v1487_v3 = vmul.f32 0.5, %v1483_v8  ;;  %v1440_v33 = vmul.f32 %v1435_v47, %v5014_v21 }
 0x2ef   : > { %v3397_v62 = vpop.eup %3396  ;;  %3406 = vrcp.f32 %v1389_v0 }
 0x2f0   : > { %v3399_v60 = vpop.eup %3398  ;;  %v3225_v9 = vpack.c.bf16 %v1487_v3, %v1486_v29  ;;  %v1437_v41 = vmul.f32 %v3397_v62, %v5150_v42 }
 0x2f1   : > { %v1391_v55 = vpop.xlane.xlu1 %1390  ;;  %v1475_v11 = vmul.f32 %v3399_v60, %v5152_v52 }
 0x2f2   : > { %3408 = vrcp.f32 %v1391_v55  ;;  %3226 = vmatprep.subr.bf16.mxu0 %v3225_v9  ;;  %v1441_v54 = vmul.f32 %v1437_v41, %v5018_v23 }
 0x2f3   : > { %v3401_v59 = vpop.eup %3400  ;;  %3228 = vmatpush3.bf16.xpose.msra.mxu0 %v3225_v9  ;;  %v1480_v38 = vmul.f32 %v1475_v11, %v5068_v63 }
 0x2f4   : > { %v1477_v44 = vmul.f32 %v3401_v59, %v5156_v56  ;;  %v3403_v51 = vpop.eup %3402 }
 0x2f5   : > { %v1484_v28 = vadd.f32 %v1480_v38, %v1440_v33  ;;  %v1373_v37 = vmul.f32 %v3403_v51, %v5158_v58  ;;  %v1493_v60 = vpop.xlane.xlu1 %1492 }
 0x2f6   : > { %v1481_v13 = vmul.f32 %v1477_v44, %v5074_v4 }
 0x2f7   : > { %v1488_v42 = vmul.f32 0.5, %v1484_v28  ;;  %v1376_v23 = vmul.f32 %v1373_v37, %v5090_v24 }
 0x2f8   : > { %v3405_v14 = vpop.eup %3404  ;;  %v1485_v52 = vadd.f32 %v1481_v13, %v1441_v54 }
 0x2f9   : > { %v3407_v31 = vpop.eup %3406  ;;  %v1375_v48 = vmul.f32 %v3405_v14, %v5164_v17 }
 0x2fa   : > { %v1489_v8 = vmul.f32 0.5, %v1485_v52  ;;  %v1393_v63 = vmul.f32 %v3407_v31, %v5166_v1  ;;  %v1491_v1 = vpop.xlane.xlu0 %1490 }
 0x2fb   : > { %v1377_v0 = vmul.f32 %v1375_v48, %v5096_v34  ;;  %v1498_v11 = vsub.f32 %v5171_v2, %v1491_v1 }
 0x2fc   : > { %v3409_v21 = vpop.eup %3408  ;;  %v3229_v10 = vpack.c.bf16 %v1489_v8, %v1488_v42  ;;  %v1396_v4 = vmul.f32 %v1393_v63, %v5080_v35  ;;  %v1499_v35 = vsub.f32 %v5180_v39, %v1493_v60 }
 0x2fd   : > { %v1395_v56 = vmul.f32 %v3409_v21, %v5173_v15  ;;  %v1533_v15 = vpop.xlane.xlu1 %1532  ;;  %v1502_v13 = vmul.f32 1.442695, %v1498_v11 }
 0x2fe   : > { %3230 = vmatprep.subr.bf16.mxu0 %v3229_v10  ;;  %v1398_v58 = vadd.f32 %v1396_v4, %v1376_v23  ;;  %v1531_v9 = vpop.xlane.xlu0 %1530  ;;  %v1504_v44 = vmul.f32 1.442695, %v1499_v35  ;;  %v1539_v51 = vsub.f32 %v5191_v22, %v1533_v15 }
 0x2ff   : > { %v1397_v29 = vmul.f32 %v1395_v56, %v5087_v19  ;;  %3232 = vmatpush3.bf16.xpose.msra.mxu0 %v3229_v10  ;;  %v1538_v28 = vsub.f32 %v5183_v18, %v1531_v9 }
 0x300   : > { %v1400_v3 = vmul.f32 0.5, %v1398_v58  ;;  %3410 = vpow2.f32 %v1504_v44  ;;  %v1544_v14 = vmul.f32 1.442695, %v1539_v51 }
 0x301   : > { %v1399_v62 = vadd.f32 %v1397_v29, %v1377_v0  ;;  %v1497_v24 = vpop.xlane.xlu1 %1496  ;;  %3412 = vpow2.f32 %v1502_v13  ;;  %v1542_v31 = vmul.f32 1.442695, %v1538_v28 }
 0x302   : > { %2805 = vmatprep.mubr.f32.mxu0 %v1400_v3  ;;  %v1495_v47 = vpop.xlane.xlu0 %1494  ;;  %v1501_v52 = vsub.f32 %v5196_v27, %v1497_v24  ;;  %3414 = vpow2.f32 %v1544_v14 }
 0x303   : > { %v1401_v17 = vmul.f32 0.5, %v1399_v62  ;;  %v1500_v37 = vsub.f32 %v5188_v40, %v1495_v47  ;;  %3416 = vpow2.f32 %v1542_v31 }
 0x304   : > { %v1508_v48 = vmul.f32 1.442695, %v1501_v52 }
 0x305   : > { %v1537_v54 = vpop.xlane.xlu1 %1536  ;;  %v1506_v21 = vmul.f32 1.442695, %v1500_v37 }
 0x306   : > { %2806 = vmatmul.mubr.f32.vlgmr.msra.gmra.mrb[20].mxu0 %v1401_v17  ;;  %v1535_v38 = vpop.xlane.xlu0 %1534  ;;  %v1541_v63 = vsub.f32 %v5204_v46, %v1537_v54  ;;  %3418 = vpow2.f32 %v1508_v48 }
 0x307   : > { %v1540_v10 = vsub.f32 %v5199_v30, %v1535_v38  ;;  %3420 = vpow2.f32 %v1506_v21 }
 0x308   : > { %v1548_v23 = vmul.f32 1.442695, %v1541_v63 }
 0x309   : > { %v1806_v8 = vpop.xlane.xlu1 %1805  ;;  %v1546_v29 = vmul.f32 1.442695, %v1540_v10 }
 0x30a   : > { %v1804_v42 = vpop.xlane.xlu0 %1803  ;;  %v1812_v4 = vsub.f32 %v5065_v61, %v1806_v8  ;;  %v5264_v3 = vpop.eup %3410  ;;  %3422 = vpow2.f32 %v1548_v23 }
 0x30b   : > { %v1811_v58 = vsub.f32 %v5060_v57, %v1804_v42  ;;  %v5266_v62 = vpop.eup %3412  ;;  %3424 = vpow2.f32 %v1546_v29 }
 0x30c   : > { %v1817_v17 = vmul.f32 1.442695, %v1812_v4  ;;  %v5272_v47 = vpop.eup %3414 }
 0x30d   : > { %v1846_v0 = vpop.xlane.xlu1 %1845  ;;  %v1815_v60 = vmul.f32 1.442695, %v1811_v58 }
 0x30e   : > { %v1844_v56 = vpop.xlane.xlu0 %1843  ;;  %v1852_v1 = vsub.f32 %v5011_v16, %v1846_v0  ;;  %3426 = vpow2.f32 %v1817_v17 }
 0x30f   : > { %v1851_v9 = vsub.f32 %v5002_v7, %v1844_v56  ;;  %3428 = vpow2.f32 %v1815_v60 }
 0x311   : > { %v1810_v24 = vpop.xlane.xlu1 %1809  ;;  %v1855_v11 = vmul.f32 1.442695, %v1851_v9 }
 0x312   : > { %v1808_v15 = vpop.xlane.xlu0 %1807 }
 0x313   : > { %v1813_v35 = vsub.f32 %v5070_v25, %v1808_v15 }
 0x315   : > { %v1819_v44 = vmul.f32 1.442695, %v1813_v35 }
 0x3d9   : > { %v2807_v55 = vpop.f32.mrb[20].mxu0 }
 0x3da   : > { %v5241_v34 = vmul.f32 0.8, %v2807_v55  ;;  %v1644_v19 = vpop.f32.mrb[21].mxu0  ;;  %v5274_v55 = vpop.eup %3416 }
 0x3db   : > { %v5244_v41 = vmul.f32 0.8, %v1644_v19  ;;  %v1857_v19 = vmul.f32 1.442695, %v1852_v1  ;;  %v5280_v38 = vpop.eup %3418 }
 0x3dc   : > { %v1659_v59 = vsel %vm1655_vm0, %v5241_v34, -inf }
 0x3dd   : > { %1660 = vmax.xlane.f32.xlu1 %v1659_v59  ;;  %v1656_v33 = vsel %vm1655_vm0, %v5244_v41, -inf  ;;  %v1814_v59 = vsub.f32 %v5076_v6, %v1810_v24  ;;  %3430 = vpow2.f32 %v1857_v19 }
 0x3de   : > { %1657 = vmax.xlane.f32.xlu0 %v1656_v33  ;;  %v5282_v33 = vpop.eup %3420  ;;  %3432 = vpow2.f32 %v1855_v11 }
 0x3df   : > { %v1821_v51 = vmul.f32 1.442695, %v1814_v59  ;;  %v5286_v54 = vpop.eup %3422  ;;  %3434 = vpow2.f32 %v1819_v44 }
 0x3e0   : > { %v5288_v13 = vpop.eup %3424 }
 0x3e1   : > { %1849 = vmax.xlane.f32.xlu1 %v5020_v26  ;;  %3436 = vpow2.f32 %v1821_v51  ;;  %v5292_v28 = vpop.eup %3426 }
 0x3e2   : > { %1847 = vmax.xlane.f32.xlu0 %v5016_v20  ;;  %v5294_v14 = vpop.eup %3428 }
 0x3e5   : > { %1779 = vmax.xlane.f32.xlu1 %v5000_v5 }
 0x3e6   : > { %1759 = vmax.xlane.f32.xlu0 %v5047_v45 }
 0x3e7   : > { %v5298_v52 = vpop.eup %3430 }
 0x3e8   : > { %v5300_v31 = vpop.eup %3432 }
 0x3e9   : > { %1781 = vmax.xlane.f32.xlu1 %v5009_v12  ;;  %v5304_v37 = vpop.eup %3434 }
 0x3ea   : > { %1761 = vmax.xlane.f32.xlu0 %v5051_v50 }
 0x3eb   : > { %v5306_v42 = vpop.eup %3436 }
 0x3ed   : > { %1512 = vadd.xlane.f32.xlu1 %v5264_v3 }
 0x3ee   : > { %1510 = vadd.xlane.f32.xlu0 %v5266_v62 }
 0x3f1   : > { %1552 = vadd.xlane.f32.xlu1 %v5272_v47 }
 0x3f2   : > { %1550 = vadd.xlane.f32.xlu0 %v5274_v55 }
 0x3f5   : > { %1516 = vadd.xlane.f32.xlu1 %v5280_v38 }
 0x3f6   : > { %1514 = vadd.xlane.f32.xlu0 %v5282_v33 }
 0x3f9   : > { %1556 = vadd.xlane.f32.xlu1 %v5286_v54 }
 0x3fa   : > { %1554 = vadd.xlane.f32.xlu0 %v5288_v13 }
 0x3fd   : > { %1825 = vadd.xlane.f32.xlu1 %v5292_v28 }
 0x3fe   : > { %1823 = vadd.xlane.f32.xlu0 %v5294_v14 }
 0x401   : > { %1865 = vadd.xlane.f32.xlu1 %v5298_v52 }
 0x402   : > { %1863 = vadd.xlane.f32.xlu0 %v5300_v31 }
 0x405   : > { %1827 = vadd.xlane.f32.xlu1 %v5304_v37 }
 0x406   : > { %1829 = vadd.xlane.f32.xlu0 %v5306_v42 }
 0x46a   : > { %v1661_v8 = vpop.xlane.xlu1 %1660 }
 0x46b   : > { %v1663_v48 = vsub.f32 %v5241_v34, %v1661_v8  ;;  %v1658_v63 = vpop.xlane.xlu0 %1657 }
 0x46c   : > { %v1662_v21 = vsub.f32 %v5244_v41, %v1658_v63 }
 0x46d   : > { %v1666_v23 = vmul.f32 1.442695, %v1663_v48 }
 0x46e   : > { %v1664_v10 = vmul.f32 1.442695, %v1662_v21  ;;  %v1850_v56 = vpop.xlane.xlu1 %1849 }
 0x46f   : > { %v1854_v4 = vsub.f32 %v5020_v26, %v1850_v56  ;;  %v1848_v0 = vpop.xlane.xlu0 %1847 }
 0x470   : > { %3438 = vpow2.f32 %v1664_v10  ;;  %v1853_v29 = vsub.f32 %v5016_v20, %v1848_v0 }
 0x471   : > { %v1861_v58 = vmul.f32 1.442695, %v1854_v4  ;;  %3440 = vpow2.f32 %v1666_v23 }
 0x472   : > { %v1859_v17 = vmul.f32 1.442695, %v1853_v29  ;;  %v1780_v1 = vpop.xlane.xlu1 %1779 }
 0x473   : > { %v1783_v60 = vsub.f32 %v5000_v5, %v1780_v1  ;;  %v1760_v9 = vpop.xlane.xlu0 %1759 }
 0x474   : > { %3442 = vpow2.f32 %v1859_v17  ;;  %v1763_v34 = vsub.f32 %v5047_v45, %v1760_v9 }
 0x475   : > { %3444 = vpow2.f32 %v1861_v58  ;;  %v1785_v41 = vmul.f32 1.442695, %v1783_v60 }
 0x476   : > { %v1765_v15 = vmul.f32 1.442695, %v1763_v34  ;;  %v1782_v24 = vpop.xlane.xlu1 %1781 }
 0x477   : > { %v1784_v35 = vsub.f32 %v5009_v12, %v1782_v24  ;;  %v1762_v19 = vpop.xlane.xlu0 %1761 }
 0x478   : > { %3446 = vpow2.f32 %v1765_v15  ;;  %v1764_v11 = vsub.f32 %v5051_v50, %v1762_v19 }
 0x479   : > { %v1787_v59 = vmul.f32 1.442695, %v1784_v35  ;;  %3448 = vpow2.f32 %v1785_v41 }
 0x47a   : > { %v5318_v44 = vpop.eup %3438  ;;  %v1767_v51 = vmul.f32 1.442695, %v1764_v11  ;;  %v1513_v8 = vpop.xlane.xlu1 %1512 }
 0x47b   : > { %3450 = vpow2.f32 %v1787_v59  ;;  %v1511_v48 = vpop.xlane.xlu0 %1510  ;;  %v1668_v63 = vsel %vm1655_vm0, %v5318_v44, 0.0  ;;  %v5322_v21 = vpop.eup %3440 }
 0x47c   : > { %3452 = vpow2.f32 %v1767_v51  ;;  %1669 = vadd.xlane.f32.xlu0 %v1668_v63  ;;  %v1671_v58 = vsel %vm1655_vm0, %v5322_v21, 0.0 }
 0x47d   : > { %3454 = vrcp.f32 %v1513_v8 }
 0x47e   : > { %v5324_v10 = vpop.eup %3442  ;;  %3456 = vrcp.f32 %v1511_v48  ;;  %v1553_v56 = vpop.xlane.xlu1 %1552 }
 0x47f   : > { %v5326_v23 = vpop.eup %3444  ;;  %3458 = vrcp.f32 %v1553_v56  ;;  %1867 = vadd.xlane.f32.xlu1 %v5324_v10  ;;  %v1551_v4 = vpop.xlane.xlu0 %1550 }
 0x480   : > { %3460 = vrcp.f32 %v1551_v4  ;;  %1869 = vadd.xlane.f32.xlu0 %v5326_v23 }
 0x482   : > { %v5330_v0 = vpop.eup %3446  ;;  %v1517_v29 = vpop.xlane.xlu1 %1516 }
 0x483   : > { %3462 = vrcp.f32 %v1517_v29  ;;  %1672 = vadd.xlane.f32.xlu1 %v1671_v58  ;;  %v1515_v17 = vpop.xlane.xlu0 %1514  ;;  %v5334_v1 = vpop.eup %3448 }
 0x484   : > { %3464 = vrcp.f32 %v1515_v17  ;;  %1769 = vadd.xlane.f32.xlu0 %v5330_v0 }
 0x485   : > { %v5337_v60 = vpop.eup %3450 }
 0x486   : > { %v5339_v9 = vpop.eup %3452  ;;  %v1557_v34 = vpop.xlane.xlu1 %1556 }
 0x487   : > { %v3455_v41 = vpop.eup %3454  ;;  %3466 = vrcp.f32 %v1557_v34  ;;  %1789 = vadd.xlane.f32.xlu1 %v5334_v1  ;;  %v1555_v15 = vpop.xlane.xlu0 %1554 }
 0x488   : > { %v3457_v24 = vpop.eup %3456  ;;  %3468 = vrcp.f32 %v1555_v15  ;;  %1771 = vadd.xlane.f32.xlu0 %v5339_v9  ;;  %v1521_v35 = vmul.f32 %v3455_v41, %v5264_v3 }
 0x489   : > { %v3459_v19 = vpop.eup %3458  ;;  %v1519_v11 = vmul.f32 %v3457_v24, %v5266_v62 }
 0x48a   : > { %v3461_v59 = vpop.eup %3460  ;;  %v1826_v51 = vpop.xlane.xlu1 %1825  ;;  %v1561_v8 = vmul.f32 %v3459_v19, %v5272_v47  ;;  %v1527_v56 = vmul.f32 %v1521_v35, %v5191_v22 }
 0x48b   : > { %3470 = vrcp.f32 %v1826_v51  ;;  %1791 = vadd.xlane.f32.xlu1 %v5337_v60  ;;  %v1824_v48 = vpop.xlane.xlu0 %1823  ;;  %v1559_v63 = vmul.f32 %v3461_v59, %v5274_v55  ;;  %v1526_v62 = vmul.f32 %v1519_v11, %v5183_v18 }
 0x48c   : > { %3472 = vrcp.f32 %v1824_v48  ;;  %1891 = vmax.xlane.f32.xlu0 %v5117_v43  ;;  %v1567_v3 = vmul.f32 %v1561_v8, %v5180_v39  ;;  %v5700_v48 = vld [vmem:[#allocation9_spill] sm:$0xff] }
 0x48d   : > { %v3463_v4 = vpop.eup %3462  ;;  %v1566_v29 = vmul.f32 %v1559_v63, %v5171_v2 }
 0x48e   : > { %v3465_v58 = vpop.eup %3464  ;;  %v1866_v47 = vpop.xlane.xlu1 %1865  ;;  %v1571_v17 = vadd.f32 %v1567_v3, %v1527_v56  ;;  %v1525_v22 = vmul.f32 %v3463_v4, %v5280_v38  ;;  %v5701_v56 = vld [vmem:[#allocation7_spill] sm:$0xff] }
 0x48f   : > { %3474 = vrcp.f32 %v1866_v47  ;;  %1893 = vmax.xlane.f32.xlu1 %v5122_v49  ;;  %v1864_v34 = vpop.xlane.xlu0 %1863  ;;  %v1570_v55 = vadd.f32 %v1566_v29, %v1526_v62  ;;  %v1523_v18 = vmul.f32 %v3465_v58, %v5282_v33  ;;  %v5702_v29 = vld [vmem:[#allocation8_spill] sm:$0xff] }
 0x490   : > { %3476 = vrcp.f32 %v1864_v34  ;;  %1931 = vmax.xlane.f32.xlu0 %v5031_v32  ;;  %v1575_v41 = vmul.f32 0.5, %v1571_v17  ;;  %v1529_v11 = vmul.f32 %v1525_v22, %v5204_v46 }
 0x491   : > { %v3467_v39 = vpop.eup %3466  ;;  %v1574_v15 = vmul.f32 0.5, %v1570_v55  ;;  %v1528_v38 = vmul.f32 %v1523_v18, %v5199_v30 }
 0x492   : > { %v3469_v24 = vpop.eup %3468  ;;  %v1565_v2 = vmul.f32 %v3467_v39, %v5286_v54  ;;  %v1828_v39 = vpop.xlane.xlu1 %1827 }
 0x493   : > { %1933 = vmax.xlane.f32.xlu1 %v5035_v36  ;;  %v3233_v35 = vpack.c.bf16 %v1575_v41, %v1574_v15  ;;  %v1563_v19 = vmul.f32 %v3469_v24, %v5288_v13  ;;  %v1830_v15 = vpop.xlane.xlu0 %1829  ;;  %3478 = vrcp.f32 %v1828_v39 }
 0x494   : > { %1895 = vmax.xlane.f32.xlu0 %v5127_v53  ;;  %v1569_v59 = vmul.f32 %v1565_v2, %v5196_v27  ;;  %3480 = vrcp.f32 %v1830_v15 }
 0x495   : > { %v3471_v51 = vpop.eup %3470  ;;  %3234 = vmatprep.subr.bf16.mxu0 %v3233_v35  ;;  %v1568_v33 = vmul.f32 %v1563_v19, %v5188_v40 }
 0x496   : > { %v3473_v8 = vpop.eup %3472  ;;  %3236 = vmatpush3.bf16.msra.mxu0 %v3233_v35  ;;  %v1573_v54 = vadd.f32 %v1569_v59, %v1529_v11  ;;  %v1834_v3 = vmul.f32 %v3471_v51, %v5292_v28 }
 0x497   : > { %1897 = vmax.xlane.f32.xlu1 %v5700_v48  ;;  %v1572_v63 = vadd.f32 %v1568_v33, %v1528_v38  ;;  %v1832_v27 = vmul.f32 %v3473_v8, %v5294_v14 }
 0x498   : > { %1935 = vmax.xlane.f32.xlu0 %v5701_v56  ;;  %v1577_v13 = vmul.f32 0.5, %v1573_v54  ;;  %v1840_v47 = vmul.f32 %v1834_v3, %v5011_v16 }
 0x499   : > { %v3475_v46 = vpop.eup %3474  ;;  %v1576_v4 = vmul.f32 0.5, %v1572_v63  ;;  %v1839_v34 = vmul.f32 %v1832_v27, %v5002_v7 }
 0x49a   : > { %v3477_v62 = vpop.eup %3476  ;;  %v1874_v30 = vmul.f32 %v3475_v46, %v5298_v52 }
 0x49b   : > { %1937 = vmax.xlane.f32.xlu1 %v5702_v29  ;;  %v3237_v40 = vpack.c.bf16 %v1577_v13, %v1576_v4  ;;  %v1872_v58 = vmul.f32 %v3477_v62, %v5300_v31 }
 0x49c   : > { %v1880_v17 = vmul.f32 %v1874_v30, %v5065_v61 }
 0x49d   : > { %3238 = vmatprep.subr.bf16.mxu0 %v3237_v40  ;;  %v1879_v28 = vmul.f32 %v1872_v58, %v5060_v57  ;;  %v3479_v18 = vpop.eup %3478 }
 0x49e   : > { %3240 = vmatpush3.bf16.msra.mxu0 %v3237_v40  ;;  %v1884_v55 = vadd.f32 %v1880_v17, %v1840_v47  ;;  %v3481_v24 = vpop.eup %3480  ;;  %v1836_v59 = vmul.f32 %v3479_v18, %v5304_v37 }
 0x49f   : > { %v1883_v14 = vadd.f32 %v1879_v28, %v1839_v34  ;;  %v1838_v38 = vmul.f32 %v3481_v24, %v5306_v42 }
 0x4a0   : > { %v1888_v41 = vmul.f32 0.5, %v1884_v55  ;;  %v1841_v13 = vmul.f32 %v1836_v59, %v5016_v20 }
 0x4a1   : > { %v1887_v22 = vmul.f32 0.5, %v1883_v14  ;;  %v1842_v46 = vmul.f32 %v1838_v38, %v5020_v26 }
 0x4a3   : > { %v3241_v52 = vpack.c.bf16 %v1888_v41, %v1887_v22 }
 0x4a5   : > { %3242 = vmatprep.subr.bf16.mxu0 %v3241_v52 }
 0x509   : > { %v1670_v31 = vpop.xlane.xlu0 %1669 }
 0x50a   : > { %3482 = vrcp.f32 %v1670_v31 }
 0x50c   : > { %v1868_v16 = vpop.xlane.xlu1 %1867 }
 0x50d   : > { %3484 = vrcp.f32 %v1868_v16  ;;  %v1870_v61 = vpop.xlane.xlu0 %1869 }
 0x50e   : > { %3486 = vrcp.f32 %v1870_v61 }
 0x510   : > { %v1673_v7 = vpop.xlane.xlu1 %1672 }
 0x511   : > { %3488 = vrcp.f32 %v1673_v7  ;;  %v1770_v57 = vpop.xlane.xlu0 %1769 }
 0x512   : > { %3490 = vrcp.f32 %v1770_v57 }
 0x514   : > { %v3483_v2 = vpop.eup %3482  ;;  %v1790_v35 = vpop.xlane.xlu1 %1789 }
 0x515   : > { %3492 = vrcp.f32 %v1790_v35  ;;  %v1772_v19 = vpop.xlane.xlu0 %1771  ;;  %v1675_v11 = vmul.f32 %v3483_v2, %v5318_v44 }
 0x516   : > { %3494 = vrcp.f32 %v1772_v19 }
 0x517   : > { %v3485_v51 = vpop.eup %3484  ;;  %2816 = vmatprep.mubr.msk.f32.mxu0 %vm1655_vm0, %v1675_v11 }
 0x518   : > { %v3487_v33 = vpop.eup %3486  ;;  %v1792_v8 = vpop.xlane.xlu1 %1791  ;;  %v1876_v54 = vmul.f32 %v3485_v51, %v5324_v10 }
 0x519   : > { %3496 = vrcp.f32 %v1792_v8  ;;  %v1878_v63 = vmul.f32 %v3487_v33, %v5326_v23  ;;  %v1892_v41 = vpop.xlane.xlu0 %1891 }
 0x51a   : > { %v1881_v3 = vmul.f32 %v1876_v54, %v5070_v25  ;;  %v1899_v39 = vsub.f32 %v5117_v43, %v1892_v41 }
 0x51b   : > { %v3489_v44 = vpop.eup %3488  ;;  %v1882_v37 = vmul.f32 %v1878_v63, %v5076_v6 }
 0x51c   : > { %v3491_v4 = vpop.eup %3490  ;;  %v1677_v27 = vmul.f32 %v3489_v44, %v5322_v21  ;;  %v1885_v42 = vadd.f32 %v1881_v3, %v1841_v13  ;;  %v1903_v16 = vmul.f32 1.442695, %v1899_v39 }
 0x51d   : > { %v1886_v62 = vadd.f32 %v1882_v37, %v1842_v46  ;;  %v1774_v30 = vmul.f32 %v3491_v4, %v5330_v0 }
 0x51e   : > { %2817 = vmatmul.mubr.msk.f32.vlgmr.msra.gmra.mrb[22].mxu0 %vm1655_vm0, %v1677_v27  ;;  %v1889_v10 = vmul.f32 0.5, %v1885_v42 }
 0x51f   : > { %v3493_v23 = vpop.eup %3492  ;;  %3244 = vmatpush3.bf16.xpose.msra.mxu0 %v3241_v52  ;;  %v1890_v20 = vmul.f32 0.5, %v1886_v62  ;;  %v1777_v6 = vmul.f32 %v1774_v30, %v5000_v5  ;;  %v1932_v52 = vpop.xlane.xlu0 %1931 }
 0x520   : > { %v3495_v40 = vpop.eup %3494  ;;  %v1794_v25 = vmul.f32 %v3493_v23, %v5334_v1  ;;  %v1939_v61 = vsub.f32 %v5031_v32, %v1932_v52 }
 0x521   : > { %v3245_v58 = vpack.c.bf16 %v1890_v20, %v1889_v10  ;;  %v1776_v26 = vmul.f32 %v3495_v40, %v5339_v9  ;;  %v1894_v9 = vpop.xlane.xlu1 %1893 }
 0x522   : > { %v1797_v21 = vmul.f32 %v1794_v25, %v5047_v45  ;;  %v1943_v18 = vmul.f32 1.442695, %v1939_v61 }
 0x523   : > { %v3497_v47 = vpop.eup %3496  ;;  %3246 = vmatprep.subr.bf16.mxu0 %v3245_v58  ;;  %v1778_v0 = vmul.f32 %v1776_v26, %v5009_v12  ;;  %v1896_v31 = vpop.xlane.xlu0 %1895 }
 0x524   : > { %v1796_v17 = vmul.f32 %v3497_v47, %v5337_v60  ;;  %v1799_v34 = vadd.f32 %v1797_v21, %v1777_v6  ;;  %v1900_v60 = vsub.f32 %v5122_v49, %v1894_v9  ;;  %v1901_v24 = vsub.f32 %v5127_v53, %v1896_v31 }
 0x525   : > { %v1934_v22 = vpop.xlane.xlu1 %1933 }
 0x526   : > { %v1801_v28 = vmul.f32 0.5, %v1799_v34  ;;  %v1798_v55 = vmul.f32 %v1796_v17, %v5051_v50  ;;  %v1905_v15 = vmul.f32 1.442695, %v1900_v60  ;;  %v1940_v50 = vsub.f32 %v5035_v36, %v1934_v22 }
 0x527   : > { %3248 = vmatpush3.bf16.xpose.msra.mxu0 %v3245_v58  ;;  %v1936_v35 = vpop.xlane.xlu0 %1935  ;;  %v1907_v33 = vmul.f32 1.442695, %v1901_v24 }
 0x528   : > { %2827 = vmatprep.mubr.f32.mxu0 %v1801_v28  ;;  %v1800_v1 = vadd.f32 %v1798_v55, %v1778_v0  ;;  %3498 = vpow2.f32 %v1905_v15  ;;  %v1945_v7 = vmul.f32 1.442695, %v1940_v50  ;;  %v1941_v8 = vsub.f32 %v5701_v56, %v1936_v35 }
 0x529   : > { %v1898_v12 = vpop.xlane.xlu1 %1897  ;;  %3500 = vpow2.f32 %v1903_v16 }
 0x52a   : > { %v1802_v14 = vmul.f32 0.5, %v1800_v1  ;;  %v1902_v57 = vsub.f32 %v5700_v48, %v1898_v12  ;;  %3502 = vpow2.f32 %v1945_v7  ;;  %v1947_v44 = vmul.f32 1.442695, %v1941_v8 }
 0x52b   : > { %3504 = vpow2.f32 %v1943_v18 }
 0x52c   : > { %v1909_v11 = vmul.f32 1.442695, %v1902_v57 }
 0x52d   : > { %v1938_v2 = vpop.xlane.xlu1 %1937 }
 0x52e   : > { %2828 = vmatmul.mubr.f32.vlgmr.msra.gmra.mrb[24].mxu0 %v1802_v14  ;;  %v1942_v59 = vsub.f32 %v5702_v29, %v1938_v2  ;;  %3506 = vpow2.f32 %v1909_v11 }
 0x52f   : > { %3508 = vpow2.f32 %v1907_v33 }
 0x530   : > { %v1949_v3 = vmul.f32 1.442695, %v1942_v59 }
 0x532   : > { %v3499_v46 = vpop.eup %3498  ;;  %3510 = vpow2.f32 %v1949_v3 }
 0x533   : > { %v3501_v37 = vpop.eup %3500  ;;  %3512 = vpow2.f32 %v1947_v44 }
 0x534   : > { %v3503_v4 = vpop.eup %3502 }
 0x535   : > { %v3505_v27 = vpop.eup %3504 }
 0x538   : > { %v3507_v42 = vpop.eup %3506 }
 0x539   : > { %v3509_v62 = vpop.eup %3508 }
 0x53c   : > { %v3511_v10 = vpop.eup %3510 }
 0x53d   : > { %v3513_v30 = vpop.eup %3512 }
 0x5f1   : > { %v5396_v5 = vpop.f32.mrb[22].mxu0 }
 0x5f2   : > { %v5398_v45 = vpop.f32.mrb[23].mxu0 }
 0x601   : > { %v2829_v19 = vpop.f32.mrb[24].mxu0 }
 0x602   : > { %v2055_v51 = vmul.f32 0.8, %v2829_v19  ;;  %v2045_v38 = vpop.f32.mrb[25].mxu0 }
 0x603   : > { %v2054_v54 = vmul.f32 0.8, %v2045_v38 }
 0x604   : > { %v2059_v63 = vsel %vm1655_vm0, %v2055_v51, -inf }
 0x605   : > { %2060 = vmax.xlane.f32.xlu1 %v2059_v63  ;;  %v2056_v13 = vsel %vm1655_vm0, %v2054_v54, -inf }
 0x606   : > { %2057 = vmax.xlane.f32.xlu0 %v2056_v13 }
 0x609   : > { %1913 = vadd.xlane.f32.xlu1 %v3499_v46 }
 0x60a   : > { %1911 = vadd.xlane.f32.xlu0 %v3501_v37 }
 0x60d   : > { %1953 = vadd.xlane.f32.xlu1 %v3503_v4 }
 0x60e   : > { %1951 = vadd.xlane.f32.xlu0 %v3505_v27 }
 0x611   : > { %1917 = vadd.xlane.f32.xlu1 %v3507_v42 }
 0x612   : > { %1915 = vadd.xlane.f32.xlu0 %v3509_v62 }
 0x615   : > { %1957 = vadd.xlane.f32.xlu1 %v3511_v10 }
 0x616   : > { %1955 = vadd.xlane.f32.xlu0 %v3513_v30 }
 0x692   : > { %v2061_v23 = vpop.xlane.xlu1 %2060 }
 0x693   : > { %v2063_v20 = vsub.f32 %v2055_v51, %v2061_v23  ;;  %v2058_v40 = vpop.xlane.xlu0 %2057  ;;  %v2165_v23 = vld [vmem:[%s5685_s6 + $0x30] sm:$0xff] }
 0x694   : > { %v2062_v25 = vsub.f32 %v2054_v54, %v2058_v40  ;;  %v2170_v40 = vld [vmem:[%s5685_s6 + $0x58] sm:$0xff] }
 0x695   : > { %v2066_v58 = vmul.f32 1.442695, %v2063_v20  ;;  %v2168_v20 = vld [vmem:[%s5685_s6 + $0x48] sm:$0xff] }
 0x696   : > { %v2064_v26 = vmul.f32 1.442695, %v2062_v25  ;;  %v1914_v6 = vpop.xlane.xlu1 %1913 }
 0x697   : > { %3514 = vpow2.f32 %v2066_v58  ;;  %v1912_v21 = vpop.xlane.xlu0 %1911  ;;  %v3265_v58 = vpack.c.bf16 %v2170_v40, %v2168_v20  ;;  %v2208_v20 = vld [vmem:[%s5685_s6 + $0x188] sm:$0xff]  ;;  %v2210_v40 = vld [vmem:[%s5685_s6 + $0x198] sm:$0xff] }
 0x698   : > { %3516 = vpow2.f32 %v2064_v26  ;;  %v2167_v26 = vld [vmem:[%s5685_s6 + $0x40] sm:$0xff] }
 0x699   : > { %3518 = vrcp.f32 %v1914_v6  ;;  %v2169_v6 = vld [vmem:[%s5685_s6 + $0x50] sm:$0xff] }
 0x69a   : > { %3520 = vrcp.f32 %v1912_v21  ;;  %v1954_v47 = vpop.xlane.xlu1 %1953  ;;  %v2172_v21 = vld [vmem:[%s5685_s6 + $0x68] sm:$0xff] }
 0x69b   : > { %3522 = vrcp.f32 %v1954_v47  ;;  %v1952_v17 = vpop.xlane.xlu0 %1951  ;;  %v2174_v47 = vld [vmem:[%s5685_s6 + $0x78] sm:$0xff] }
 0x69c   : > { %3524 = vrcp.f32 %v1952_v17  ;;  %v3267_v17 = vpack.c.bf16 %v2169_v6, %v2167_v26  ;;  %v2207_v26 = vld [vmem:[%s5685_s6 + $0x180] sm:$0xff]  ;;  %v2209_v6 = vld [vmem:[%s5685_s6 + $0x190] sm:$0xff] }
 0x69e   : > { %v1918_v34 = vpop.xlane.xlu1 %1917 }
 0x69f   : > { %3526 = vrcp.f32 %v1918_v34  ;;  %v1916_v28 = vpop.xlane.xlu0 %1915  ;;  %v3269_v34 = vpack.c.bf16 %v2174_v47, %v2172_v21  ;;  %v2212_v21 = vld [vmem:[%s5685_s6 + $0x1a8] sm:$0xff]  ;;  %v2214_v47 = vld [vmem:[%s5685_s6 + $0x1b8] sm:$0xff] }
 0x6a0   : > { %3528 = vrcp.f32 %v1916_v28  ;;  %v2171_v28 = vld [vmem:[%s5685_s6 + $0x60] sm:$0xff] }
 0x6a1   : > { %v5410_v0 = vpop.eup %3514 }
 0x6a2   : > { %v5412_v55 = vpop.eup %3516  ;;  %v1958_v1 = vpop.xlane.xlu1 %1957  ;;  %v2071_v14 = vsel %vm1655_vm0, %v5410_v0, 0.0 }
 0x6a3   : > { %v3519_v9 = vpop.eup %3518  ;;  %3530 = vrcp.f32 %v1958_v1  ;;  %2072 = vadd.xlane.f32.xlu1 %v2071_v14  ;;  %v1956_v41 = vpop.xlane.xlu0 %1955  ;;  %v2068_v22 = vsel %vm1655_vm0, %v5412_v55, 0.0  ;;  %v2173_v1 = vld [vmem:[%s5685_s6 + $0x70] sm:$0xff]  ;;  %v2176_v14 = vld [vmem:[%s5685_s6 + $0x88] sm:$0xff] }
 0x6a4   : > { %v3521_v52 = vpop.eup %3520  ;;  %3532 = vrcp.f32 %v1956_v41  ;;  %2069 = vadd.xlane.f32.xlu0 %v2068_v22  ;;  %v1922_v60 = vmul.f32 %v3519_v9, %v3499_v46  ;;  %v2178_v9 = vld [vmem:[%s5685_s6 + $0x98] sm:$0xff]  ;;  %v3271_v41 = vpack.c.bf16 %v2173_v1, %v2171_v28  ;;  %v2211_v28 = vld [vmem:[%s5685_s6 + $0x1a0] sm:$0xff]  ;;  %v2213_v1 = vld [vmem:[%s5685_s6 + $0x1b0] sm:$0xff] }
 0x6a5   : > { %v3523_v39 = vpop.eup %3522  ;;  %v1920_v12 = vmul.f32 %v3521_v52, %v3501_v37  ;;  %v3273_v22 = vpack.c.bf16 %v2178_v9, %v2176_v14  ;;  %v2175_v52 = vld [vmem:[%s5685_s6 + $0x80] sm:$0xff]  ;;  %v2216_v14 = vld [vmem:[%s5685_s6 + $0x1c8] sm:$0xff]  ;;  %v2218_v9 = vld [vmem:[%s5685_s6 + $0x1d8] sm:$0xff] }
 0x6a6   : > { %v3525_v15 = vpop.eup %3524  ;;  %v1962_v50 = vmul.f32 %v3523_v39, %v3503_v4  ;;  %v1928_v16 = vmul.f32 %v1922_v60, %v5035_v36  ;;  %v2160_v4 = vld [vmem:[%s5685_s6 + $0x8] sm:$0xff]  ;;  %v2177_v60 = vld [vmem:[%s5685_s6 + $0x90] sm:$0xff] }
 0x6a7   : > { %v1960_v31 = vmul.f32 %v3525_v15, %v3505_v27  ;;  %v1927_v57 = vmul.f32 %v1920_v12, %v5031_v32  ;;  %v2164_v27 = vld [vmem:[%s5685_s6 + $0x28] sm:$0xff]  ;;  %v2182_v12 = vld [vmem:[%s5685_s6 + $0xb8] sm:$0xff]  ;;  %v3275_v15 = vpack.c.bf16 %v2177_v60, %v2175_v52  ;;  %v2215_v52 = vld [vmem:[%s5685_s6 + $0x1c0] sm:$0xff] }
 0x6a8   : > { %v1968_v61 = vmul.f32 %v1962_v50, %v5122_v49  ;;  %v2180_v39 = vld [vmem:[%s5685_s6 + $0xa8] sm:$0xff]  ;;  %v2217_v60 = vld [vmem:[%s5685_s6 + $0x1d0] sm:$0xff] }
 0x6a9   : > { %v3527_v7 = vpop.eup %3526  ;;  %v1967_v18 = vmul.f32 %v1960_v31, %v5117_v43  ;;  %v3277_v50 = vpack.c.bf16 %v2182_v12, %v2180_v39  ;;  %v2179_v31 = vld [vmem:[%s5685_s6 + $0xa0] sm:$0xff]  ;;  %v2220_v39 = vld [vmem:[%s5685_s6 + $0x1e8] sm:$0xff]  ;;  %v2222_v12 = vld [vmem:[%s5685_s6 + $0x1f8] sm:$0xff] }
 0x6aa   : > { %v3529_v24 = vpop.eup %3528  ;;  %v1972_v2 = vadd.f32 %v1968_v61, %v1928_v16  ;;  %v1926_v11 = vmul.f32 %v3527_v7, %v3507_v42  ;;  %v2166_v42 = vld [vmem:[%s5685_s6 + $0x38] sm:$0xff]  ;;  %v2181_v16 = vld [vmem:[%s5685_s6 + $0xb0] sm:$0xff]  ;;  %v2184_v61 = vld [vmem:[%s5685_s6 + $0xc8] sm:$0xff] }
 0x6ab   : > { %v1971_v35 = vadd.f32 %v1967_v18, %v1927_v57  ;;  %v1924_v38 = vmul.f32 %v3529_v24, %v3509_v62  ;;  %v2186_v7 = vld [vmem:[%s5685_s6 + $0xd8] sm:$0xff]  ;;  %v3279_v57 = vpack.c.bf16 %v2181_v16, %v2179_v31  ;;  %v2183_v24 = vld [vmem:[%s5685_s6 + $0xc0] sm:$0xff] }
 0x6ac   : > { %v1976_v19 = vmul.f32 0.5, %v1972_v2  ;;  %v1930_v36 = vmul.f32 %v1926_v11, %v5702_v29  ;;  %v2161_v29 = vld [vmem:[%s5685_s6 + $0x10] sm:$0xff]  ;;  %v3281_v18 = vpack.c.bf16 %v2186_v7, %v2184_v61 }
 0x6ad   : > { %v3531_v59 = vpop.eup %3530  ;;  %v1975_v51 = vmul.f32 0.5, %v1971_v35  ;;  %v1929_v32 = vmul.f32 %v1924_v38, %v5701_v56  ;;  %v2185_v2 = vld [vmem:[%s5685_s6 + $0xd0] sm:$0xff]  ;;  %v2188_v35 = vld [vmem:[%s5685_s6 + $0xe8] sm:$0xff] }
 0x6ae   : > { %v3533_v33 = vpop.eup %3532  ;;  %v1966_v8 = vmul.f32 %v3531_v59, %v3511_v10  ;;  %v3261_v10 = vpack.c.bf16 %v2166_v42, %v2164_v27  ;;  %v3283_v11 = vpack.c.bf16 %v2185_v2, %v2183_v24  ;;  %v2189_v38 = vld [vmem:[%s5685_s6 + $0xf0] sm:$0xff]  ;;  %v2204_v27 = vld [vmem:[%s5685_s6 + $0x168] sm:$0xff]  ;;  %v2206_v42 = vld [vmem:[%s5685_s6 + $0x178] sm:$0xff] }
 0x6af   : > { %v3249_v54 = vpack.c.bf16 %v1976_v19, %v1975_v51  ;;  %v1964_v63 = vmul.f32 %v3533_v33, %v3513_v30  ;;  %v2163_v30 = vld [vmem:[%s5685_s6 + $0x20] sm:$0xff]  ;;  %v2190_v19 = vld [vmem:[%s5685_s6 + $0xf8] sm:$0xff]  ;;  %v2192_v33 = vld [vmem:[%s5685_s6 + $0x108] sm:$0xff] }
 0x6b0   : > { %v1970_v49 = vmul.f32 %v1966_v8, %v5700_v48  ;;  %v2162_v48 = vld [vmem:[%s5685_s6 + $0x18] sm:$0xff]  ;;  %v3263_v25 = vpack.c.bf16 %v2165_v23, %v2163_v30  ;;  %v3285_v59 = vpack.c.bf16 %v2190_v19, %v2188_v35  ;;  %v2187_v51 = vld [vmem:[%s5685_s6 + $0xe0] sm:$0xff]  ;;  %v2205_v23 = vld [vmem:[%s5685_s6 + $0x170] sm:$0xff] }
 0x6b1   : > { %3250 = vmatprep.subr.bf16.mxu0 %v3249_v54  ;;  %v1969_v43 = vmul.f32 %v1964_v63, %v5127_v53  ;;  %v2159_v53 = vld [vmem:[%s5685_s6] sm:$0xff]  ;;  %v3257_v56 = vpack.c.bf16 %v2162_v48, %v2160_v4  ;;  %v2194_v8 = vld [vmem:[%s5685_s6 + $0x118] sm:$0xff]  ;;  %v2221_v2 = vld [vmem:[%s5685_s6 + $0x1f0] sm:$0xff] }
 0x6b2   : > { %3252 = vmatpush3.bf16.msra.mxu0 %v3249_v54  ;;  %v1974_v13 = vadd.f32 %v1970_v49, %v1930_v36  ;;  %v3259_v62 = vpack.c.bf16 %v2161_v29, %v2159_v53  ;;  %v3287_v54 = vpack.c.bf16 %v2189_v38, %v2187_v51  ;;  %v3289_v63 = vpack.c.bf16 %v2194_v8, %v2192_v33  ;;  %v2191_v36 = vld [vmem:[%s5685_s6 + $0x100] sm:$0xff]  ;;  %v2193_v49 = vld [vmem:[%s5685_s6 + $0x110] sm:$0xff]  ;;  %v2202_v4 = vld [vmem:[%s5685_s6 + $0x158] sm:$0xff] }
 0x6b3   : > { %v1973_v3 = vadd.f32 %v1969_v43, %v1929_v32  ;;  %3258 = vmatprep.subr.bf16.mxu1 %v3257_v56  ;;  %v2196_v32 = vld [vmem:[%s5685_s6 + $0x128] sm:$0xff]  ;;  %v2198_v43 = vld [vmem:[%s5685_s6 + $0x138] sm:$0xff]  ;;  %v2199_v56 = vld [vmem:[%s5685_s6 + $0x140] sm:$0xff] }
 0x6b4   : > { %v1978_v44 = vmul.f32 0.5, %v1974_v13  ;;  %3260 = vmatpush1.bf16.msra.mxu1 %v3259_v62  ;;  %v3291_v13 = vpack.c.bf16 %v2193_v49, %v2191_v36  ;;  %v2201_v29 = vld [vmem:[%s5685_s6 + $0x150] sm:$0xff]  ;;  %v2203_v30 = vld [vmem:[%s5685_s6 + $0x160] sm:$0xff]  ;;  %v5704_v51 = vld [vmem:[#allocation6_spill] sm:$0xff] }
 0x6b5   : > { %v1977_v46 = vmul.f32 0.5, %v1973_v3  ;;  %3262 = vmatprep.subr.bf16.mxu1 %v3261_v10  ;;  %v3293_v3 = vpack.c.bf16 %v2198_v43, %v2196_v32  ;;  %v3299_v62 = vpack.c.bf16 %v2201_v29, %v2199_v56  ;;  %v3301_v10 = vpack.c.bf16 %v2206_v42, %v2204_v27  ;;  %v2219_v24 = vld [vmem:[%s5685_s6 + $0x1e0] sm:$0xff] }
 0x6b6   : > { %v3319_v35 = vpack.c.bf16 %v2221_v2, %v2219_v24 }
 0x6b7   : > { %v3253_v37 = vpack.c.bf16 %v1978_v44, %v1977_v46  ;;  %v2195_v44 = vld [vmem:[%s5685_s6 + $0x120] sm:$0xff]  ;;  %v2197_v46 = vld [vmem:[%s5685_s6 + $0x130] sm:$0xff] }
 0x6b8   : > { %3264 = vmatpush1.bf16.msra.mxu1 %v3263_v25  ;;  %v3295_v48 = vpack.c.bf16 %v2197_v46, %v2195_v44  ;;  %v3303_v25 = vpack.c.bf16 %v2205_v23, %v2203_v30 }
 0x6b9   : > { %3254 = vmatprep.subr.bf16.mxu0 %v3253_v37  ;;  %3266 = vmatprep.subr.bf16.mxu1 %v3265_v58  ;;  %v3305_v58 = vpack.c.bf16 %v2210_v40, %v2208_v20 }
 0x6ba   : > { %3256 = vmatpush3.bf16.msra.mxu0 %v3253_v37  ;;  %v2200_v37 = vld [vmem:[%s5685_s6 + $0x148] sm:$0xff] }
 0x6bb   : > { %v3297_v53 = vpack.c.bf16 %v2202_v4, %v2200_v37 }
 0x6bc   : > { %3268 = vmatpush1.bf16.msra.mxu1 %v3267_v17  ;;  %v3307_v17 = vpack.c.bf16 %v2209_v6, %v2207_v26 }
 0x6bd   : > { %3270 = vmatprep.subr.bf16.mxu1 %v3269_v34  ;;  %v3309_v34 = vpack.c.bf16 %v2214_v47, %v2212_v21 }
 0x6c0   : > { %3272 = vmatpush1.bf16.msra.mxu1 %v3271_v41  ;;  %v3311_v41 = vpack.c.bf16 %v2213_v1, %v2211_v28 }
 0x6c1   : > { %3274 = vmatprep.subr.bf16.mxu1 %v3273_v22  ;;  %v3313_v22 = vpack.c.bf16 %v2218_v9, %v2216_v14 }
 0x6c4   : > { %3276 = vmatpush1.bf16.msra.mxu1 %v3275_v15  ;;  %v3315_v15 = vpack.c.bf16 %v2217_v60, %v2215_v52 }
 0x6c5   : > { %3278 = vmatprep.subr.bf16.mxu1 %v3277_v50  ;;  %v3317_v50 = vpack.c.bf16 %v2222_v12, %v2220_v39 }
 0x6c8   : > { %3280 = vmatpush1.bf16.msra.mxu1 %v3279_v57 }
 0x6c9   : > { %3282 = vmatprep.subr.bf16.mxu1 %v3281_v18 }
 0x6cc   : > { %3284 = vmatpush1.bf16.msra.mxu1 %v3283_v11 }
 0x6cd   : > { %3286 = vmatprep.subr.bf16.mxu1 %v3285_v59 }
 0x6d0   : > { %3288 = vmatpush1.bf16.msra.mxu1 %v3287_v54 }
 0x6d1   : > { %3290 = vmatprep.subr.bf16.mxu1 %v3289_v63 }
 0x6d4   : > { %3292 = vmatpush1.bf16.msra.mxu1 %v3291_v13 }
 0x6d5   : > { %3294 = vmatprep.subr.bf16.mxu1 %v3293_v3 }
 0x6d8   : > { %3296 = vmatpush1.bf16.msra.mxu1 %v3295_v48 }
 0x6d9   : > { %3298 = vmatprep.subr.bf16.mxu1 %v3297_v53 }
 0x6dc   : > { %3300 = vmatpush1.bf16.msra.mxu1 %v3299_v62 }
 0x6dd   : > { %3302 = vmatprep.subr.bf16.mxu1 %v3301_v10 }
 0x6e0   : > { %3304 = vmatpush1.bf16.msra.mxu1 %v3303_v25 }
 0x6e1   : > { %3306 = vmatprep.subr.bf16.mxu1 %v3305_v58 }
 0x6e4   : > { %3308 = vmatpush1.bf16.msra.mxu1 %v3307_v17 }
 0x6e5   : > { %3310 = vmatprep.subr.bf16.mxu1 %v3309_v34 }
 0x6e8   : > { %3312 = vmatpush1.bf16.msra.mxu1 %v3311_v41 }
 0x6e9   : > { %3314 = vmatprep.subr.bf16.mxu1 %v3313_v22 }
 0x6ec   : > { %3316 = vmatpush1.bf16.msra.mxu1 %v3315_v15 }
 0x6ed   : > { %3318 = vmatprep.subr.bf16.mxu1 %v3317_v50 }
 0x6f0   : > { %3320 = vmatpush1.bf16.msra.mxu1 %v3319_v35 }
 0x730   : > { %v2073_v31 = vpop.xlane.xlu1 %2072 }
 0x731   : > { %3534 = vrcp.f32 %v2073_v31  ;;  %v2070_v16 = vpop.xlane.xlu0 %2069 }
 0x732   : > { %3536 = vrcp.f32 %v2070_v16 }
 0x73b   : > { %v3535_v61 = vpop.eup %3534 }
 0x73c   : > { %v3537_v7 = vpop.eup %3536  ;;  %v2077_v18 = vmul.f32 %v3535_v61, %v5410_v0  ;;  %v2223_v0 = vld [vmem:[%s5686_s7] sm:$0x3] }
 0x73d   : > { %v2075_v57 = vmul.f32 %v3537_v7, %v5412_v55  ;;  %v5703_v55 = vld [vmem:[#allocation5_spill] sm:$0xff]  ;;  %v2232_v38 = vrot.slane %v2223_v0, %v5704_v51 }
 0x73e   : > { %v2228_v59 = vrot.slane %v2223_v0, %v5703_v55 }
 0x73f   : > { %2838 = vmatprep.mubr.msk.f32.mxu0 %vm1655_vm0, %v2075_v57 }
 0x740   : > { %2839 = vmatmul.mubr.msk.f32.vlgmr.msra.gmra.mrb[26].mxu0 %vm1655_vm0, %v2077_v18 }
 0x813   : > { %v2840_v19 = vpop.f32.mrb[26].mxu0 }
 0x814   : > { %v2150_v11 = vpop.f32.mrb[27].mxu0 }
 0x815   : > { %2299 = vmatprep.mubr.f32.mxu1 %v2150_v11 }
 0x816   : > { %2300 = vmatmul.mubr.f32.vlgmr.msra.gmra.mrb[20].mxu1 %v5398_v45 }
 0x817   : > { %2305 = vmatprep.mubr.f32.mxu1 %v2840_v19 }
 0x81a   : > { %2306 = vmatmul.mubr.f32.gmra.mrb[22].mxu1 %v5396_v5 }
 0x8e9   : > { %v2301_v33 = vpop.f32.mrb[20].mxu1 }
 0x8ea   : > { %v2302_v8 = vadd.f32 %v2301_v33, %v2228_v59  ;;  %v2303_v54 = vpop.f32.mrb[21].mxu1 }
 0x8eb   : > { %v2304_v45 = vadd.f32 %v2303_v54, %v2232_v38 }
 0x8ec   : > { %2312 = vst [vmem:[%s328_s22] sm:$0xff] %v2302_v8 }
 0x8ed   : > { %2313 = vst [vmem:[%s328_s22 + $0x8] sm:$0xff] %v2304_v45  ;;  %v2307_v5 = vpop.f32.mrb[22].mxu1 }
 0x8ee   : > { %v2308_v63 = vadd.f32 %v2307_v5, %v2228_v59  ;;  %v2309_v36 = vpop.f32.mrb[23].mxu1 }
 0x8ef   : > { %v2310_v49 = vadd.f32 %v2309_v36, %v2232_v38 }
 0x8f0   : > { %2314 = vst [vmem:[%s328_s22 + $0x10] sm:$0xff] %v2308_v63 }
 0x8f1   : > { %2315 = vst [vmem:[%s328_s22 + $0x18] sm:$0xff] %v2310_v49 }
 0x8f2   : > { %3551 = shalt.err (!%p3548_p3)
}
 0x8f3   : > { %s3552_s18 = scalar_lea.hbm %s5636_s10, 512  ;;  %s3556_s22 = scalar_lea.hbm %s5687_s8, 1024 }
 0x8f4   : > { %p3553_p4 = scmp.ne.s32.totalorder %s5636_s10, %s3552_s18  ;;  %p3557_p9 = scmp.lt.u32.totalorder %s5636_s10, %s5687_s8 }
 0x8f5   : > { %p3558_p10 = scmp.lt.u32.totalorder %s3556_s22, %s3552_s18  ;;  %p3560_p12 = scmp.lt.u32.totalorder %s3552_s18, %s5636_s10 }
 0x8f6   : > { %p3554_p7 = pnand %p3553_p4, %p3688_p5 }
 0x8f7   : > { %p3559_p11 = por %p3558_p10, %p3557_p9 }
 0x8f8   : > { %p3555_p8 = pneg %p3554_p7 }
 0x8f9   : > { %p3561_p13 = por %p3560_p12, %p3559_p11 }
 0x8fb   : > { %p3562_p0 = pnand %p3561_p13, %p3555_p8 }
 0x8fd   : > { %3565 = shalt.err (!%p3562_p0)
}
 0x8fe   : > { %s3603_s25 = smov 256   ;;  %s3604_s9 = smov 16  }
 0x8ff   : > { %3321 = dma.vmem_to_hbm [thread:$0]  (%p3688_p5), %s5631_s23, 512, %s5636_s10, %s5638_s12, %s3603_s25, %s3603_s25, %s3604_s9  }
 0x900 PF: > { %p3327_p1 = scmp.ge.s32.totalorder %s3600_s30, 2  ;;  %s2345_s13 = sand.u32 1, %s3588_s27  }
 0x901   : > { %s2346_s17 = scalar_lea.sflag [#allocation3], %s2345_s13 }
 0x902   : > { %p3324_p2 = pnand %p3327_p1, %p3692_p6 }
 0x904   : > { %3583 = dma.done.wait (!%p3324_p2), %s2346_s17, 512  }
 0x905   : > { %3585 = vsyncadd (!%p3324_p2), %s2346_s17, 4294966784  ;;  %p18_p3 = scmp.ge.s32.totalorder %s3675_s11, 4   ;;  %s5705_s27 = smov %s3592_s28 }
 0x906   : > { %s5706_s28 = smov %s3596_s29  ;;  %s5707_s29 = smov %s3686_s14 }
 0x907   : > { %s5708_s30 = smov %s3675_s11  ;;  %20 = sbr.rel (!%p18_p3) target bundleno = 3 (0x3), region = 105 }
 0x90e   :  { %2351 = vsyncpa [#allocation3], 1 }
 0x90f   :  { %2353 = vsyncpa [#allocation3 + $0x1], 1 }

</bundles_post_ra>
